<compile_context>
chip_gen: v5e
topology: v5e:2x2
jax: 0.10.0
libtpu: 0.0.40
codegen_flags: <defaults>
</compile_context>

<pallas_src>
import functools
import numpy as np

import jax
import jax.numpy as jnp
from jax.experimental import pallas as pl
from jax.experimental.pallas import tpu as pltpu

# ----------------------------- hyper-parameters (small demo) -----------------------------
HIDDEN = 128
NUM_HEADS = 8
HEAD_DIM = HIDDEN // NUM_HEADS
LMAX = 2
L_DIM = (LMAX + 1) ** 2 - 1          # 8
NUM_RBF = 32
NUM_LAYERS = 2
CUTOFF = 5.0
MAX_Z = 10
LN_EPS = 1e-5
# max_num_edges_save = 0 -> the four-body branch and its MLP are disabled (valid config).
MAX_NUM_EDGES_SAVE = 0

# ----------------------------- tile sizes -----------------------------
# Chosen to fit comfortably inside the default scoped-VMEM limit on all generations
# (v5e 16 MiB / v6e,v7x 32 MiB) with double buffering.  On v5e/v6e (128 MiB VMEM) these can
# be raised to 256-512 for deeper DMA pipelining; keep <=256 on v7x (64 MiB VMEM).
NODE_TILE = 128       # node-tile rows (node kernels + aggregation output tile)
EDGE_TILE = 128       # edge rows per fused-edge-kernel grid step
MOL_TILE = 8          # molecules per attention grid step
ATTN_TILE = MOL_TILE * NUM_HEADS   # (molecule, head) rows per attention grid step

_PAR = pltpu.CompilerParams(dimension_semantics=("parallel",))


def _round_up(v, m):
    return ((v + m - 1) // m) * m


# ============================= Pallas kernels =============================
def _layernorm_kernel(x_ref, g_ref, b_ref, o_ref):
    x = x_ref[...].astype(jnp.float32)
    mu = jnp.mean(x, axis=-1, keepdims=True)
    var = jnp.mean((x - mu) ** 2, axis=-1, keepdims=True)
    o_ref[...] = ((x - mu) * jax.lax.rsqrt(var + LN_EPS) * g_ref[...] + b_ref[...]).astype(o_ref.dtype)


def layernorm_pallas(x, gamma, beta):
    n, h = x.shape
    return pl.pallas_call(
        _layernorm_kernel,
        grid=(n // NODE_TILE,),
        in_specs=[pl.BlockSpec((NODE_TILE, h), lambda i: (i, 0)),
                  pl.BlockSpec((1, h), lambda i: (0, 0)),
                  pl.BlockSpec((1, h), lambda i: (0, 0))],
        out_specs=pl.BlockSpec((NODE_TILE, h), lambda i: (i, 0)),
        out_shape=jax.ShapeDtypeStruct((n, h), jnp.float32),
        compiler_params=_PAR,
    )(x, gamma.reshape(1, h), beta.reshape(1, h))


def _node_prep_kernel(x_ref, vec_ref, g_ref, b_ref, wvec_ref, wqkv_ref,
                      qkv_ref, vsum_ref, vec3_ref):
    # LayerNorm(x), fused QKV projection (hoisted out of the attention kernel),
    # and vec_proj(vec) -> (sum over L of vec1, vec3).
    tn, l, h = vec_ref.shape
    x = x_ref[...].astype(jnp.float32)
    mu = jnp.mean(x, axis=-1, keepdims=True)
    var = jnp.mean((x - mu) ** 2, axis=-1, keepdims=True)
    xln = (x - mu) * jax.lax.rsqrt(var + LN_EPS) * g_ref[...] + b_ref[...]
    qkv_ref[...] = jnp.dot(xln.astype(jnp.bfloat16), wqkv_ref[...],
                           preferred_element_type=jnp.float32)

    vec2d = vec_ref[...].astype(jnp.float32).reshape(tn * l, h).astype(jnp.bfloat16)
    vp = jnp.dot(vec2d, wvec_ref[...], preferred_element_type=jnp.float32).reshape(tn, l, 2 * h)
    vsum_ref[...] = jnp.sum(vp[:, :, :h], axis=1)
    vec3_ref[...] = vp[:, :, h:]


def node_prep_pallas(x, vec, lp):
    n, h = x.shape
    l = vec.shape[1]
    return pl.pallas_call(
        _node_prep_kernel,
        grid=(n // NODE_TILE,),
        in_specs=[pl.BlockSpec((NODE_TILE, h), lambda i: (i, 0)),
                  pl.BlockSpec((NODE_TILE, l, h), lambda i: (i, 0, 0)),
                  pl.BlockSpec((1, h), lambda i: (0, 0)),
                  pl.BlockSpec((1, h), lambda i: (0, 0)),
                  pl.BlockSpec((h, 2 * h), lambda i: (0, 0)),
                  pl.BlockSpec((h, 3 * h), lambda i: (0, 0))],
        out_specs=(pl.BlockSpec((NODE_TILE, 3 * h), lambda i: (i, 0)),
                   pl.BlockSpec((NODE_TILE, h), lambda i: (i, 0)),
                   pl.BlockSpec((NODE_TILE, l, h), lambda i: (i, 0, 0))),
        out_shape=(jax.ShapeDtypeStruct((n, 3 * h), jnp.float32),
                   jax.ShapeDtypeStruct((n, h), jnp.float32),
                   jax.ShapeDtypeStruct((n, l, h), jnp.float32)),
        compiler_params=_PAR,
    )(x, vec, lp['ln_g'].reshape(1, h), lp['ln_b'].reshape(1, h), lp['w_vec'], lp['w_qkv'])


def _attn_kernel(q_ref, k_ref, v_ref, mask_ref, invc_ref, o_ref):
    # TODO(synk): exact ManyBodyPadAttn source not provided; modeled as masked multi-head
    # attention whose softmax-weighted values are averaged over the *valid* key dimension
    # (the reference does `.mean(dim=2)` on the padded tensor).
    scale = 1.0 / (HEAD_DIM ** 0.5)
    q = (q_ref[...] * scale).astype(jnp.bfloat16)      # scale folded into q
    k = k_ref[...].astype(jnp.bfloat16)
    v = v_ref[...].astype(jnp.bfloat16)
    s = jnp.einsum('bqd,bkd->bqk', q, k, preferred_element_type=jnp.float32)
    s = s + (1.0 - mask_ref[...])[:, None, :] * (-1e9)
    w = jax.nn.softmax(s, axis=-1)
    o = jnp.einsum('bqk,bkd->bqd', w.astype(jnp.bfloat16), v, preferred_element_type=jnp.float32)
    o_ref[...] = (o * invc_ref[...][:, :, None]).astype(o_ref.dtype)


def attention_pallas(q, k, v, mask, invc):
    bh, s, hd = q.shape
    return pl.pallas_call(
        _attn_kernel,
        grid=(bh // ATTN_TILE,),
        in_specs=[pl.BlockSpec((ATTN_TILE, s, hd), lambda i: (i, 0, 0)),
                  pl.BlockSpec((ATTN_TILE, s, hd), lambda i: (i, 0, 0)),
                  pl.BlockSpec((ATTN_TILE, s, hd), lambda i: (i, 0, 0)),
                  pl.BlockSpec((ATTN_TILE, s), lambda i: (i, 0)),
                  pl.BlockSpec((ATTN_TILE, 1), lambda i: (i, 0))],
        out_specs=pl.BlockSpec((ATTN_TILE, s, hd), lambda i: (i, 0, 0)),
        out_shape=jax.ShapeDtypeStruct((bh, s, hd), jnp.float32),
        compiler_params=_PAR,
    )(q, k, v, mask, invc)


def _edge_fused_kernel(blk_tile_ref, blk_first_ref, *refs, last):
    # Fused: message() + segment-sum aggregation (scatter-add via one-hot matmul into the
    # VMEM-resident destination node tile) + edge_update() for non-last layers.
    if last:
        (dloc_ref, v_ref, f_ref, vecs_ref, r_ref, d_ref,
         wdv_ref, bdv_ref, ws_ref, bs_ref,
         xagg_ref, vagg_ref) = refs
    else:
        (dloc_ref, v_ref, f_ref, vecs_ref, r_ref, d_ref,
         wdv_ref, bdv_ref, ws_ref, bs_ref,
         vecd_ref, wtrg_ref, wsrc_ref, wf_ref, bf_ref,
         xagg_ref, vagg_ref, df_ref) = refs

    eb = pl.program_id(0)
    te, h = v_ref.shape
    l = d_ref.shape[1]
    tn = xagg_ref.shape[0]

    f = f_ref[...]
    v = v_ref[...]
    r = r_ref[...]
    d = d_ref[...]

    # ---- message (self-loop edges are included with cutoff(0)=1, as in the reference) ----
    dv = jax.nn.silu(jnp.dot(f.astype(jnp.bfloat16), wdv_ref[...],
                             preferred_element_type=jnp.float32) + bdv_ref[...])
    cut = 0.5 * (jnp.cos(r * (jnp.pi / CUTOFF)) + 1.0) * (r < CUTOFF).astype(jnp.float32)
    vj = v * cut * dv
    s = jax.nn.silu(jnp.dot(vj.astype(jnp.bfloat16), ws_ref[...],
                            preferred_element_type=jnp.float32) + bs_ref[...])
    s1 = s[:, :h]
    s2 = s[:, h:]

    # ---- fused segment-sum: one-hot over local destination index, matmul-scatter ----
    dloc = dloc_ref[...]                                              # [TE,1]; -1 => padding edge
    node_ids = jax.lax.broadcasted_iota(jnp.int32, (te, tn), 1)
    onehot = (dloc == node_ids).astype(jnp.bfloat16)                  # padding rows -> all-zero
    dnums = (((0,), (0,)), ((), ()))
    cx = jax.lax.dot_general(onehot, vj.astype(jnp.bfloat16), dnums,
                             preferred_element_type=jnp.float32)      # [TN,H]

    @pl.when(blk_first_ref[eb] == 1)
    def _init():
        xagg_ref[...] = jnp.zeros_like(xagg_ref)
        vagg_ref[...] = jnp.zeros_like(vagg_ref)

    xagg_ref[...] += cx

    vec_src = vecs_ref[...].astype(jnp.float32)                       # [TE,L,H]
    for li in range(l):
        msg_l = vec_src[:, li, :] * s1 + s2 * d[:, li:li + 1]
        cv_l = jax.lax.dot_general(onehot, msg_l.astype(jnp.bfloat16), dnums,
                                   preferred_element_type=jnp.float32)
        vagg_ref[:, li, :] += cv_l

    if not last:
        # ---- edge_update: vector-rejection dot + f_proj gate ----
        vec_dst = vecd_ref[...].astype(jnp.float32)
        w1 = jnp.dot(vec_dst.reshape(te * l, h).astype(jnp.bfloat16), wtrg_ref[...],
                     preferred_element_type=jnp.float32).reshape(te, l, h)
        w2 = jnp.dot(vec_src.reshape(te * l, h).astype(jnp.bfloat16), wsrc_ref[...],
                     preferred_element_type=jnp.float32).reshape(te, l, h)
        dd = d[:, :, None]
        w1r = w1 - jnp.sum(w1 * dd, axis=1, keepdims=True) * dd           # rejection(w1,  d)
        nd = -dd
        w2r = w2 - jnp.sum(w2 * nd, axis=1, keepdims=True) * nd           # rejection(w2, -d)
        wdot = jnp.sum(w1r * w2r, axis=1)                                 # [TE,H]
        fp = jax.nn.silu(jnp.dot(f.astype(jnp.bfloat16), wf_ref[...],
                                 preferred_element_type=jnp.float32) + bf_ref[...])
        valid = (dloc >= 0).astype(jnp.float32)                           # zero padding edges
        df_ref[...] = fp * wdot * valid


def edge_fused_pallas(lp, dst_local, v_e, f_e, vec_src, r_e, d_e, vec_dst,
                      blk_tile, blk_first, n_pad, last):
    e_pad, h = v_e.shape
    l = vec_src.shape[1]
    nb = e_pad // EDGE_TILE

    def emap(i, bt, bf):
        return (i, 0)

    def emap3(i, bt, bf):
        return (i, 0, 0)

    def wmap(i, bt, bf):
        return (0, 0)

    def xagg_map(i, bt, bf):
        return (bt[i], 0)

    def vagg_map(i, bt, bf):
        return (bt[i], 0, 0)

    in_specs = [
        pl.BlockSpec((EDGE_TILE, 1), emap),            # dst_local (within node tile; -1 = pad)
        pl.BlockSpec((EDGE_TILE, h), emap),            # v[src]
        pl.BlockSpec((EDGE_TILE, h), emap),            # f_ij
        pl.BlockSpec((EDGE_TILE, l, h), emap3),        # vec[src]  (bf16)
        pl.BlockSpec((EDGE_TILE, 1), emap),            # r_ij
        pl.BlockSpec((EDGE_TILE, l), emap),            # d_ij
        pl.BlockSpec((h, h), wmap),                    # w_dv
        pl.BlockSpec((1, h), wmap),                    # b_dv
        pl.BlockSpec((h, 2 * h), wmap),                # w_s
        pl.BlockSpec((1, 2 * h), wmap),                # b_s
    ]
    args = [dst_local, v_e, f_e, vec_src, r_e, d_e,
            lp['w_dv'], lp['b_dv'].reshape(1, h), lp['w_s'], lp['b_s'].reshape(1, 2 * h)]
    out_specs = [pl.BlockSpec((NODE_TILE, h), xagg_map),
                 pl.BlockSpec((NODE_TILE, l, h), vagg_map)]
    out_shape = [jax.ShapeDtypeStruct((n_pad, h), jnp.float32),
                 jax.ShapeDtypeStruct((n_pad, l, h), jnp.float32)]
    if not last:
        in_specs += [pl.BlockSpec((EDGE_TILE, l, h), emap3),   # vec[dst] (bf16)
                     pl.BlockSpec((h, h), wmap),               # w_trg
                     pl.BlockSpec((h, h), wmap),               # w_src
                     pl.BlockSpec((h, h), wmap),               # w_f
                     pl.BlockSpec((1, h), wmap)]               # b_f
        args += [vec_dst, lp['w_trg'], lp['w_src'], lp['w_f'], lp['b_f'].reshape(1, h)]
        out_specs.append(pl.BlockSpec((EDGE_TILE, h), emap))
        out_shape.append(jax.ShapeDtypeStruct((e_pad, h), jnp.float32))

    return pl.pallas_call(
        functools.partial(_edge_fused_kernel, last=last),
        grid_spec=pltpu.PrefetchScalarGridSpec(
            num_scalar_prefetch=2,
            grid=(nb,),
            in_specs=in_specs,
            out_specs=tuple(out_specs)),
        out_shape=tuple(out_shape),
        compiler_params=pltpu.CompilerParams(
            dimension_semantics=("arbitrary",),           # sequential accumulation into node tiles
            vmem_limit_bytes=32 * 1024 * 1024),
    )(blk_tile, blk_first, *args)


def _node_update_kernel(xa_ref, va_ref, vsum_ref, vec3_ref, wo_ref, bo_ref, dx_ref, dvec_ref):
    h = xa_ref.shape[-1]
    o = jnp.dot(xa_ref[...].astype(jnp.bfloat16), wo_ref[...],
                preferred_element_type=jnp.float32) + bo_ref[...]
    o1 = o[:, :h]
    o2 = o[:, h:2 * h]
    o3 = o[:, 2 * h:]
    dx_ref[...] = vsum_ref[...] * o2 + o3
    dvec_ref[...] = vec3_ref[...] * o1[:, None, :] + va_ref[...]


def node_update_pallas(x_agg, vec_agg, vsum, vec3, lp):
    n, h = x_agg.shape
    l = vec_agg.shape[1]
    return pl.pallas_call(
        _node_update_kernel,
        grid=(n // NODE_TILE,),
        in_specs=[pl.BlockSpec((NODE_TILE, h), lambda i: (i, 0)),
                  pl.BlockSpec((NODE_TILE, l, h), lambda i: (i, 0, 0)),
                  pl.BlockSpec((NODE_TILE, h), lambda i: (i, 0)),
                  pl.BlockSpec((NODE_TILE, l, h), lambda i: (i, 0, 0)),
                  pl.BlockSpec((h, 3 * h), lambda i: (0, 0)),
                  pl.BlockSpec((1, 3 * h), lambda i: (0, 0))],
        out_specs=(pl.BlockSpec((NODE_TILE, h), lambda i: (i, 0)),
                   pl.BlockSpec((NODE_TILE, l, h), lambda i: (i, 0, 0))),
        out_shape=(jax.ShapeDtypeStruct((n, h), jnp.float32),
                   jax.ShapeDtypeStruct((n, l, h), jnp.float32)),
        compiler_params=_PAR,
    )(x_agg, vec_agg, vsum, vec3, lp['w_o'], lp['b_o'].reshape(1, 3 * h))


# ============================= plain-JAX glue =============================
def cosine_cutoff(d):
    return 0.5 * (jnp.cos(jnp.pi * d / CUTOFF) + 1.0) * (d < CUTOFF).astype(jnp.float32)


def expnorm_rbf(dist):
    alpha = 5.0 / CUTOFF
    means = jnp.linspace(float(np.exp(-CUTOFF)), 1.0, NUM_RBF)
    betas = jnp.full((NUM_RBF,), (2.0 / NUM_RBF * (1.0 - float(np.exp(-CUTOFF)))) ** -2)
    d = dist[:, None]
    return cosine_cutoff(dist)[:, None] * jnp.exp(-betas * (jnp.exp(alpha * (-d)) - means) ** 2)


def sphere_l2(v):
    # ViSNet-style real spherical harmonics up to l=2 (8 components)
    x, y, z = v[:, 0], v[:, 1], v[:, 2]
    s3 = 3.0 ** 0.5
    return jnp.stack([x, y, z,
                      s3 * x * z, s3 * x * y,
                      y * y - 0.5 * (x * x + z * z),
                      s3 * y * z, (s3 / 2.0) * (z * z - x * x)], axis=-1)


def neighbor_embedding(p, z, x, src, dst, edge_weight, edge_attr, num_nodes):
    mask = (src != dst).astype(jnp.float32)
    c = cosine_cutoff(edge_weight)
    w = (edge_attr @ p['w_dist'] + p['b_dist']) * (c * mask)[:, None]
    x_nbr = p['embedding'][z]
    agg = jax.ops.segment_sum(x_nbr[src] * w, dst, num_segments=num_nodes)
    return jnp.concatenate([x, agg], axis=1) @ p['w_comb'] + p['b_comb']


# ----------------------------- host-side schedules (numpy) -----------------------------
def build_molecule_padding(counts):
    # TODO(synk): get_feats_with_padding source not provided; zero-pad nodes per molecule
    # to a sublane-friendly slot count and pad the batch to a MOL_TILE multiple.
    b = len(counts)
    s_pad = max(_round_up(max(counts), 8), 8)
    b_pad = max(_round_up(b, MOL_TILE), MOL_TILE)
    gather = np.zeros((b_pad, s_pad), np.int32)
    mask = np.zeros((b_pad, s_pad), np.float32)
    scatter = np.zeros((int(sum(counts)),), np.int32)
    off = 0
    for i, c in enumerate(counts):
        gather[i, :c] = np.arange(off, off + c, dtype=np.int32)
        mask[i, :c] = 1.0
        scatter[off:off + c] = i * s_pad + np.arange(c, dtype=np.int32)
        off += c
    inv_cnt = (1.0 / np.maximum(mask.sum(axis=1), 1.0)).astype(np.float32)
    return gather, mask, scatter, inv_cnt, s_pad, b_pad


def build_edge_blocks(src, dst, n_pad):
    # Group edges by destination node tile, pad each group to an EDGE_TILE multiple
    # (>= one block so every node-tile output is written), and emit block metadata
    # for the scalar-prefetch driven aggregation.
    num_tiles = n_pad // NODE_TILE
    perm_l, dloc_l, btile_l, bfirst_l = [], [], [], []
    for t in range(num_tiles):
        lo, hi = t * NODE_TILE, (t + 1) * NODE_TILE
        idx = np.nonzero((dst >= lo) & (dst < hi))[0].astype(np.int32)
        n_real_e = idx.shape[0]
        n_padded = max(_round_up(max(n_real_e, 1), EDGE_TILE), EDGE_TILE)
        perm_t = np.zeros((n_padded,), np.int32)
        perm_t[:n_real_e] = idx
        dloc_t = np.full((n_padded,), -1, np.int32)
        dloc_t[:n_real_e] = (dst[idx] - lo).astype(np.int32)
        perm_l.append(perm_t)
        dloc_l.append(dloc_t)
        nblk = n_padded // EDGE_TILE
        btile_l += [t] * nblk
        bfirst_l += [1] + [0] * (nblk - 1)
    return (np.concatenate(perm_l), np.concatenate(dloc_l),
            np.asarray(btile_l, np.int32), np.asarray(bfirst_l, np.int32))


# ----------------------------- forward -----------------------------
def mabnet_forward(params, z, pos, edge_index_np, counts):
    src_np = np.asarray(edge_index_np[0], np.int32)
    dst_np = np.asarray(edge_index_np[1], np.int32)
    n_real = int(pos.shape[0])
    n_pad = max(_round_up(n_real, NODE_TILE), NODE_TILE)

    # host-side schedules (shapes depend only on graph structure)
    mol_gather_np, mol_mask_np, mol_scatter_np, inv_cnt_np, s_pad, b_pad = build_molecule_padding(counts)
    perm_np, dst_local_np, blk_tile_np, blk_first_np = build_edge_blocks(src_np, dst_np, n_pad)

    mol_gather = jnp.asarray(mol_gather_np)
    mol_scatter = jnp.asarray(mol_scatter_np)
    mask_bh = jnp.asarray(np.repeat(mol_mask_np, NUM_HEADS, axis=0))            # [B_pad*NH, S]
    invc_bh = jnp.asarray(np.repeat(inv_cnt_np[:, None], NUM_HEADS, axis=0))    # [B_pad*NH, 1]

    perm = jnp.asarray(perm_np)
    src_p = jnp.asarray(src_np[perm_np])
    dst_p = jnp.asarray(dst_np[perm_np])
    dst_local = jnp.asarray(dst_local_np[:, None])
    edge_valid = jnp.asarray((dst_local_np >= 0).astype(np.float32))[:, None]
    blk_tile = jnp.asarray(blk_tile_np)
    blk_first = jnp.asarray(blk_first_np)

    src = jnp.asarray(src_np)
    dst = jnp.asarray(dst_np)

    # ---- plain-JAX featurization on the original edge list ----
    x = params['embedding'][z]
    edge_vec = pos[src] - pos[dst]
    loop_mask = src != dst
    norm = jnp.sqrt(jnp.sum(edge_vec ** 2, axis=-1))
    edge_weight = jnp.where(loop_mask, norm, 0.0)
    edge_attr = expnorm_rbf(edge_weight)                        # [E, num_rbf]
    safe_norm = jnp.where(loop_mask, norm, 1.0)
    edge_vec = jnp.where(loop_mask[:, None], edge_vec / safe_norm[:, None], edge_vec)
    d_ij = sphere_l2(edge_vec)                                  # [E, L]
    x = neighbor_embedding(params['ne'], z, x, src, dst, edge_weight, edge_attr, n_real)
    f_ij = (x[src] + x[dst]) * (edge_attr @ params['ee']['w_edge'] + params['ee']['b_edge'])

    # ---- permute / pad per-edge tensors once (fixed across layers) ----
    r_p = edge_weight[perm][:, None]
    d_p = d_ij[perm]
    f_p = f_ij[perm] * edge_valid

    # ---- pad node tensors to the node-tile multiple ----
    x = jnp.pad(x, ((0, n_pad - n_real), (0, 0)))
    vec = jnp.zeros((n_pad, L_DIM, HIDDEN), jnp.float32)

    bh = b_pad * NUM_HEADS

    for lp in params['layers']:
        # LayerNorm + QKV + vec_proj (VecLayerNorm('none', non-trainable) == identity)
        qkv, vsum, vec3 = node_prep_pallas(x, vec, lp)

        # ---- many-body attention: molecules padded, heads folded into the batch axis ----
        qkv_mol = qkv[mol_gather]                                      # [B_pad, S, 3H]

        def _split_heads(t):
            return (t.reshape(b_pad, s_pad, NUM_HEADS, HEAD_DIM)
                     .transpose(0, 2, 1, 3).reshape(bh, s_pad, HEAD_DIM))

        qh = _split_heads(qkv_mol[..., :HIDDEN])
        kh = _split_heads(qkv_mol[..., HIDDEN:2 * HIDDEN])
        vh = _split_heads(qkv_mol[..., 2 * HIDDEN:])
        o_bh = attention_pallas(qh, kh, vh, mask_bh, invc_bh)          # [BH, S, HD]
        o_flat = (o_bh.reshape(b_pad, NUM_HEADS, s_pad, HEAD_DIM)
                      .transpose(0, 2, 1, 3).reshape(b_pad * s_pad, HIDDEN))
        v_nodes = o_flat[mol_scatter]                                  # [N_real, H]

        # ---- per-edge gathers (bf16 for the big [E,L,H] tensors) ----
        # TODO(synk): gathers left to XLA; could become in-kernel DMA gathers with pl.ANY refs.
        v_e = v_nodes[src_p]                                           # [E_pad, H]
        vec_src = vec[src_p].astype(jnp.bfloat16)                      # [E_pad, L, H]
        if lp['last']:
            x_agg, vec_agg = edge_fused_pallas(lp, dst_local, v_e, f_p, vec_src, r_p, d_p,
                                               None, blk_tile, blk_first, n_pad, last=True)
            df = None
        else:
            vec_dst = vec[dst_p].astype(jnp.bfloat16)
            x_agg, vec_agg, df = edge_fused_pallas(lp, dst_local, v_e, f_p, vec_src, r_p, d_p,
                                                   vec_dst, blk_tile, blk_first, n_pad, last=False)

        dx, dvec = node_update_pallas(x_agg, vec_agg, vsum, vec3, lp)
        x = x + dx
        vec = vec + dvec
        if df is not None:
            f_p = f_p + df

    x = layernorm_pallas(x, params['out_g'], params['out_b'])
    # vec_out_norm: VecLayerNorm('none', non-trainable) == identity
    return x[:n_real], vec[:n_real]


# ----------------------------- deterministic parameter init -----------------------------
def _xavier(key, shape):
    lim = float(np.sqrt(6.0 / (shape[0] + shape[-1])))
    return jax.random.uniform(key, shape, jnp.float32, -lim, lim)


def init_params(key):
    keys = iter(jax.random.split(key, 128))
    bf = lambda a: a.astype(jnp.bfloat16)
    p = {}
    p['embedding'] = jax.random.normal(next(keys), (MAX_Z, HIDDEN), jnp.float32) * 0.1
    p['ne'] = dict(
        embedding=jax.random.normal(next(keys), (MAX_Z, HIDDEN), jnp.float32) * 0.1,
        w_dist=_xavier(next(keys), (NUM_RBF, HIDDEN)), b_dist=jnp.zeros((HIDDEN,)),
        w_comb=_xavier(next(keys), (2 * HIDDEN, HIDDEN)), b_comb=jnp.zeros((HIDDEN,)),
    )
    p['ee'] = dict(w_edge=_xavier(next(keys), (NUM_RBF, HIDDEN)), b_edge=jnp.zeros((HIDDEN,)))
    layers = []
    for li in range(NUM_LAYERS):
        last = (li == NUM_LAYERS - 1)
        w_qkv = jnp.concatenate([_xavier(next(keys), (HIDDEN, HIDDEN)) for _ in range(3)], axis=1)
        lp = dict(
            last=last,
            ln_g=jnp.ones((HIDDEN,)), ln_b=jnp.zeros((HIDDEN,)),
            w_vec=bf(_xavier(next(keys), (HIDDEN, 2 * HIDDEN))),
            w_qkv=bf(w_qkv),
            w_dv=bf(_xavier(next(keys), (HIDDEN, HIDDEN))), b_dv=jnp.zeros((HIDDEN,)),
            w_s=bf(_xavier(next(keys), (HIDDEN, 2 * HIDDEN))), b_s=jnp.zeros((2 * HIDDEN,)),
            w_o=bf(_xavier(next(keys), (HIDDEN, 3 * HIDDEN))), b_o=jnp.zeros((3 * HIDDEN,)),
        )
        if not last:
            lp.update(
                w_f=bf(_xavier(next(keys), (HIDDEN, HIDDEN))), b_f=jnp.zeros((HIDDEN,)),
                w_trg=bf(_xavier(next(keys), (HIDDEN, HIDDEN))),
                w_src=bf(_xavier(next(keys), (HIDDEN, HIDDEN))),
            )
        layers.append(lp)
    p['layers'] = layers
    p['out_g'] = jnp.ones((HIDDEN,))
    p['out_b'] = jnp.zeros((HIDDEN,))
    return p


# ----------------------------- main -----------------------------
if __name__ == "__main__":
    key = jax.random.PRNGKey(0)
    kz, kp, kpar = jax.random.split(key, 3)

    counts = [4, 4]                               # 2 molecules x 4 atoms
    n_nodes = sum(counts)
    z = jax.random.randint(kz, (n_nodes,), 1, MAX_Z)
    pos = jax.random.uniform(kp, (n_nodes, 3), jnp.float32, 0.0, 2.0)

    # TODO(synk): radius_graph construction is host-side glue; with this small box and
    # cutoff=5.0 it equals the complete per-molecule graph with self loops (loop=True).
    edges = []
    off = 0
    for c in counts:
        for i in range(off, off + c):
            for j in range(off, off + c):
                edges.append((j, i))              # (source, target)
        off += c
    edge_index = np.asarray(edges, dtype=np.int32).T   # [2, E]

    params = init_params(kpar)
    x_out, vec_out = mabnet_forward(params, z, pos, edge_index, counts)
    jax.block_until_ready((x_out, vec_out))

    assert x_out.shape == (n_nodes, HIDDEN)
    assert vec_out.shape == (n_nodes, L_DIM, HIDDEN)
    assert bool(jnp.all(jnp.isfinite(x_out))) and bool(jnp.all(jnp.isfinite(vec_out)))
    print("KERNEL_OK")
</pallas_src>

<mosaic_0001>
module attributes {stable_mosaic.version = 11 : i64} {
  func.func @_node_prep_kernel(%arg0: i32, %arg1: memref<128x128xf32, #tpu.memory_space<vmem>>, %arg2: memref<128x8x128xf32, #tpu.memory_space<vmem>>, %arg3: memref<1x128xf32, #tpu.memory_space<vmem>>, %arg4: memref<1x128xf32, #tpu.memory_space<vmem>>, %arg5: memref<128x256xbf16, #tpu.memory_space<vmem>>, %arg6: memref<128x384xbf16, #tpu.memory_space<vmem>>, %arg7: memref<128x384xf32, #tpu.memory_space<vmem>>, %arg8: memref<128x128xf32, #tpu.memory_space<vmem>>, %arg9: memref<128x8x128xf32, #tpu.memory_space<vmem>>) attributes {dimension_semantics = [#tpu.dimension_semantics<parallel>], iteration_bounds = array<i64: 1>, scalar_prefetch = 0 : i64, scratch_operands = 0 : i64, tpu.core_type = #tpu.core_type<tc>, window_params = [{transform_indices = @transform_0, window_bounds = array<i64: 128, 128>}, {transform_indices = @transform_1, window_bounds = array<i64: 128, 8, 128>}, {pipeline_mode = #tpu.pipeline_mode<synchronous>, transform_indices = @transform_2, window_bounds = array<i64: 1, 128>}, {pipeline_mode = #tpu.pipeline_mode<synchronous>, transform_indices = @transform_3, window_bounds = array<i64: 1, 128>}, {pipeline_mode = #tpu.pipeline_mode<synchronous>, transform_indices = @transform_4, window_bounds = array<i64: 128, 256>}, {pipeline_mode = #tpu.pipeline_mode<synchronous>, transform_indices = @transform_5, window_bounds = array<i64: 128, 384>}, {transform_indices = @transform_6, window_bounds = array<i64: 128, 384>}, {transform_indices = @transform_7, window_bounds = array<i64: 128, 128>}, {transform_indices = @transform_8, window_bounds = array<i64: 128, 8, 128>}]} {
    %c0 = arith.constant 0 : index
    %c0_0 = arith.constant 0 : index
    %0 = vector.load %arg1[%c0, %c0_0] : memref<128x128xf32, #tpu.memory_space<vmem>>, vector<128x128xf32>
    %cst = arith.constant dense<0.000000e+00> : vector<128xf32>
    %1 = vector.multi_reduction <add>, %0, %cst [1] : vector<128x128xf32> to vector<128xf32>
    %2 = vector.shape_cast %1 : vector<128xf32> to vector<128x1xf32>
    %cst_1 = arith.constant 1.280000e+02 : f32
    %3 = vector.broadcast %cst_1 : f32 to vector<128x1xf32>
    %4 = arith.divf %2, %3 : vector<128x1xf32>
    %5 = vector.broadcast %4 : vector<128x1xf32> to vector<128x128xf32>
    %6 = arith.subf %0, %5 : vector<128x128xf32>
    %7 = arith.mulf %6, %6 : vector<128x128xf32>
    %cst_2 = arith.constant dense<0.000000e+00> : vector<128xf32>
    %8 = vector.multi_reduction <add>, %7, %cst_2 [1] : vector<128x128xf32> to vector<128xf32>
    %9 = vector.shape_cast %8 : vector<128xf32> to vector<128x1xf32>
    %cst_3 = arith.constant 1.280000e+02 : f32
    %10 = vector.broadcast %cst_3 : f32 to vector<128x1xf32>
    %11 = arith.divf %9, %10 : vector<128x1xf32>
    %12 = vector.broadcast %4 : vector<128x1xf32> to vector<128x128xf32>
    %13 = arith.subf %0, %12 : vector<128x128xf32>
    %cst_4 = arith.constant 9.99999974E-6 : f32
    %14 = vector.broadcast %cst_4 : f32 to vector<128x1xf32>
    %15 = arith.addf %11, %14 : vector<128x1xf32>
    %16 = math.rsqrt %15 : vector<128x1xf32>
    %17 = vector.broadcast %16 : vector<128x1xf32> to vector<128x128xf32>
    %18 = arith.mulf %13, %17 : vector<128x128xf32>
    %c0_5 = arith.constant 0 : index
    %c0_6 = arith.constant 0 : index
    %19 = vector.load %arg3[%c0_5, %c0_6] : memref<1x128xf32, #tpu.memory_space<vmem>>, vector<1x128xf32>
    %20 = vector.broadcast %19 : vector<1x128xf32> to vector<128x128xf32>
    %21 = arith.mulf %18, %20 : vector<128x128xf32>
    %c0_7 = arith.constant 0 : index
    %c0_8 = arith.constant 0 : index
    %22 = vector.load %arg4[%c0_7, %c0_8] : memref<1x128xf32, #tpu.memory_space<vmem>>, vector<1x128xf32>
    %23 = vector.broadcast %22 : vector<1x128xf32> to vector<128x128xf32>
    %24 = arith.addf %21, %23 : vector<128x128xf32>
    %25 = arith.truncf %24 : vector<128x128xf32> to vector<128x128xbf16>
    %c0_9 = arith.constant 0 : index
    %c0_10 = arith.constant 0 : index
    %26 = vector.load %arg6[%c0_9, %c0_10] : memref<128x384xbf16, #tpu.memory_space<vmem>>, vector<128x384xbf16>
    %cst_11 = arith.constant dense<0.000000e+00> : vector<128x384xf32>
    %27 = tpu.matmul %25, %26, %cst_11 {dimension_numbers = #tpu.dot_dimension_numbers<[1], [0], [0], [1], [0, 0, 1, 1], [], []>} : vector<128x128xbf16>, vector<128x384xbf16>, vector<128x384xf32> -> vector<128x384xf32>
    %c0_12 = arith.constant 0 : index
    %c0_13 = arith.constant 0 : index
    %28 = vector.load %arg7[%c0_12, %c0_13] : memref<128x384xf32, #tpu.memory_space<vmem>>, vector<128x384xf32>
    tpu.vector_store %arg7[%c0_12, %c0_13], %27 {strides = array<i32>} : memref<128x384xf32, #tpu.memory_space<vmem>>, vector<128x384xf32>,
    %c0_14 = arith.constant 0 : index
    %c0_15 = arith.constant 0 : index
    %c0_16 = arith.constant 0 : index
    %29 = vector.load %arg2[%c0_14, %c0_15, %c0_16] : memref<128x8x128xf32, #tpu.memory_space<vmem>>, vector<128x8x128xf32>
    %30 = vector.shape_cast %29 : vector<128x8x128xf32> to vector<1024x128xf32>
    %31 = arith.truncf %30 : vector<1024x128xf32> to vector<1024x128xbf16>
    %c0_17 = arith.constant 0 : index
    %c0_18 = arith.constant 0 : index
    %32 = vector.load %arg5[%c0_17, %c0_18] : memref<128x256xbf16, #tpu.memory_space<vmem>>, vector<128x256xbf16>
    %cst_19 = arith.constant dense<0.000000e+00> : vector<1024x256xf32>
    %33 = tpu.matmul %31, %32, %cst_19 {dimension_numbers = #tpu.dot_dimension_numbers<[1], [0], [0], [1], [0, 0, 1, 1], [], []>} : vector<1024x128xbf16>, vector<128x256xbf16>, vector<1024x256xf32> -> vector<1024x256xf32>
    %34 = vector.shape_cast %33 : vector<1024x256xf32> to vector<128x8x256xf32>
    %35 = vector.extract_strided_slice %34 {offsets = [0, 0, 0], sizes = [128, 8, 128], strides = [1, 1, 1]} : vector<128x8x256xf32> to vector<128x8x128xf32>
    %cst_20 = arith.constant dense<0.000000e+00> : vector<128x128xf32>
    %36 = vector.multi_reduction <add>, %35, %cst_20 [1] : vector<128x8x128xf32> to vector<128x128xf32>
    %c0_21 = arith.constant 0 : index
    %c0_22 = arith.constant 0 : index
    %37 = vector.load %arg8[%c0_21, %c0_22] : memref<128x128xf32, #tpu.memory_space<vmem>>, vector<128x128xf32>
    tpu.vector_store %arg8[%c0_21, %c0_22], %36 {strides = array<i32>} : memref<128x128xf32, #tpu.memory_space<vmem>>, vector<128x128xf32>,
    %38 = vector.extract_strided_slice %34 {offsets = [0, 0, 128], sizes = [128, 8, 128], strides = [1, 1, 1]} : vector<128x8x256xf32> to vector<128x8x128xf32>
    %c0_23 = arith.constant 0 : index
    %c0_24 = arith.constant 0 : index
    %c0_25 = arith.constant 0 : index
    %39 = vector.load %arg9[%c0_23, %c0_24, %c0_25] : memref<128x8x128xf32, #tpu.memory_space<vmem>>, vector<128x8x128xf32>
    tpu.vector_store %arg9[%c0_23, %c0_24, %c0_25], %38 {strides = array<i32>} : memref<128x8x128xf32, #tpu.memory_space<vmem>>, vector<128x8x128xf32>,
    return
  }
  func.func @transform_0(%arg0: i32) -> (i32, i32) {
    %c0_i32 = arith.constant 0 : i32
    %c0_i32_0 = arith.constant 0 : i32
    return %arg0, %c0_i32 : i32, i32
  }
  func.func @transform_1(%arg0: i32) -> (i32, i32, i32) {
    %c0_i32 = arith.constant 0 : i32
    %c0_i32_0 = arith.constant 0 : i32
    %c0_i32_1 = arith.constant 0 : i32
    return %arg0, %c0_i32, %c0_i32_0 : i32, i32, i32
  }
  func.func @transform_2(%arg0: i32) -> (i32, i32) {
    %c0_i32 = arith.constant 0 : i32
    %c0_i32_0 = arith.constant 0 : i32
    %c0_i32_1 = arith.constant 0 : i32
    return %c0_i32, %c0_i32_0 : i32, i32
  }
  func.func @transform_3(%arg0: i32) -> (i32, i32) {
    %c0_i32 = arith.constant 0 : i32
    %c0_i32_0 = arith.constant 0 : i32
    %c0_i32_1 = arith.constant 0 : i32
    return %c0_i32, %c0_i32_0 : i32, i32
  }
  func.func @transform_4(%arg0: i32) -> (i32, i32) {
    %c0_i32 = arith.constant 0 : i32
    %c0_i32_0 = arith.constant 0 : i32
    %c0_i32_1 = arith.constant 0 : i32
    return %c0_i32, %c0_i32_0 : i32, i32
  }
  func.func @transform_5(%arg0: i32) -> (i32, i32) {
    %c0_i32 = arith.constant 0 : i32
    %c0_i32_0 = arith.constant 0 : i32
    %c0_i32_1 = arith.constant 0 : i32
    return %c0_i32, %c0_i32_0 : i32, i32
  }
  func.func @transform_6(%arg0: i32) -> (i32, i32) {
    %c0_i32 = arith.constant 0 : i32
    %c0_i32_0 = arith.constant 0 : i32
    return %arg0, %c0_i32 : i32, i32
  }
  func.func @transform_7(%arg0: i32) -> (i32, i32) {
    %c0_i32 = arith.constant 0 : i32
    %c0_i32_0 = arith.constant 0 : i32
    return %arg0, %c0_i32 : i32, i32
  }
  func.func @transform_8(%arg0: i32) -> (i32, i32, i32) {
    %c0_i32 = arith.constant 0 : i32
    %c0_i32_0 = arith.constant 0 : i32
    %c0_i32_1 = arith.constant 0 : i32
    return %arg0, %c0_i32, %c0_i32_0 : i32, i32, i32
  }
}

</mosaic_0001>

<bundles_post_ra>
// kernel: tpu_custom_call.1
= control target key start
LH: loop header
LB: loop body
LE: loop exit
PB: predicated region body
PF: predicated region fallthrough
CT: control target
= control target key end

     0   :  { %14 = vsyncpa [#allocation3], 0  ;;  %s4424_s0 = inlined_call_operand.hbm [shape: f32[128,128], index: 0, kind: input, shape index: {}]   ;;  %s4425_s1 = inlined_call_operand.hbm [shape: f32[128,8,128], index: 1, kind: input, shape index: {}]   ;;  %s4426_s2 = inlined_call_operand.vmem [shape: f32[1,128], index: 2, kind: input, shape index: {}]   ;;  %s4427_s3 = inlined_call_operand.vmem [shape: f32[1,128], index: 3, kind: input, shape index: {}]   ;;  %s4428_s4 = inlined_call_operand.hbm [shape: bf16[128,256], index: 4, kind: input, shape index: {}]   ;;  %s4429_s5 = inlined_call_operand.hbm [shape: bf16[128,384], index: 5, kind: input, shape index: {}]   ;;  %s4430_s6 = inlined_call_operand.hbm [shape: f32[128,384], index: 6, kind: output, shape index: {0}]   ;;  %s4431_s7 = inlined_call_operand.hbm [shape: f32[128,128], index: 7, kind: output, shape index: {1}]   ;;  %s4432_s8 = inlined_call_operand.hbm [shape: f32[128,8,128], index: 8, kind: output, shape index: {2}]  }
   0x1   :  { %15 = vsyncpa [#allocation6], 0 }
   0x2   :  { %16 = vsyncpa [#allocation9], 0 }
   0x3   :  { %17 = vsyncpa [#allocation4], 0 }
   0x4   :  { %18 = vsyncpa [#allocation12], 0  ;;  %s36_s29 = sshll.u32 %s4425_s1, 4  ;;  %s3466_s30 = smov [#allocation5]   ;;  %s37_s29 = int_to_ptr.hbm [resolvable:$true] %s36_s29 }
   0x5   :  { %s38_s9 = sshll.u32 %s3466_s30, 4  ;;  %s23_s12 = sshll.u32 %s4424_s0, 4  ;;  %s39_s9 = int_to_ptr.vmem [resolvable:$true] %s38_s9  ;;  %s24_s12 = int_to_ptr.hbm [resolvable:$true] %s23_s12 }
   0x6   :  { %s3467_s13 = smov 128   ;;  %s3468_s14 = smov 8  }
   0x7   :  { %44 = dma.hbm_to_vmem [thread:$0]  %s37_s29, 16384, %s39_s9, [#allocation6], %s3467_s13, %s3467_s13, %s3468_s14  }
   0x8   :  { %s3469_s15 = smov [#allocation2]   ;;  %s53_s1 = sshll.u32 %s4428_s4, 4  ;;  %s54_s1 = int_to_ptr.hbm [resolvable:$true] %s53_s1 }
   0x9   :  { %s25_s16 = sshll.u32 %s3469_s15, 4  ;;  %s66_s20 = sshll.u32 %s4429_s5, 4  ;;  %s26_s16 = int_to_ptr.vmem [resolvable:$true] %s25_s16  ;;  %s67_s20 = int_to_ptr.hbm [resolvable:$true] %s66_s20 }
   0xa   :  { %31 = dma.hbm_to_vmem [thread:$0]  %s24_s12, 2048, %s26_s16, [#allocation3], %s3467_s13, %s3467_s13, %s3468_s14  }
   0xb   :  { %s3470_s21 = smov [#allocation7]   ;;  %s3471_s23 = smov [#allocation8]  }
   0xc   :  { %s55_s22 = sshll.u32 %s3470_s21, 4  ;;  %s68_s4 = sshll.u32 %s3471_s23, 4  ;;  %s56_s22 = int_to_ptr.vmem [resolvable:$true] %s55_s22  ;;  %s69_s4 = int_to_ptr.vmem [resolvable:$true] %s68_s4 }
   0xd   :  { %61 = dma.hbm_to_vmem [thread:$0]  %s54_s1, 2048, %s56_s22, [#allocation6], %s3467_s13, %s3467_s13, %s3468_s14  }
   0xe   :  { %s3472_s24 = smov 192   ;;  %s3473_s25 = smov 12  }
   0xf   :  { %74 = dma.hbm_to_vmem [thread:$0]  %s67_s20, 3072, %s69_s4, [#allocation9], %s3472_s24, %s3472_s24, %s3473_s25  }
  0x10   :  { %3456 = dma.done.wait [#allocation3], 2048  }
  0x11   :  { %3457 = vsyncadd [#allocation3], 4294965248 }
  0x12   :  { %3458 = dma.done.wait [#allocation6], 18432  }
  0x13   :  { %3459 = vsyncadd [#allocation6], 4294948864 }
  0x14   :  { %3460 = dma.done.wait [#allocation9], 3072  }
  0x15   :  { %3461 = vsyncadd [#allocation9], 4294964224  ;;  %v99_v0 = vld [vmem:[#allocation2 + $0x40] sm:$0xff]  ;;  %v101_v2 = vld [vmem:[#allocation2 + $0x50] sm:$0xff]  ;;  %v3474_v12 = vmov 128.0   ;;  %s2964_s29 = sshll.u32 %s4430_s6, 4  ;;  %s2965_s29 = int_to_ptr.hbm [resolvable:$true] %s2964_s29 }
  0x16   :  { %v91_v1 = vld [vmem:[#allocation2] sm:$0xff]  ;;  %123 = vadd.xlane.f32.xlu0 %v99_v0  ;;  %127 = vadd.xlane.f32.xlu1 %v101_v2  ;;  %v100_v3 = vld [vmem:[#allocation2 + $0x48] sm:$0xff]  ;;  %v102_v5 = vld [vmem:[#allocation2 + $0x58] sm:$0xff]  ;;  %3254 = vrcp.f32 %v3474_v12  ;;  %s3475_s30 = smov [#allocation10]   ;;  %s3476_s10 = smov 384  }
  0x17   :  { %107 = vadd.xlane.f32.xlu2 %v91_v1  ;;  %v92_v4 = vld [vmem:[#allocation2 + $0x8] sm:$0xff]  ;;  %v93_v6 = vld [vmem:[#allocation2 + $0x10] sm:$0xff]  ;;  %v3546_v7 = vld [vmem:[#allocation2 + $0x60] sm:$0xff]  ;;  %s2962_s9 = sshll.u32 %s3475_s30, 4  ;;  %s3477_s11 = smov 24   ;;  %s2963_s9 = int_to_ptr.vmem [resolvable:$true] %s2962_s9 }
  0x18   :  { %v3548_v8 = vld [vmem:[#allocation2 + $0x68] sm:$0xff]  ;;  %v3552_v9 = vld [vmem:[#allocation2 + $0x18] sm:$0xff]  ;;  %v3555_v10 = vld [vmem:[#allocation2 + $0x70] sm:$0xff]  ;;  %s3478_s6 = smov [#allocation11]   ;;  %s2977_s17 = sshll.u32 %s4431_s7, 4  ;;  %s2978_s17 = int_to_ptr.hbm [resolvable:$true] %s2977_s17 }
  0x19   :  { %v3558_v11 = vld [vmem:[#allocation2 + $0x28] sm:$0xff]  ;;  %v3577_v33 = vld [vmem:[#allocation2 + $0x78] sm:$0xff]  ;;  %v3594_v45 = vld [vmem:[#allocation2 + $0x20] sm:$0xff]  ;;  %s2975_s12 = sshll.u32 %s3478_s6, 4  ;;  %s3479_s18 = smov [#allocation13]   ;;  %s2976_s12 = int_to_ptr.vmem [resolvable:$true] %s2975_s12 }
  0x1a   :  { %v3581_v35 = vld [vmem:[#allocation2 + $0x38] sm:$0xff]  ;;  %v3615_v58 = vld [vmem:[#allocation2 + $0x30] sm:$0xff]  ;;  %v3090_v12 = vld [vmem:[#allocation8 + $0x9c] sm:$0xf0]  ;;  %s2988_s1 = sshll.u32 %s3479_s18, 4  ;;  %s2990_s20 = sshll.u32 %s4432_s8, 4  ;;  %s2989_s1 = int_to_ptr.vmem [resolvable:$true] %s2988_s1  ;;  %s2991_s20 = int_to_ptr.hbm [resolvable:$true] %s2990_s20 }
  0x1c   :  { %v3255_v13 = vpop.eup %3254 }
  0x1d   :  { %v140_v14 = vmul.f32 128.0, %v3255_v13  ;;  %vm144_vm0 = vweird.f32 %v3255_v13 }
  0x1e   :  { %125 = vadd.xlane.f32.xlu0 %v100_v3  ;;  %129 = vadd.xlane.f32.xlu1 %v102_v5 }
  0x1f   :  { %109 = vadd.xlane.f32.xlu2 %v92_v4  ;;  %v141_v15 = vsub.f32 1.0, %v140_v14  ;;  %v3189_v14 = vld [vmem:[#allocation8 + $0x7c] sm:$0xf] }
  0x21   :  { %v142_v16 = vmul.f32 %v3255_v13, %v141_v15  ;;  %v3078_v15 = vld [vmem:[#allocation8 + $0x84] sm:$0xf0] }
  0x23   :  { %v143_v17 = vadd.f32 %v3255_v13, %v142_v16  ;;  %v3081_v16 = vor.u32 %v3189_v14, %v3078_v15 }
  0x25   :  { %v3561_v18 = vsel %vm144_vm0, %v3255_v13, %v143_v17  ;;  %v3066_v17 = vld [vmem:[#allocation8 + $0x6c] sm:$0xf0] }
  0x26   :  { %131 = vadd.xlane.f32.xlu0 %v3546_v7  ;;  %133 = vadd.xlane.f32.xlu1 %v3548_v8 }
  0x27   :  { %111 = vadd.xlane.f32.xlu2 %v93_v6 }
  0x2e   :  { %113 = vadd.xlane.f32.xlu0 %v3552_v9 }
  0x36   :  { %135 = vadd.xlane.f32.xlu0 %v3555_v10 }
  0x3e   :  { %117 = vadd.xlane.f32.xlu0 %v3558_v11 }
  0x89   :  { %v124_v19 = vpop.xlane.xlu0 %123  ;;  %v128_v27 = vpop.xlane.xlu1 %127 }
  0x8a   :  { %v108_v20 = vpop.xlane.xlu2 %107  ;;  %v154_v21 = vmul.f32 %v3561_v18, %v124_v19  ;;  %v156_v32 = vmul.f32 %v3561_v18, %v128_v27 }
  0x8b   :  { %v146_v22 = vmul.f32 %v3561_v18, %v108_v20  ;;  %v3100_v20 = vld [vmem:[#allocation8 + $0xa8] sm:$0xf] }
  0x8c   :  { %v3565_v23 = vsub.f32 %v99_v0, %v154_v21  ;;  %v3584_v36 = vsub.f32 %v101_v2, %v156_v32  ;;  %v3196_v21 = vld [vmem:[#allocation8 + $0xb0] sm:$0xf0] }
  0x8d   :  { %v3567_v24 = vsub.f32 %v91_v1, %v146_v22  ;;  %v3183_v22 = vld [vmem:[#allocation8 + $0x4c] sm:$0xf] }
  0x8e   :  { %v186_v25 = vmul.f32 %v3565_v23, %v3565_v23  ;;  %v188_v43 = vmul.f32 %v3584_v36, %v3584_v36 }
  0x8f   :  { %v178_v26 = vmul.f32 %v3567_v24, %v3567_v24 }
  0x90   :  { %210 = vadd.xlane.f32.xlu1 %v186_v25  ;;  %v3101_v25 = vor.u32 %v3196_v21, %v3100_v20  ;;  %v3144_v20 = vld [vmem:[#allocation7 + $0x40] sm:$0xf]  ;;  %v3207_v21 = vld [vmem:[#allocation7 + $0x44] sm:$0xf0] }
  0x91   :  { %194 = vadd.xlane.f32.xlu0 %v178_v26  ;;  %v126_v28 = vpop.xlane.xlu0 %125  ;;  %v130_v38 = vpop.xlane.xlu1 %129  ;;  %v3054_v26 = vld [vmem:[#allocation8 + $0x54] sm:$0xf0] }
  0x92   :  { %v110_v29 = vpop.xlane.xlu2 %109  ;;  %v155_v30 = vmul.f32 %v3561_v18, %v126_v28  ;;  %v157_v44 = vmul.f32 %v3561_v18, %v130_v38  ;;  %v3057_v27 = vor.u32 %v3183_v22, %v3054_v26  ;;  %642 = vmatpush.bf16.msra.mxu0 %v3101_v25  ;;  %v3088_v28 = vld [vmem:[#allocation8 + $0x90] sm:$0xf]  ;;  %v3659_v22 = vor.u32 %v3207_v21, %v3144_v20 }
  0x93   :  { %v147_v41 = vmul.f32 %v3561_v18, %v110_v29  ;;  %v3193_v29 = vld [vmem:[#allocation8 + $0x98] sm:$0xf0]  ;;  %v3168_v38 = vld [vmem:[#allocation7 + $0x70] sm:$0xf] }
  0x94   :  { %v3574_v31 = vsub.f32 %v100_v3, %v155_v30  ;;  %v3601_v48 = vsub.f32 %v102_v5, %v157_v44  ;;  %v3180_v30 = vld [vmem:[#allocation8 + $0x34] sm:$0xf]  ;;  %v3089_v32 = vor.u32 %v3193_v29, %v3088_v28  ;;  %v3177_v44 = vld [vmem:[#allocation8 + $0x1c] sm:$0xf]  ;;  %v3040_v28 = vld [vmem:[#allocation8 + $0x30] sm:$0xf] }
  0x95   :  { %v3598_v47 = vsub.f32 %v92_v4, %v147_v41  ;;  %v3076_v41 = vld [vmem:[#allocation8 + $0x78] sm:$0xf]  ;;  %v3181_v29 = vld [vmem:[#allocation8 + $0x38] sm:$0xf0] }
  0x96   :  { %v187_v34 = vmul.f32 %v3574_v31, %v3574_v31  ;;  %v189_v49 = vmul.f32 %v3601_v48, %v3601_v48  ;;  %643 = vmatpush.bf16.msra.mxu0 %v3089_v32  ;;  %v3041_v32 = vor.u32 %v3181_v29, %v3040_v28 }
  0x97   :  { %v179_v50 = vmul.f32 %v3598_v47, %v3598_v47 }
  0x98   :  { %137 = vadd.xlane.f32.xlu1 %v3577_v33  ;;  %212 = vadd.xlane.f32.xlu2 %v187_v34  ;;  %v3042_v34 = vld [vmem:[#allocation8 + $0x3c] sm:$0xf0] }
  0x99   :  { %121 = vadd.xlane.f32.xlu0 %v3581_v35  ;;  %v132_v40 = vpop.xlane.xlu0 %131  ;;  %v134_v54 = vpop.xlane.xlu1 %133 }
  0x9a   :  { %v112_v37 = vpop.xlane.xlu2 %111  ;;  %v158_v51 = vmul.f32 %v3561_v18, %v132_v40  ;;  %v159_v56 = vmul.f32 %v3561_v18, %v134_v54  ;;  %v3160_v54 = vld [vmem:[#allocation7 + $0x60] sm:$0xf] }
  0x9b   :  { %v148_v39 = vmul.f32 %v3561_v18, %v112_v37  ;;  %v3045_v37 = vor.u32 %v3180_v30, %v3042_v34  ;;  %v3136_v34 = vld [vmem:[#allocation7 + $0x30] sm:$0xf] }
  0x9c   :  { %v3609_v53 = vsub.f32 %v3546_v7, %v158_v51  ;;  %v3619_v60 = vsub.f32 %v3548_v8, %v159_v56  ;;  %v3195_v7 = vld [vmem:[#allocation8 + $0xac] sm:$0xf]  ;;  %v3102_v8 = vld [vmem:[#allocation8 + $0xb4] sm:$0xf0] }
  0x9d   :  { %v3589_v42 = vsub.f32 %v93_v6, %v148_v39  ;;  %v3213_v39 = vld [vmem:[#allocation7 + $0x74] sm:$0xf0] }
  0x9e   :  { %v190_v55 = vmul.f32 %v3609_v53, %v3609_v53  ;;  %v191_v62 = vmul.f32 %v3619_v60, %v3619_v60  ;;  %v3640_v40 = vor.u32 %v3213_v39, %v3168_v38 }
  0x9f   :  { %v180_v46 = vmul.f32 %v3589_v42, %v3589_v42 }
  0xa0   :  { %214 = vadd.xlane.f32.xlu1 %v188_v43  ;;  %115 = vadd.xlane.f32.xlu2 %v3594_v45  ;;  %v3190_v43 = vld [vmem:[#allocation8 + $0x80] sm:$0xf0] }
  0xa1   :  { %198 = vadd.xlane.f32.xlu0 %v180_v46  ;;  %v114_v52 = vpop.xlane.xlu0 %113  ;;  %3222 = vmatpush.bf16.msra.mxu3 %v3640_v40  ;;  %v3077_v46 = vor.u32 %v3190_v43, %v3076_v41  ;;  %v3028_v41 = vld [vmem:[#allocation8 + $0x18] sm:$0xf]  ;;  %v3178_v43 = vld [vmem:[#allocation8 + $0x20] sm:$0xf0] }
  0xa2   :  { %v149_v57 = vmul.f32 %v3561_v18, %v114_v52 }
  0xa3   :  { %644 = vmatpush.bf16.msra.mxu0 %v3077_v46 }
  0xa4   :  { %v3622_v61 = vsub.f32 %v3552_v9, %v149_v57  ;;  %v3105_v9 = vor.u32 %v3195_v7, %v3102_v8  ;;  %v3152_v7 = vld [vmem:[#allocation7 + $0x50] sm:$0xf]  ;;  %v3209_v8 = vld [vmem:[#allocation7 + $0x54] sm:$0xf0] }
  0xa6   :  { %v181_v63 = vmul.f32 %v3622_v61, %v3622_v61  ;;  %3214 = vmatpush.bf16.msra.mxu2 %v3105_v9  ;;  %691 = vmatpush.bf16.msra.mxu1 %v3105_v9  ;;  %v3651_v9 = vor.u32 %v3209_v8, %v3152_v7 }
  0xa8   :  { %216 = vadd.xlane.f32.xlu2 %v189_v49  ;;  %196 = vadd.xlane.f32.xlu1 %v179_v50  ;;  %v3030_v49 = vld [vmem:[#allocation8 + $0x24] sm:$0xf0] }
  0xa9   :  { %v136_v59 = vpop.xlane.xlu0 %135  ;;  %v3033_v52 = vor.u32 %v3177_v44, %v3030_v49 }
  0xaa   :  { %v160_v0 = vmul.f32 %v3561_v18, %v136_v59 }
  0xac   :  { %v3630_v1 = vsub.f32 %v3555_v10, %v160_v0  ;;  %v3192_v10 = vld [vmem:[#allocation8 + $0x94] sm:$0xf]  ;;  %v3174_v0 = vld [vmem:[#allocation8 + $0x4] sm:$0xf] }
  0xad   :  { %v3093_v13 = vor.u32 %v3192_v10, %v3090_v12  ;;  %v3052_v12 = vld [vmem:[#allocation8 + $0x48] sm:$0xf] }
  0xae   :  { %v192_v3 = vmul.f32 %v3630_v1, %v3630_v1 }
  0xaf   :  { %3215 = vmatpush.bf16.msra.mxu2 %v3093_v13  ;;  %692 = vmatpush.bf16.msra.mxu1 %v3093_v13  ;;  %v3184_v13 = vld [vmem:[#allocation8 + $0x50] sm:$0xf0] }
  0xb0   :  { %119 = vadd.xlane.f32.xlu2 %v3615_v58  ;;  %218 = vadd.xlane.f32.xlu1 %v190_v55  ;;  %v3211_v55 = vld [vmem:[#allocation7 + $0x64] sm:$0xf0] }
  0xb1   :  { %v118_v2 = vpop.xlane.xlu0 %117  ;;  %v3644_v57 = vor.u32 %v3211_v55, %v3160_v54 }
  0xb2   :  { %v151_v4 = vmul.f32 %v3561_v18, %v118_v2 }
  0xb3   :  { %3216 = vmatpush.bf16.msra.mxu2 %v3081_v16  ;;  %693 = vmatpush.bf16.msra.mxu1 %v3081_v16  ;;  %v3053_v16 = vor.u32 %v3184_v13, %v3052_v12  ;;  %v3016_v13 = vld [vmem:[#allocation8] sm:$0xf] }
  0xb4   :  { %v3636_v5 = vsub.f32 %v3558_v11, %v151_v4  ;;  %v3186_v11 = vld [vmem:[#allocation8 + $0x64] sm:$0xf]  ;;  %3223 = vmatpush.bf16.msra.mxu3 %v3644_v57  ;;  %v3018_v4 = vld [vmem:[#allocation8 + $0xc] sm:$0xf0] }
  0xb5   :  { %v3069_v19 = vor.u32 %v3186_v11, %v3066_v17 }
  0xb6   :  { %v183_v6 = vmul.f32 %v3636_v5, %v3636_v5 }
  0xb7   :  { %3217 = vmatpush.bf16.msra.mxu2 %v3069_v19  ;;  %694 = vmatpush.bf16.msra.mxu1 %v3069_v19 }
  0xb8   :  { %220 = vadd.xlane.f32.xlu2 %v191_v62  ;;  %200 = vadd.xlane.f32.xlu1 %v181_v63  ;;  %v3064_v62 = vld [vmem:[#allocation8 + $0x60] sm:$0xf]  ;;  %v3187_v63 = vld [vmem:[#allocation8 + $0x68] sm:$0xf0] }
  0xb9   :  { %3224 = vmatpush.bf16.msra.mxu3 %v3651_v9 }
  0xbb   :  { %3218 = vmatpush.bf16.msra.mxu2 %v3057_v27  ;;  %695 = vmatpush.bf16.msra.mxu1 %v3057_v27 }
  0xbd   :  { %3225 = vmatpush.bf16.msra.mxu3 %v3659_v22 }
  0xbf   :  { %3219 = vmatpush.bf16.msra.mxu2 %v3045_v37  ;;  %696 = vmatpush.bf16.msra.mxu1 %v3045_v37  ;;  %v3205_v37 = vld [vmem:[#allocation7 + $0x34] sm:$0xf0] }
  0xc0   :  { %222 = vadd.xlane.f32.xlu2 %v192_v3  ;;  %v3065_v3 = vor.u32 %v3187_v63, %v3064_v62  ;;  %v3675_v39 = vor.u32 %v3205_v37, %v3136_v34 }
  0xc2   :  { %645 = vmatpush.bf16.msra.mxu0 %v3065_v3  ;;  %3226 = vmatpush.bf16.msra.mxu3 %v3675_v39 }
  0xc3   :  { %3220 = vmatpush.bf16.msra.mxu2 %v3033_v52  ;;  %697 = vmatpush.bf16.msra.mxu1 %v3033_v52 }
  0xc6   :  { %646 = vmatpush.bf16.msra.mxu0 %v3053_v16 }
  0xc8   :  { %204 = vadd.xlane.f32.xlu2 %v183_v6  ;;  %v3021_v6 = vor.u32 %v3174_v0, %v3018_v4 }
  0xca   :  { %3221 = vmatpush.bf16.msra.mxu2 %v3021_v6  ;;  %698 = vmatpush.bf16.msra.mxu1 %v3021_v6 }
  0xcb   :  { %647 = vmatpush.bf16.msra.mxu0 %v3041_v32 }
 0x103   :  { %v211_v50 = vpop.xlane.xlu1 %210 }
 0x104   :  { %v195_v51 = vpop.xlane.xlu0 %194  ;;  %v234_v56 = vmul.f32 %v211_v50, %v3561_v18 }
 0x105   :  { %v226_v59 = vmul.f32 %v195_v51, %v3561_v18  ;;  %v3029_v51 = vor.u32 %v3178_v43, %v3028_v41  ;;  %v3199_v41 = vld [vmem:[#allocation7 + $0x4] sm:$0xf0] }
 0x106   :  { %v3647_v2 = vadd.f32 1e-05, %v234_v56  ;;  %v3128_v56 = vld [vmem:[#allocation7 + $0x20] sm:$0xf] }
 0x107   :  { %v3653_v10 = vadd.f32 1e-05, %v226_v59  ;;  %v3203_v59 = vld [vmem:[#allocation7 + $0x24] sm:$0xf0]  ;;  %648 = vmatpush.bf16.msra.mxu0 %v3029_v51 }
 0x108   :  { %3256 = vrsqrt.f32 %v3647_v2  ;;  %v3683_v0 = vor.u32 %v3203_v59, %v3128_v56  ;;  %vm344_vm2 = vweird.f32 %v3647_v2  ;;  %v3737_v59 = vld [vmem:[%s4426_s2] ss:$0 sm:$0xff] }
 0x109   :  { %3258 = vrsqrt.f32 %v3653_v10  ;;  %vm264_vm7 = vweird.f32 %v3653_v10 }
 0x10a   :  { %3227 = vmatpush.bf16.msra.mxu3 %v3683_v0 }
 0x10b   :  { %v138_v14 = vpop.xlane.xlu1 %137  ;;  %v213_v15 = vpop.xlane.xlu2 %212 }
 0x10c   :  { %v161_v11 = vmul.f32 %v3561_v18, %v138_v14  ;;  %v122_v17 = vpop.xlane.xlu0 %121  ;;  %v235_v19 = vmul.f32 %v213_v15, %v3561_v18  ;;  %v3175_v14 = vld [vmem:[#allocation8 + $0x8] sm:$0xf0] }
 0x10d   :  { %v153_v63 = vmul.f32 %v3561_v18, %v122_v17  ;;  %v3201_v17 = vld [vmem:[#allocation7 + $0x14] sm:$0xf0]  ;;  %v3017_v28 = vor.u32 %v3175_v14, %v3016_v13 }
 0x10e   :  { %v3661_v25 = vpop.eup %3256  ;;  %v3664_v26 = vsub.f32 %v3577_v33, %v161_v11  ;;  %v3666_v27 = vadd.f32 1e-05, %v235_v19  ;;  %v3120_v11 = vld [vmem:[#allocation7 + $0x10] sm:$0xf] }
 0x10f   :  { %v339_v30 = vmul.f32 %v3661_v25, %v3647_v2  ;;  %v3677_v44 = vpop.eup %3258  ;;  %vm345_vm1 = vweird.f32 %v3661_v25  ;;  %v3707_v29 = vor.u32 %v3201_v17, %v3120_v11  ;;  %649 = vmatpush.bf16.msra.mxu0 %v3017_v28 }
 0x110   :  { %3260 = vrsqrt.f32 %v3666_v27  ;;  %v193_v33 = vmul.f32 %v3664_v26, %v3664_v26  ;;  %v259_v4 = vmul.f32 %v3677_v44, %v3653_v10  ;;  %vm3709_vm3 = vmor %vm344_vm2, %vm345_vm1  ;;  %vm354_vm5 = vweird.f32 %v3666_v27 }
 0x111   :  { %v340_v38 = vmul.f32 %v3661_v25, %v339_v30  ;;  %3228 = vmatpush.bf16.msra.mxu3 %v3707_v29  ;;  %vm265_vm8 = vweird.f32 %v3677_v44 }
 0x112   :  { %224 = vadd.xlane.f32.xlu0 %v193_v33  ;;  %v260_v20 = vmul.f32 %v3677_v44, %v259_v4  ;;  %v3112_v33 = vld [vmem:[#allocation7] sm:$0xf]  ;;  %vm3770_vm9 = vmor %vm264_vm7, %vm265_vm8 }
 0x113   :  { %v341_v46 = vmul.f32 0.5, %v340_v38  ;;  %v215_v49 = vpop.xlane.xlu1 %214  ;;  %v116_v50 = vpop.xlane.xlu2 %115 }
 0x114   :  { %v236_v52 = vmul.f32 %v215_v49, %v3561_v18  ;;  %v199_v54 = vpop.xlane.xlu0 %198  ;;  %v150_v55 = vmul.f32 %v3561_v18, %v116_v50  ;;  %v3721_v49 = vor.u32 %v3199_v41, %v3112_v33  ;;  %v261_v51 = vmul.f32 0.5, %v260_v20 }
 0x115   :  { %v342_v62 = vsub.f32 1.5, %v341_v46  ;;  %v228_v7 = vmul.f32 %v199_v54, %v3561_v18 }
 0x116   :  { %v3261_v3 = vpop.eup %3260  ;;  %v3687_v6 = vadd.f32 1e-05, %v236_v52  ;;  %v3691_v8 = vsub.f32 %v3594_v45, %v150_v55  ;;  %v3702_v45 = vsub.f32 %v3581_v35, %v153_v63  ;;  %v890_v63 = vld [vmem:[#allocation5 + $0x1a8] sm:$0xff]  ;;  %3229 = vmatpush.bf16.msra.mxu3 %v3721_v49 }
 0x117   :  { %v349_v12 = vmul.f32 %v3261_v3, %v3666_v27  ;;  %v343_v15 = vmul.f32 %v3661_v25, %v342_v62  ;;  %v3705_v21 = vadd.f32 1e-05, %v228_v7  ;;  %vm355_vm4 = vweird.f32 %v3261_v3  ;;  %v889_v62 = vld [vmem:[#allocation5 + $0x1a0] sm:$0xff] }
 0x118   :  { %3262 = vrsqrt.f32 %v3687_v6  ;;  %v182_v16 = vmul.f32 %v3691_v8, %v3691_v8  ;;  %v185_v46 = vmul.f32 %v3702_v45, %v3702_v45  ;;  %vm356_vm6 = vmor %vm354_vm5, %vm355_vm4  ;;  %v262_v27 = vsub.f32 1.5, %v261_v51 }
 0x119   :  { %v350_v19 = vmul.f32 %v3261_v3, %v349_v12  ;;  %v347_v35 = vsel %vm3709_vm3, %v3661_v25, %v343_v15  ;;  %3264 = vrsqrt.f32 %v3705_v21  ;;  %v3745_v12 = vpack.c.bf16 %v890_v63, %v889_v62 }
 0x11a   :  { %202 = vadd.xlane.f32.xlu1 %v182_v16  ;;  %v426_v54 = vmul.f32 %v347_v35, %v3565_v23  ;;  %v263_v30 = vmul.f32 %v3677_v44, %v262_v27  ;;  %vm364_vm11 = vweird.f32 %v3687_v6  ;;  %vm284_vm3 = vweird.f32 %v3705_v21 }
 0x11b   :  { %v351_v32 = vmul.f32 0.5, %v350_v19  ;;  %v197_v34 = vpop.xlane.xlu1 %196  ;;  %v217_v37 = vpop.xlane.xlu2 %216  ;;  %1263 = vmatmul.bf16.vlgmr.msra.gmra.mxu3 %v3745_v12 }
 0x11c   :  { %v227_v2 = vmul.f32 %v197_v34, %v3561_v18  ;;  %v237_v38 = vmul.f32 %v217_v37, %v3561_v18  ;;  %v446_v16 = vmul.f32 %v3737_v59, %v426_v54  ;;  %v267_v51 = vsel %vm3770_vm9, %v3677_v44, %v263_v30  ;;  %v891_v30 = vld [vmem:[#allocation5 + $0x1b0] sm:$0xff] }
 0x11d   :  { %v352_v43 = vsub.f32 1.5, %v351_v32 }
 0x11e   :  { %v3723_v50 = vpop.eup %3262  ;;  %v3726_v25 = vadd.f32 1e-05, %v227_v2  ;;  %v3728_v52 = vadd.f32 1e-05, %v237_v38 }
 0x11f   :  { %v353_v55 = vmul.f32 %v3261_v3, %v352_v43  ;;  %v359_v56 = vmul.f32 %v3723_v50, %v3687_v6  ;;  %v3754_v11 = vpop.eup %3264  ;;  %vm365_vm10 = vweird.f32 %v3723_v50 }
 0x120   :  { %3266 = vrsqrt.f32 %v3726_v25  ;;  %v279_v38 = vmul.f32 %v3754_v11, %v3705_v21  ;;  %vm3790_vm12 = vmor %vm364_vm11, %vm365_vm10  ;;  %vm274_vm13 = vweird.f32 %v3726_v25  ;;  %vm374_vm1 = vweird.f32 %v3728_v52 }
 0x121   :  { %v357_v23 = vsel %vm356_vm6, %v3261_v3, %v353_v55  ;;  %v360_v4 = vmul.f32 %v3723_v50, %v359_v56  ;;  %3268 = vrsqrt.f32 %v3728_v52  ;;  %v3752_v3 = vld [vmem:[%s4427_s3] ss:$0 sm:$0xff]  ;;  %v3197_v56 = vld [vmem:[#allocation8 + $0xb8] sm:$0xf0]  ;;  %vm285_vm4 = vweird.f32 %v3754_v11 }
 0x122   :  { %v427_v7 = vmul.f32 %v357_v23, %v3574_v31  ;;  %208 = vadd.xlane.f32.xlu1 %v185_v46  ;;  %v466_v41 = vadd.f32 %v3752_v3, %v446_v16  ;;  %v280_v62 = vmul.f32 %v3754_v11, %v279_v38  ;;  %vm3845_vm7 = vmor %vm284_vm3, %vm285_vm4 }
 0x123   :  { %v361_v13 = vmul.f32 0.5, %v360_v4  ;;  %v219_v14 = vpop.xlane.xlu1 %218  ;;  %v120_v15 = vpop.xlane.xlu2 %119 }
 0x124   :  { %v238_v31 = vmul.f32 %v219_v14, %v3561_v18  ;;  %v152_v17 = vmul.f32 %v3561_v18, %v120_v15  ;;  %v447_v19 = vmul.f32 %v3737_v59, %v427_v7 }
 0x125   :  { %v362_v20 = vsub.f32 1.5, %v361_v13  ;;  %v418_v13 = vmul.f32 %v267_v51, %v3567_v24 }
 0x126   :  { %v3267_v28 = vpop.eup %3266  ;;  %v3762_v32 = vadd.f32 1e-05, %v238_v31  ;;  %v3765_v34 = vsub.f32 %v3615_v58, %v152_v17  ;;  %v467_v37 = vadd.f32 %v3752_v3, %v447_v19  ;;  %v281_v19 = vmul.f32 0.5, %v280_v62 }
 0x127   :  { %v3269_v35 = vpop.eup %3268  ;;  %v269_v33 = vmul.f32 %v3267_v28, %v3726_v25  ;;  %v363_v43 = vmul.f32 %v3723_v50, %v362_v20  ;;  %vm275_vm14 = vweird.f32 %v3267_v28 }
 0x128   :  { %v369_v58 = vmul.f32 %v3269_v35, %v3728_v52  ;;  %3270 = vrsqrt.f32 %v3762_v32  ;;  %v3782_v46 = vpack.c.bf16 %v467_v37, %v466_v41  ;;  %v184_v55 = vmul.f32 %v3765_v34, %v3765_v34  ;;  %vm3805_vm15 = vmor %vm274_vm13, %vm275_vm14  ;;  %v892_v37 = vld [vmem:[#allocation5 + $0x1b8] sm:$0xff] }
 0x129   :  { %v270_v10 = vmul.f32 %v3267_v28, %v269_v33  ;;  %v367_v6 = vsel %vm3790_vm12, %v3723_v50, %v363_v43  ;;  %vm375_vm0 = vweird.f32 %v3269_v35  ;;  %vm384_vm5 = vweird.f32 %v3762_v32 }
 0x12a   :  { %v370_v54 = vmul.f32 %v3269_v35, %v369_v58  ;;  %719 = vmatmul.bf16.vlgmr.msra.gmra.mxu2 %v3782_v46  ;;  %206 = vadd.xlane.f32.xlu0 %v184_v55  ;;  %v428_v17 = vmul.f32 %v367_v6, %v3584_v36  ;;  %vm376_vm2 = vmor %vm374_vm1, %vm375_vm0  ;;  %v3822_v36 = vpack.c.bf16 %v892_v37, %v891_v30  ;;  %v3108_v55 = vld [vmem:[#allocation8 + $0xb0] sm:$0xf]  ;;  %v3194_v6 = vld [vmem:[#allocation8 + $0xa0] sm:$0xf0] }
 0x12b   :  { %v271_v63 = vmul.f32 0.5, %v270_v10  ;;  %v201_v23 = vpop.xlane.xlu1 %200  ;;  %v221_v44 = vpop.xlane.xlu2 %220  ;;  %v438_v58 = vmul.f32 %v3737_v59, %v418_v13  ;;  %v282_v10 = vsub.f32 1.5, %v281_v19  ;;  %v3109_v62 = vor.u32 %v3197_v56, %v3108_v55  ;;  %v899_v19 = vld [vmem:[#allocation5 + $0x1f0] sm:$0xff] }
 0x12c   :  { %v371_v4 = vmul.f32 0.5, %v370_v54  ;;  %v229_v27 = vmul.f32 %v201_v23, %v3561_v18  ;;  %v239_v7 = vmul.f32 %v221_v44, %v3561_v18  ;;  %v448_v54 = vmul.f32 %v3737_v59, %v428_v17  ;;  %1268 = vmatmul.bf16.gmra.mxu3 %v3822_v36  ;;  %v3096_v44 = vld [vmem:[#allocation8 + $0x98] sm:$0xf] }
 0x12d   :  { %v272_v14 = vsub.f32 1.5, %v271_v63  ;;  %740 = vmatpush.bf16.msrb.mxu2 %v3109_v62  ;;  %v3097_v21 = vor.u32 %v3194_v6, %v3096_v44 }
 0x12e   :  { %v3803_v15 = vpop.eup %3270  ;;  %v372_v16 = vsub.f32 1.5, %v371_v4  ;;  %v3809_v31 = vadd.f32 1e-05, %v229_v27  ;;  %v3811_v50 = vadd.f32 1e-05, %v239_v7  ;;  %v283_v27 = vmul.f32 %v3754_v11, %v282_v10 }
 0x12f   :  { %v273_v20 = vmul.f32 %v3267_v28, %v272_v14  ;;  %v379_v24 = vmul.f32 %v3803_v15, %v3762_v32  ;;  %vm385_vm6 = vweird.f32 %v3803_v15  ;;  %v468_v13 = vadd.f32 %v3752_v3, %v448_v54 }
 0x130   :  { %v373_v2 = vmul.f32 %v3269_v35, %v372_v16  ;;  %3272 = vrsqrt.f32 %v3809_v31  ;;  %vm3853_vm8 = vmor %vm384_vm5, %vm385_vm6  ;;  %vm294_vm9 = vweird.f32 %v3809_v31  ;;  %vm394_vm11 = vweird.f32 %v3811_v50 }
 0x131   :  { %v277_v38 = vsel %vm3805_vm15, %v3267_v28, %v273_v20  ;;  %v380_v33 = vmul.f32 %v3803_v15, %v379_v24  ;;  %3274 = vrsqrt.f32 %v3811_v50  ;;  %741 = vmatpush.bf16.msrb.mxu2 %v3097_v21 }
 0x132   :  { %v419_v41 = vmul.f32 %v277_v38, %v3598_v47  ;;  %v377_v43 = vsel %vm376_vm2, %v3269_v35, %v373_v2  ;;  %v287_v2 = vsel %vm3845_vm7, %v3754_v11, %v283_v27  ;;  %v893_v11 = vld [vmem:[#allocation5 + $0x1c0] sm:$0xff]  ;;  %v896_v27 = vld [vmem:[#allocation5 + $0x1d8] sm:$0xff] }
 0x133   :  { %v429_v52 = vmul.f32 %v377_v43, %v3601_v48  ;;  %v381_v51 = vmul.f32 0.5, %v380_v33  ;;  %v458_v48 = vadd.f32 %v3752_v3, %v438_v58  ;;  %v894_v43 = vld [vmem:[#allocation5 + $0x1c8] sm:$0xff] }
 0x134   :  { %v439_v28 = vmul.f32 %v3737_v59, %v419_v41 }
 0x135   :  { %v382_v47 = vsub.f32 1.5, %v381_v51  ;;  %v449_v35 = vmul.f32 %v3737_v59, %v429_v52 }
 0x136   :  { %v3273_v63 = vpop.eup %3272  ;;  %v459_v23 = vadd.f32 %v3752_v3, %v439_v28 }
 0x137   :  { %v3275_v4 = vpop.eup %3274  ;;  %v289_v7 = vmul.f32 %v3273_v63, %v3809_v31  ;;  %v469_v14 = vadd.f32 %v3752_v3, %v449_v35  ;;  %v383_v16 = vmul.f32 %v3803_v15, %v382_v47  ;;  %vm295_vm10 = vweird.f32 %v3273_v63  ;;  %v3191_v35 = vld [vmem:[#allocation8 + $0x88] sm:$0xf0] }
 0x138   :  { %v389_v17 = vmul.f32 %v3275_v4, %v3811_v50  ;;  %v3857_v24 = vpack.c.bf16 %v459_v23, %v458_v48  ;;  %vm395_vm12 = vweird.f32 %v3275_v4  ;;  %v420_v31 = vmul.f32 %v287_v2, %v3589_v42  ;;  %vm296_vm13 = vmor %vm294_vm9, %vm295_vm10 }
 0x139   :  { %v290_v20 = vmul.f32 %v3273_v63, %v289_v7  ;;  %v3859_v30 = vpack.c.bf16 %v469_v14, %v468_v13  ;;  %v387_v32 = vsel %vm3853_vm8, %v3803_v15, %v383_v16  ;;  %vm396_vm14 = vmor %vm394_vm11, %vm395_vm12  ;;  %v3874_v15 = vpack.c.bf16 %v894_v43, %v893_v11  ;;  %v897_v13 = vld [vmem:[#allocation5 + $0x1e0] sm:$0xff]  ;;  %v898_v14 = vld [vmem:[#allocation5 + $0x1e8] sm:$0xff]  ;;  %v223_v16 = vpop.xlane.xlu2 %222 }
 0x13a   :  { %v390_v37 = vmul.f32 %v3275_v4, %v389_v17  ;;  %650 = vmatmul.bf16.vlgmr.msra.gmra.mxu0 %v3857_v24  ;;  %699 = vmatmul.bf16.vlgmr.msra.gmra.mxu1 %v3857_v24  ;;  %v430_v10 = vmul.f32 %v387_v32, %v3609_v53  ;;  %v440_v55 = vmul.f32 %v3737_v59, %v420_v31  ;;  %v3084_v53 = vld [vmem:[#allocation8 + $0x80] sm:$0xf]  ;;  %v3188_v11 = vld [vmem:[#allocation8 + $0x70] sm:$0xf0] }
 0x13b   :  { %v291_v38 = vmul.f32 0.5, %v290_v20  ;;  %724 = vmatmul.bf16.gmra.mxu2 %v3859_v30  ;;  %v3085_v48 = vor.u32 %v3191_v35, %v3084_v53  ;;  %v3897_v25 = vpack.c.bf16 %v898_v14, %v897_v13  ;;  %v240_v17 = vmul.f32 %v223_v16, %v3561_v18  ;;  %v900_v20 = vld [vmem:[#allocation5 + $0x1f8] sm:$0xff]  ;;  %v3212_v43 = vld [vmem:[#allocation7 + $0x74] sm:$0xf]  ;;  %v3162_v53 = vld [vmem:[#allocation7 + $0x68] sm:$0xf0] }
 0x13c   :  { %v391_v33 = vmul.f32 0.5, %v390_v37  ;;  %v450_v47 = vmul.f32 %v3737_v59, %v430_v10  ;;  %1273 = vmatmul.bf16.gmra.mxu3 %v3874_v15  ;;  %v3901_v21 = vpack.c.bf16 %v900_v20, %v899_v19  ;;  %v3208_v16 = vld [vmem:[#allocation7 + $0x54] sm:$0xf]  ;;  %v3036_v19 = vld [vmem:[#allocation8 + $0x20] sm:$0xf] }
 0x13d   :  { %v292_v41 = vsub.f32 1.5, %v291_v38  ;;  %742 = vmatpush.bf16.msrb.mxu2 %v3085_v48  ;;  %v3903_v37 = vadd.f32 1e-05, %v240_v17  ;;  %v3154_v17 = vld [vmem:[#allocation7 + $0x58] sm:$0xf0] }
 0x13e   :  { %v392_v58 = vsub.f32 1.5, %v391_v33  ;;  %v470_v23 = vadd.f32 %v3752_v3, %v450_v47  ;;  %v3210_v47 = vld [vmem:[#allocation7 + $0x64] sm:$0xf] }
 0x13f   :  { %v293_v52 = vmul.f32 %v3273_v63, %v292_v41  ;;  %3276 = vrsqrt.f32 %v3903_v37  ;;  %v3072_v41 = vld [vmem:[#allocation8 + $0x68] sm:$0xf]  ;;  %v3165_v48 = vor.u32 %v3210_v47, %v3162_v53  ;;  %vm404_vm15 = vweird.f32 %v3903_v37 }
 0x140   :  { %v393_v51 = vmul.f32 %v3275_v4, %v392_v58  ;;  %v3073_v31 = vor.u32 %v3188_v11, %v3072_v41  ;;  %v3170_v58 = vld [vmem:[#allocation7 + $0x78] sm:$0xf0]  ;;  %v3179_v41 = vld [vmem:[#allocation8 + $0x28] sm:$0xf0] }
 0x141   :  { %v297_v54 = vsel %vm296_vm13, %v3273_v63, %v293_v52  ;;  %v460_v63 = vadd.f32 %v3752_v3, %v440_v55  ;;  %v205_v2 = vpop.xlane.xlu2 %204  ;;  %v3173_v52 = vor.u32 %v3212_v43, %v3170_v58  ;;  %v3060_v55 = vld [vmem:[#allocation8 + $0x50] sm:$0xf]  ;;  %v3037_v43 = vor.u32 %v3179_v41, %v3036_v19  ;;  %v904_v58 = vld [vmem:[#allocation5 + $0x218] sm:$0xff]  ;;  %v3202_v41 = vld [vmem:[#allocation7 + $0x24] sm:$0xf] }
 0x142   :  { %v421_v50 = vmul.f32 %v297_v54, %v3622_v61  ;;  %v397_v28 = vsel %vm396_vm14, %v3275_v4, %v393_v51  ;;  %v895_v4 = vld [vmem:[#allocation5 + $0x1d0] sm:$0xff]  ;;  %v231_v38 = vmul.f32 %v205_v2, %v3561_v18  ;;  %v901_v51 = vld [vmem:[#allocation5 + $0x200] sm:$0xff]  ;;  %v902_v54 = vld [vmem:[#allocation5 + $0x208] sm:$0xff]  ;;  %743 = vmatpush.bf16.msrb.mxu2 %v3073_v31 }
 0x143   :  { %v431_v56 = vmul.f32 %v397_v28, %v3619_v60  ;;  %v3894_v7 = vpack.c.bf16 %v896_v27, %v895_v4  ;;  %1454 = vmatpush.bf16.msrb.mxu0 %v3173_v52  ;;  %3230 = vmatpush.bf16.msrb.mxu1 %v3173_v52  ;;  %v903_v31 = vld [vmem:[#allocation5 + $0x210] sm:$0xff] }
 0x144   :  { %v441_v42 = vmul.f32 %v3737_v59, %v421_v50  ;;  %v3910_v33 = vadd.f32 1e-05, %v231_v38  ;;  %v3915_v50 = vpack.c.bf16 %v902_v54, %v901_v51  ;;  %v3157_v38 = vor.u32 %v3208_v16, %v3154_v17  ;;  %v3024_v51 = vld [vmem:[#allocation8 + $0x8] sm:$0xf]  ;;  %v3176_v54 = vld [vmem:[#allocation8 + $0x10] sm:$0xf0] }
 0x145   :  { %v451_v62 = vmul.f32 %v3737_v59, %v431_v56  ;;  %v3908_v32 = vpop.eup %3276  ;;  %v3185_v56 = vld [vmem:[#allocation8 + $0x58] sm:$0xf0] }
 0x146   :  { %v461_v61 = vadd.f32 %v3752_v3, %v441_v42  ;;  %v399_v10 = vmul.f32 %v3908_v32, %v3903_v37  ;;  %3278 = vrsqrt.f32 %v3910_v33  ;;  %v3061_v42 = vor.u32 %v3185_v56, %v3060_v55  ;;  %v3138_v16 = vld [vmem:[#allocation7 + $0x38] sm:$0xf0]  ;;  %v3200_v56 = vld [vmem:[#allocation7 + $0x14] sm:$0xf] }
 0x147   :  { %v471_v44 = vadd.f32 %v3752_v3, %v451_v62  ;;  %3231 = vmatpush.bf16.msrb.mxu1 %v3165_v48  ;;  %1455 = vmatpush.bf16.msrb.mxu0 %v3165_v48  ;;  %vm405_vm0 = vweird.f32 %v3908_v32  ;;  %vm314_vm2 = vweird.f32 %v3910_v33 }
 0x148   :  { %v3887_v60 = vpack.c.bf16 %v461_v61, %v460_v63  ;;  %v400_v28 = vmul.f32 %v3908_v32, %v399_v10  ;;  %744 = vmatpush.bf16.msrb.mxu2 %v3061_v42  ;;  %vm3938_vm1 = vmor %vm404_vm15, %vm405_vm0  ;;  %v3025_v42 = vor.u32 %v3176_v54, %v3024_v51 }
 0x149   :  { %v3889_v6 = vpack.c.bf16 %v471_v44, %v470_v23  ;;  %v3048_v23 = vld [vmem:[#allocation8 + $0x38] sm:$0xf]  ;;  %v3182_v44 = vld [vmem:[#allocation8 + $0x40] sm:$0xf0] }
 0x14a   :  { %655 = vmatmul.bf16.gmra.mxu0 %v3887_v60  ;;  %704 = vmatmul.bf16.gmra.mxu1 %v3887_v60  ;;  %v401_v63 = vmul.f32 0.5, %v400_v28  ;;  %v3049_v13 = vor.u32 %v3182_v44, %v3048_v23  ;;  %v3934_v28 = vpack.c.bf16 %v904_v58, %v903_v31  ;;  %v3206_v44 = vld [vmem:[#allocation7 + $0x44] sm:$0xf] }
 0x14b   :  { %729 = vmatmul.bf16.gmra.mxu2 %v3889_v6  ;;  %3232 = vmatpush.bf16.msrb.mxu1 %v3157_v38 }
 0x14c   :  { %1278 = vmatmul.bf16.gmra.mxu3 %v3894_v7  ;;  %v3919_v35 = vpop.eup %3278  ;;  %v402_v14 = vsub.f32 1.5, %v401_v63  ;;  %745 = vmatpush.bf16.msrb.mxu2 %v3049_v13 }
 0x14d   :  { %v309_v4 = vmul.f32 %v3919_v35, %v3910_v33  ;;  %1456 = vmatpush.bf16.msrb.mxu0 %v3157_v38  ;;  %vm315_vm3 = vweird.f32 %v3919_v35 }
 0x14e   :  { %v403_v10 = vmul.f32 %v3908_v32, %v402_v14  ;;  %v3204_v14 = vld [vmem:[#allocation7 + $0x34] sm:$0xf]  ;;  %vm3957_vm5 = vmor %vm314_vm2, %vm315_vm3  ;;  %vm2681_vm2 = vcmask 1042434   ;;  %vm2683_vm3 = vcmask 1043459  }
 0x14f   :  { %v310_v20 = vmul.f32 %v3919_v35, %v309_v4  ;;  %v3146_v4 = vld [vmem:[#allocation7 + $0x48] sm:$0xf0]  ;;  %v3141_v38 = vor.u32 %v3204_v14, %v3138_v16  ;;  %v3198_v16 = vld [vmem:[#allocation7 + $0x4] sm:$0xf] }
 0x150   :  { %746 = vmatpush.bf16.msrb.mxu2 %v3037_v43 }
 0x151   :  { %v311_v47 = vmul.f32 0.5, %v310_v20 }
 0x153   :  { %v312_v63 = vsub.f32 1.5, %v311_v47  ;;  %v3122_v47 = vld [vmem:[#allocation7 + $0x18] sm:$0xf0] }
 0x154   :  { %747 = vmatpush.bf16.msrb.mxu2 %v3025_v42 }
 0x158   :  { %1125 = vmatpush.bf16.msra.mxu2 %v3640_v40  ;;  %v313_v40 = vmul.f32 %v3919_v35, %v312_v63 }
 0x15c   :  { %1283 = vmatmul.bf16.gmra.mxu3 %v3897_v25  ;;  %1126 = vmatpush.bf16.msra.mxu2 %v3644_v57 }
 0x160   :  { %1127 = vmatpush.bf16.msra.mxu2 %v3651_v9 }
 0x164   :  { %1128 = vmatpush.bf16.msra.mxu2 %v3659_v22 }
 0x168   :  { %1129 = vmatpush.bf16.msra.mxu2 %v3675_v39 }
 0x16c   :  { %1288 = vmatmul.bf16.gmra.mxu3 %v3901_v21  ;;  %1130 = vmatpush.bf16.msra.mxu2 %v3683_v0  ;;  %v907_v0 = vld [vmem:[#allocation5 + $0x230] sm:$0xff] }
 0x170   :  { %1131 = vmatpush.bf16.msra.mxu2 %v3707_v29 }
 0x174   :  { %1132 = vmatpush.bf16.msra.mxu2 %v3721_v49 }
 0x17c   :  { %1293 = vmatmul.bf16.gmra.mxu3 %v3915_v50 }
 0x185   :  { %v225_v62 = vpop.xlane.xlu0 %224 }
 0x186   :  { %v241_v61 = vmul.f32 %v225_v62, %v3561_v18  ;;  %v407_v62 = vsel %vm3938_vm1, %v3908_v32, %v403_v10  ;;  %v3149_v32 = vor.u32 %v3206_v44, %v3146_v4  ;;  %v317_v10 = vsel %vm3957_vm5, %v3919_v35, %v313_v40 }
 0x187   :  { %v432_v13 = vmul.f32 %v407_v62, %v3630_v1  ;;  %v905_v62 = vld [vmem:[#allocation5 + $0x220] sm:$0xff]  ;;  %vm2679_vm1 = vcmask 1041409   ;;  %vm2687_vm5 = vcmask 1045509  }
 0x188   :  { %v3924_v27 = vadd.f32 1e-05, %v241_v61  ;;  %3233 = vmatpush.bf16.msrb.mxu1 %v3149_v32  ;;  %1457 = vmatpush.bf16.msrb.mxu0 %v3149_v32 }
 0x189   :  { %v452_v31 = vmul.f32 %v3737_v59, %v432_v13 }
 0x18a   :  { %3280 = vrsqrt.f32 %v3924_v27  ;;  %vm414_vm6 = vweird.f32 %v3924_v27 }
 0x18c   :  { %1298 = vmatmul.bf16.gmra.mxu3 %v3934_v28  ;;  %3234 = vmatpush.bf16.msrb.mxu1 %v3141_v38 }
 0x18d   :  { %v203_v2 = vpop.xlane.xlu1 %202  ;;  %1458 = vmatpush.bf16.msrb.mxu0 %v3141_v38 }
 0x18e   :  { %v230_v11 = vmul.f32 %v203_v2, %v3561_v18 }
 0x190   :  { %v3932_v52 = vadd.f32 1e-05, %v230_v11  ;;  %v3281_v55 = vpop.eup %3280  ;;  %v3130_v11 = vld [vmem:[#allocation7 + $0x28] sm:$0xf0] }
 0x191   :  { %v409_v53 = vmul.f32 %v3281_v55, %v3924_v27  ;;  %vm415_vm4 = vweird.f32 %v3281_v55  ;;  %v3133_v27 = vor.u32 %v3202_v41, %v3130_v11 }
 0x192   :  { %3282 = vrsqrt.f32 %v3932_v52  ;;  %vm416_vm7 = vmor %vm414_vm6, %vm415_vm4  ;;  %vm304_vm9 = vweird.f32 %v3932_v52  ;;  %vm2685_vm4 = vcmask 1044484   ;;  %vm2689_vm6 = vcmask 1046534  }
 0x193   :  { %v410_v48 = vmul.f32 %v3281_v55, %v409_v53  ;;  %3235 = vmatpush.bf16.msrb.mxu1 %v3133_v27  ;;  %1459 = vmatpush.bf16.msrb.mxu0 %v3133_v27 }
 0x195   :  { %v209_v37 = vpop.xlane.xlu1 %208  ;;  %v411_v61 = vmul.f32 0.5, %v410_v48  ;;  %v906_v48 = vld [vmem:[#allocation5 + $0x228] sm:$0xff] }
 0x196   :  { %v233_v23 = vmul.f32 %v209_v37, %v3561_v18  ;;  %v3125_v37 = vor.u32 %v3200_v56, %v3122_v47 }
 0x197   :  { %v412_v19 = vsub.f32 1.5, %v411_v61  ;;  %v3974_v61 = vpack.c.bf16 %v906_v48, %v905_v62 }
 0x198   :  { %v3283_v17 = vpop.eup %3282  ;;  %v3953_v20 = vadd.f32 1e-05, %v233_v23  ;;  %3236 = vmatpush.bf16.msrb.mxu1 %v3125_v37  ;;  %1460 = vmatpush.bf16.msrb.mxu0 %v3125_v37 }
 0x199   :  { %v299_v2 = vmul.f32 %v3283_v17, %v3932_v52  ;;  %v413_v33 = vmul.f32 %v3281_v55, %v412_v19  ;;  %vm305_vm8 = vweird.f32 %v3283_v17  ;;  %v3114_v19 = vld [vmem:[#allocation7 + $0x8] sm:$0xf0] }
 0x19a   :  { %3284 = vrsqrt.f32 %v3953_v20  ;;  %vm306_vm10 = vmor %vm304_vm9, %vm305_vm8  ;;  %v3117_v22 = vor.u32 %v3198_v16, %v3114_v19  ;;  %vm334_vm11 = vweird.f32 %v3953_v20 }
 0x19b   :  { %v300_v43 = vmul.f32 %v3283_v17, %v299_v2  ;;  %v417_v58 = vsel %vm416_vm7, %v3281_v55, %v413_v33  ;;  %v472_v55 = vadd.f32 %v3752_v3, %v452_v31  ;;  %vm2691_vm7 = vcmask 1047559  }
 0x19c   :  { %v433_v51 = vmul.f32 %v417_v58, %v3664_v26  ;;  %v423_v26 = vmul.f32 %v317_v10, %v3636_v5  ;;  %1303 = vmatmul.bf16.gmra.mxu3 %v3974_v61  ;;  %3237 = vmatpush.bf16.msrb.mxu1 %v3117_v22 }
 0x19d   :  { %v301_v54 = vmul.f32 0.5, %v300_v43  ;;  %v207_v42 = vpop.xlane.xlu0 %206  ;;  %1461 = vmatpush.bf16.msrb.mxu0 %v3117_v22  ;;  %v914_v22 = vld [vmem:[#allocation5 + $0x268] sm:$0xff] }
 0x19e   :  { %v453_v53 = vmul.f32 %v3737_v59, %v433_v51  ;;  %v232_v63 = vmul.f32 %v207_v42, %v3561_v18  ;;  %v443_v52 = vmul.f32 %v3737_v59, %v423_v26  ;;  %v3989_v2 = vpop.f32.mrf.mxu3  ;;  %v908_v51 = vld [vmem:[#allocation5 + $0x238] sm:$0xff] }
 0x19f   :  { %v302_v57 = vsub.f32 1.5, %v301_v54  ;;  %v4002_v54 = vpack.c.bf16 %v908_v51, %v907_v0 }
 0x1a0   :  { %v3285_v35 = vpop.eup %3284  ;;  %v473_v44 = vadd.f32 %v3752_v3, %v453_v53  ;;  %v248_v4 = vadd.f32 1e-05, %v232_v63  ;;  %v463_v38 = vadd.f32 %v3752_v3, %v443_v52 }
 0x1a1   :  { %v303_v23 = vmul.f32 %v3283_v17, %v302_v57  ;;  %v329_v9 = vmul.f32 %v3285_v35, %v3953_v20  ;;  %vm335_vm12 = vweird.f32 %v3285_v35 }
 0x1a2   :  { %v3981_v18 = vpack.c.bf16 %v473_v44, %v472_v55  ;;  %3286 = vrsqrt.f32 %v248_v4  ;;  %vm336_vm13 = vmor %vm334_vm11, %vm335_vm12  ;;  %vm324_vm15 = vweird.f32 %v248_v4 }
 0x1a3   :  { %v307_v5 = vsel %vm306_vm10, %v3283_v17, %v303_v23  ;;  %v330_v13 = vmul.f32 %v3285_v35, %v329_v9 }
 0x1a4   :  { %v422_v32 = vmul.f32 %v307_v5, %v3691_v8  ;;  %734 = vmatmul.bf16.gmra.mxu2 %v3981_v18  ;;  %v911_v5 = vld [vmem:[#allocation5 + $0x250] sm:$0xff] }
 0x1a5   :  { %v331_v14 = vmul.f32 0.5, %v330_v13  ;;  %v912_v13 = vld [vmem:[#allocation5 + $0x258] sm:$0xff] }
 0x1a6   :  { %v442_v40 = vmul.f32 %v3737_v59, %v422_v32  ;;  %v4000_v10 = vpop.f32.mrf.mxu3  ;;  %v4023_v19 = vpack.c.bf16 %v912_v13, %v911_v5 }
 0x1a7   :  { %v332_v17 = vsub.f32 1.5, %v331_v14 }
 0x1a8   :  { %v462_v8 = vadd.f32 %v3752_v3, %v442_v40  ;;  %v3287_v1 = vpop.eup %3286 }
 0x1a9   :  { %v333_v41 = vmul.f32 %v3285_v35, %v332_v17  ;;  %v319_v11 = vmul.f32 %v3287_v1, %v248_v4  ;;  %vm325_vm14 = vweird.f32 %v3287_v1 }
 0x1aa   :  { %v3993_v33 = vpack.c.bf16 %v463_v38, %v462_v8  ;;  %vm326_vm0 = vmor %vm324_vm15, %vm325_vm14 }
 0x1ab   :  { %v320_v39 = vmul.f32 %v3287_v1, %v319_v11  ;;  %v337_v31 = vsel %vm336_vm13, %v3285_v35, %v333_v41 }
 0x1ac   :  { %660 = vmatmul.bf16.gmra.mxu0 %v3993_v33  ;;  %709 = vmatmul.bf16.gmra.mxu1 %v3993_v33  ;;  %v425_v27 = vmul.f32 %v337_v31, %v3702_v45 }
 0x1ad   :  { %v720_v43 = vpop.f32.mrf.mxu2  ;;  %v321_v58 = vmul.f32 0.5, %v320_v39  ;;  %1308 = vmatmul.bf16.gmra.mxu3 %v4002_v54 }
 0x1ae   :  { %814 = vst [vmem:[#allocation10 + $0xc8] sm:$0xff] %v720_v43  ;;  %v445_v42 = vmul.f32 %v3737_v59, %v425_v27 }
 0x1af   :  { %v322_v20 = vsub.f32 1.5, %v321_v58  ;;  %v4010_v53 = vpop.f32.mrf.mxu3 }
 0x1b0   :  { %v465_v48 = vadd.f32 %v3752_v3, %v445_v42 }
 0x1b1   :  { %v323_v56 = vmul.f32 %v3287_v1, %v322_v20 }
 0x1b3   :  { %v327_v29 = vsel %vm326_vm0, %v3287_v1, %v323_v56 }
 0x1b4   :  { %748 = vmatmul.bf16.vlgmr.msrb.gmra.mxu2 %v3857_v24  ;;  %v424_v47 = vmul.f32 %v327_v29, %v3765_v34  ;;  %v909_v34 = vld [vmem:[#allocation5 + $0x240] sm:$0xff]  ;;  %v910_v24 = vld [vmem:[#allocation5 + $0x248] sm:$0xff]  ;;  %v915_v29 = vld [vmem:[#allocation5 + $0x270] sm:$0xff] }
 0x1b5   :  { %v722_v57 = vpop.f32.mrf.mxu2  ;;  %v4017_v9 = vpack.c.bf16 %v910_v24, %v909_v34 }
 0x1b6   :  { %817 = vst [vmem:[#allocation10 + $0xe0] sm:$0xff] %v722_v57  ;;  %v444_v49 = vmul.f32 %v3737_v59, %v424_v47  ;;  %v916_v47 = vld [vmem:[#allocation5 + $0x278] sm:$0xff] }
 0x1b7   :  { %v651_v55 = vpop.f32.mrf.mxu0  ;;  %v700_v45 = vpop.f32.mrf.mxu1 }
 0x1b8   :  { %789 = vst [vmem:[#allocation10] sm:$0xff] %v651_v55  ;;  %v464_v62 = vadd.f32 %v3752_v3, %v444_v49  ;;  %v4015_v63 = vpop.f32.mrf.mxu3  ;;  %v4034_v49 = vpack.c.bf16 %v916_v47, %v915_v29 }
 0x1b9   :  { %790 = vst [vmem:[#allocation10 + $0x8] sm:$0xff] %v700_v45 }
 0x1ba   :  { %v477_v35 = vpack.c.bf16 %v465_v48, %v464_v62 }
 0x1bc   :  { %665 = vmatmul.bf16.gmra.mxu0 %v477_v35  ;;  %714 = vmatmul.bf16.gmra.mxu1 %v477_v35 }
 0x1bd   :  { %1313 = vmatmul.bf16.gmra.mxu3 %v4017_v9 }
 0x1be   :  { %v725_v26 = vpop.f32.mrf.mxu2 }
 0x1bf   :  { %820 = vst [vmem:[#allocation10 + $0xf8] sm:$0xff] %v725_v26  ;;  %v653_v37 = vpop.f32.mrf.mxu0  ;;  %v702_v23 = vpop.f32.mrf.mxu1 }
 0x1c0   :  { %792 = vst [vmem:[#allocation10 + $0x18] sm:$0xff] %v653_v37  ;;  %v1274_v3 = vpop.f32.mrf.mxu3 }
 0x1c1   :  { %793 = vst [vmem:[#allocation10 + $0x20] sm:$0xff] %v702_v23  ;;  %v2119_v38 = vrot.slane %v1274_v3, 4 }
 0x1c3   :  { %v2120_v11 = vadd.f32 %v2119_v38, %v1274_v3  ;;  %v918_v38 = vld [vmem:[#allocation5 + $0x288] sm:$0xff] }
 0x1c4   :  { %753 = vmatmul.bf16.gmra.mxu2 %v3887_v60 }
 0x1c5   :  { %v2121_v58 = vrot.slane %v2120_v11, 2 }
 0x1c6   :  { %v727_v59 = vpop.f32.mrf.mxu2 }
 0x1c7   :  { %823 = vst [vmem:[#allocation10 + $0x110] sm:$0xff] %v727_v59  ;;  %v656_v44 = vpop.f32.mrf.mxu0  ;;  %v705_v4 = vpop.f32.mrf.mxu1  ;;  %v2122_v27 = vadd.f32 %v2121_v58, %v2120_v11 }
 0x1c8   :  { %795 = vst [vmem:[#allocation10 + $0x30] sm:$0xff] %v656_v44  ;;  %v1276_v52 = vpop.f32.mrf.mxu3 }
 0x1c9   :  { %796 = vst [vmem:[#allocation10 + $0x38] sm:$0xff] %v705_v4  ;;  %v2125_v1 = vrot.slane %v1276_v52, 4  ;;  %v2123_v48 = vrot.slane %v2122_v27, 1 }
 0x1cc   :  { %670 = vmatmul.bf16.gmra.mxu0 %v3782_v46  ;;  %1612 = vmatmul.bf16.vlgmr.msrb.gmra.mxu1 %v3897_v25  ;;  %v913_v25 = vld [vmem:[#allocation5 + $0x260] sm:$0xff] }
 0x1cd   :  { %1318 = vmatmul.bf16.gmra.mxu3 %v4023_v19  ;;  %v4029_v8 = vpack.c.bf16 %v914_v22, %v913_v25 }
 0x1ce   :  { %v730_v32 = vpop.f32.mrf.mxu2 }
 0x1cf   :  { %826 = vst [vmem:[#allocation10 + $0x128] sm:$0xff] %v730_v32  ;;  %v658_v14 = vpop.f32.mrf.mxu0  ;;  %v707_v16 = vpop.f32.mrf.mxu1 }
 0x1d0   :  { %798 = vst [vmem:[#allocation10 + $0x48] sm:$0xff] %v658_v14  ;;  %v1279_v40 = vpop.f32.mrf.mxu3 }
 0x1d1   :  { %799 = vst [vmem:[#allocation10 + $0x50] sm:$0xff] %v707_v16  ;;  %v2131_v41 = vrot.slane %v1279_v40, 4 }
 0x1d3   :  { %v2132_v31 = vadd.f32 %v2131_v41, %v1279_v40 }
 0x1d4   :  { %758 = vmatmul.bf16.gmra.mxu2 %v3993_v33  ;;  %v2126_v33 = vadd.f32 %v2125_v1, %v1276_v52 }
 0x1d5   :  { %v2133_v20 = vrot.slane %v2132_v31, 2 }
 0x1d6   :  { %v732_v60 = vpop.f32.mrf.mxu2  ;;  %v2127_v0 = vrot.slane %v2126_v33, 2 }
 0x1d7   :  { %829 = vst [vmem:[#allocation10 + $0x140] sm:$0xff] %v732_v60  ;;  %v2134_v62 = vadd.f32 %v2133_v20, %v2132_v31 }
 0x1d8   :  { %v1281_v17 = vpop.f32.mrf.mxu3  ;;  %v2128_v56 = vadd.f32 %v2127_v0, %v2126_v33 }
 0x1d9   :  { %v2137_v43 = vrot.slane %v1281_v17, 4  ;;  %v2135_v37 = vrot.slane %v2134_v62, 1 }
 0x1db   :  { %v2136_v13 = vadd.f32 %v2135_v37, %v2134_v62  ;;  %v919_v62 = vld [vmem:[#allocation5 + $0x290] sm:$0xff] }
 0x1dc   :  { %675 = vmatmul.bf16.gmra.mxu0 %v3859_v30  ;;  %1617 = vmatmul.bf16.gmra.mxu1 %v3901_v21  ;;  %v2138_v21 = vadd.f32 %v2137_v43, %v1281_v17  ;;  %v917_v17 = vld [vmem:[#allocation5 + $0x280] sm:$0xff] }
 0x1dd   :  { %1323 = vmatmul.bf16.gmra.mxu3 %v4029_v8 }
 0x1de   :  { %v2139_v55 = vrot.slane %v2138_v21, 2 }
 0x1e0   :  { %v1284_v39 = vpop.f32.mrf.mxu3  ;;  %v2140_v26 = vadd.f32 %v2139_v55, %v2138_v21 }
 0x1e1   :  { %v2143_v51 = vrot.slane %v1284_v39, 4 }
 0x1e2   :  { %v2141_v4 = vrot.slane %v2140_v26, 1 }
 0x1e3   :  { %v2144_v57 = vadd.f32 %v2143_v51, %v1284_v39  ;;  %v4043_v39 = vpack.c.bf16 %v918_v38, %v917_v17 }
 0x1e4   :  { %763 = vmatmul.bf16.gmra.mxu2 %v477_v35  ;;  %v2129_v35 = vrot.slane %v2128_v56, 1  ;;  %v2142_v60 = vadd.f32 %v2141_v4, %v2140_v26 }
 0x1e5   :  { %v2145_v24 = vrot.slane %v2144_v57, 2 }
 0x1e6   :  { %v2130_v23 = vadd.f32 %v2129_v35, %v2128_v56  ;;  %v838_v56 = vld [vmem:[#allocation5 + $0x8] sm:$0xff] }
 0x1e7   :  { %v2146_v3 = vadd.f32 %v2145_v24, %v2144_v57  ;;  %v840_v24 = vld [vmem:[#allocation5 + $0x18] sm:$0xff] }
 0x1e8   :  { %v1286_v42 = vpop.f32.mrf.mxu3 }
 0x1e9   :  { %v2149_v45 = vrot.slane %v1286_v42, 4  ;;  %v2147_v16 = vrot.slane %v2146_v3, 1 }
 0x1eb   :  { %v2150_v34 = vadd.f32 %v2149_v45, %v1286_v42  ;;  %v2148_v1 = vadd.f32 %v2147_v16, %v2146_v3 }
 0x1ec   :  { %680 = vmatmul.bf16.gmra.mxu0 %v3889_v6  ;;  %1622 = vmatmul.bf16.gmra.mxu1 %v3915_v50  ;;  %v2124_v50 = vadd.f32 %v2123_v48, %v2122_v27  ;;  %v837_v27 = vld [vmem:[#allocation5] sm:$0xff]  ;;  %v920_v48 = vld [vmem:[#allocation5 + $0x298] sm:$0xff] }
 0x1ed   :  { %1328 = vmatmul.bf16.gmra.mxu3 %v4034_v49  ;;  %v2151_v59 = vrot.slane %v2150_v34, 2  ;;  %v4050_v42 = vpack.c.bf16 %v838_v56, %v837_v27  ;;  %v4055_v35 = vpack.c.bf16 %v920_v48, %v919_v62  ;;  %v843_v48 = vld [vmem:[#allocation5 + $0x30] sm:$0xff] }
 0x1ee   :  { %v2735_v32 = vsel %vm2679_vm1, %v2130_v23, %v2124_v50  ;;  %v922_v23 = vld [vmem:[#allocation5 + $0x2a8] sm:$0xff] }
 0x1ef   :  { %v2152_v52 = vadd.f32 %v2151_v59, %v2150_v34  ;;  %v2736_v25 = vsel %vm2681_vm2, %v2136_v13, %v2735_v32  ;;  %v839_v34 = vld [vmem:[#allocation5 + $0x10] sm:$0xff]  ;;  %v841_v13 = vld [vmem:[#allocation5 + $0x20] sm:$0xff]  ;;  %v842_v32 = vld [vmem:[#allocation5 + $0x28] sm:$0xff] }
 0x1f0   :  { %v1289_v44 = vpop.f32.mrf.mxu3  ;;  %v2737_v11 = vsel %vm2683_vm3, %v2142_v60, %v2736_v25  ;;  %v4059_v37 = vpack.c.bf16 %v840_v24, %v839_v34  ;;  %v844_v34 = vld [vmem:[#allocation5 + $0x38] sm:$0xff] }
 0x1f1   :  { %v2155_v5 = vrot.slane %v1289_v44, 4  ;;  %v2738_v0 = vsel %vm2685_vm4, %v2148_v1, %v2737_v11 }
 0x1f3   :  { %v2156_v14 = vadd.f32 %v2155_v5, %v1289_v44 }
 0x1f4   :  { %768 = vmatmul.bf16.gmra.mxu2 %v3782_v46  ;;  %v2153_v46 = vrot.slane %v2152_v52, 1 }
 0x1f5   :  { %v2157_v40 = vrot.slane %v2156_v14, 2 }
 0x1f6   :  { %v2154_v31 = vadd.f32 %v2153_v46, %v2152_v52 }
 0x1f7   :  { %v2158_v22 = vadd.f32 %v2157_v40, %v2156_v14 }
 0x1f8   :  { %v1291_v41 = vpop.f32.mrf.mxu3  ;;  %v2739_v21 = vsel %vm2687_vm5, %v2154_v31, %v2738_v0  ;;  %v923_v0 = vld [vmem:[#allocation5 + $0x2b0] sm:$0xff] }
 0x1f9   :  { %v2161_v33 = vrot.slane %v1291_v41, 4  ;;  %v2159_v43 = vrot.slane %v2158_v22, 1 }
 0x1fb   :  { %v2162_v58 = vadd.f32 %v2161_v33, %v1291_v41 }
 0x1fc   :  { %685 = vmatmul.bf16.gmra.mxu0 %v3981_v18  ;;  %1627 = vmatmul.bf16.gmra.mxu1 %v3934_v28  ;;  %v2160_v28 = vadd.f32 %v2159_v43, %v2158_v22  ;;  %v4067_v22 = vpack.c.bf16 %v842_v32, %v841_v13 }
 0x1fd   :  { %v2163_v51 = vrot.slane %v2162_v58, 2  ;;  %1333 = vmatmul.bf16.gmra.mxu3 %v4043_v39 }
 0x1fe   :  { %v2740_v57 = vsel %vm2689_vm6, %v2160_v28, %v2739_v21 }
 0x1ff   :  { %v2164_v20 = vadd.f32 %v2163_v51, %v2162_v58  ;;  %v924_v51 = vld [vmem:[#allocation5 + $0x2b8] sm:$0xff] }
 0x200   :  { %v1294_v29 = vpop.f32.mrf.mxu3  ;;  %v4071_v27 = vpack.c.bf16 %v924_v51, %v923_v0 }
 0x201   :  { %v2165_v47 = vrot.slane %v2164_v20, 1  ;;  %v2167_v3 = vrot.slane %v1294_v29, 4 }
 0x203   :  { %v2166_v55 = vadd.f32 %v2165_v47, %v2164_v20  ;;  %v2168_v4 = vadd.f32 %v2167_v3, %v1294_v29 }
 0x204   :  { %773 = vmatmul.bf16.gmra.mxu2 %v3859_v30 }
 0x205   :  { %v2741_v45 = vsel %vm2691_vm7, %v2166_v55, %v2740_v57  ;;  %v2169_v25 = vrot.slane %v2168_v4, 2 }
 0x206   :  { %2821 = vst [vmem:[#allocation11 + $0x38] sm:$0xff] %v2741_v45 }
 0x207   :  { %v2170_v1 = vadd.f32 %v2169_v25, %v2168_v4 }
 0x208   :  { %v1296_v30 = vpop.f32.mrf.mxu3 }
 0x209   :  { %v2173_v44 = vrot.slane %v1296_v30, 4  ;;  %v2171_v56 = vrot.slane %v2170_v1, 1 }
 0x20b   :  { %v2174_v5 = vadd.f32 %v2173_v44, %v1296_v30  ;;  %v2172_v45 = vadd.f32 %v2171_v56, %v2170_v1  ;;  %v926_v1 = vld [vmem:[#allocation5 + $0x2c8] sm:$0xff] }
 0x20c   :  { %1462 = vmatmul.bf16.vlgmr.msrb.gmra.mxu0 %v4050_v42  ;;  %1632 = vmatmul.bf16.gmra.mxu1 %v3974_v61  ;;  %v921_v61 = vld [vmem:[#allocation5 + $0x2a0] sm:$0xff]  ;;  %v846_v56 = vld [vmem:[#allocation5 + $0x48] sm:$0xff] }
 0x20d   :  { %1338 = vmatmul.bf16.gmra.mxu3 %v4055_v35  ;;  %v4063_v59 = vpack.c.bf16 %v922_v23, %v921_v61  ;;  %v2175_v46 = vrot.slane %v2174_v5, 2 }
 0x20f   :  { %v2176_v41 = vadd.f32 %v2175_v46, %v2174_v5 }
 0x210   :  { %v1299_v26 = vpop.f32.mrf.mxu3 }
 0x211   :  { %v2177_v29 = vrot.slane %v2176_v41, 1 }
 0x213   :  { %v2178_v30 = vadd.f32 %v2177_v29, %v2176_v41 }
 0x214   :  { %778 = vmatmul.bf16.gmra.mxu2 %v3889_v6  ;;  %v2179_v6 = vrot.slane %v1299_v26, 4 }
 0x215   :  { %v2742_v44 = vsel %vm2679_vm1, %v2178_v30, %v2172_v45 }
 0x216   :  { %v2180_v40 = vadd.f32 %v2179_v6, %v1299_v26  ;;  %v4076_v6 = vpack.c.bf16 %v844_v34, %v843_v48 }
 0x218   :  { %v1301_v50 = vpop.f32.mrf.mxu3  ;;  %v2181_v38 = vrot.slane %v2180_v40, 2 }
 0x219   :  { %v2185_v16 = vrot.slane %v1301_v50, 4 }
 0x21a   :  { %v2182_v20 = vadd.f32 %v2181_v38, %v2180_v40  ;;  %v925_v38 = vld [vmem:[#allocation5 + $0x2c0] sm:$0xff] }
 0x21c   :  { %1467 = vmatmul.bf16.gmra.mxu0 %v4059_v37  ;;  %1637 = vmatmul.bf16.gmra.mxu1 %v4002_v54  ;;  %v2183_v55 = vrot.slane %v2182_v20, 1 }
 0x21d   :  { %1343 = vmatmul.bf16.gmra.mxu3 %v4063_v59 }
 0x21e   :  { %v2184_v3 = vadd.f32 %v2183_v55, %v2182_v20  ;;  %v845_v20 = vld [vmem:[#allocation5 + $0x40] sm:$0xff] }
 0x21f   :  { %v4089_v55 = vpack.c.bf16 %v846_v56, %v845_v20 }
 0x220   :  { %v1304_v52 = vpop.f32.mrf.mxu3 }
 0x221   :  { %v2191_v17 = vrot.slane %v1304_v52, 4 }
 0x223   :  { %v2192_v11 = vadd.f32 %v2191_v17, %v1304_v52 }
 0x224   :  { %783 = vmatmul.bf16.gmra.mxu2 %v3981_v18  ;;  %v2186_v18 = vadd.f32 %v2185_v16, %v1301_v50  ;;  %v2743_v16 = vsel %vm2681_vm2, %v2184_v3, %v2742_v44  ;;  %v847_v3 = vld [vmem:[#allocation5 + $0x50] sm:$0xff]  ;;  %v848_v44 = vld [vmem:[#allocation5 + $0x58] sm:$0xff] }
 0x225   :  { %v2193_v57 = vrot.slane %v2192_v11, 2 }
 0x226   :  { %v2187_v31 = vrot.slane %v2186_v18, 2 }
 0x227   :  { %v735_v14 = vpop.f32.mrf.mxu2  ;;  %v2194_v24 = vadd.f32 %v2193_v57, %v2192_v11  ;;  %v4082_v11 = vpack.c.bf16 %v926_v1, %v925_v38  ;;  %v850_v38 = vld [vmem:[#allocation5 + $0x68] sm:$0xff] }
 0x228   :  { %832 = vst [vmem:[#allocation10 + $0x158] sm:$0xff] %v735_v14  ;;  %v1306_v33 = vpop.f32.mrf.mxu3 }
 0x229   :  { %v661_v54 = vpop.f32.mrf.mxu0  ;;  %v710_v60 = vpop.f32.mrf.mxu1  ;;  %v2197_v58 = vrot.slane %v1306_v33, 4  ;;  %v2195_v32 = vrot.slane %v2194_v24, 1 }
 0x22a   :  { %801 = vst [vmem:[#allocation10 + $0x60] sm:$0xff] %v661_v54 }
 0x22b   :  { %802 = vst [vmem:[#allocation10 + $0x68] sm:$0xff] %v710_v60  ;;  %v2198_v47 = vadd.f32 %v2197_v58, %v1306_v33  ;;  %v2196_v40 = vadd.f32 %v2195_v32, %v2194_v24  ;;  %v927_v24 = vld [vmem:[#allocation5 + $0x2d0] sm:$0xff] }
 0x22c   :  { %1472 = vmatmul.bf16.gmra.mxu0 %v4067_v22  ;;  %1642 = vmatmul.bf16.gmra.mxu1 %v4017_v9  ;;  %v2188_v9 = vadd.f32 %v2187_v31, %v2186_v18 }
 0x22d   :  { %1348 = vmatmul.bf16.gmra.mxu3 %v4071_v27  ;;  %v2199_v62 = vrot.slane %v2198_v47, 2 }
 0x22e   :  { %v2189_v61 = vrot.slane %v2188_v9, 1 }
 0x22f   :  { %v737_v43 = vpop.f32.mrf.mxu2  ;;  %v2200_v4 = vadd.f32 %v2199_v62, %v2198_v47 }
 0x230   :  { %835 = vst [vmem:[#allocation10 + $0x170] sm:$0xff] %v737_v43  ;;  %v1309_v26 = vpop.f32.mrf.mxu3  ;;  %v2190_v52 = vadd.f32 %v2189_v61, %v2188_v9 }
 0x231   :  { %v663_v28 = vpop.f32.mrf.mxu0  ;;  %v712_v21 = vpop.f32.mrf.mxu1  ;;  %v2203_v23 = vrot.slane %v1309_v26, 4  ;;  %v2201_v54 = vrot.slane %v2200_v4, 1 }
 0x232   :  { %804 = vst [vmem:[#allocation10 + $0x78] sm:$0xff] %v663_v28  ;;  %v2744_v46 = vsel %vm2683_vm3, %v2190_v52, %v2743_v16  ;;  %v930_v16 = vld [vmem:[#allocation5 + $0x2e8] sm:$0xff] }
 0x233   :  { %805 = vst [vmem:[#allocation10 + $0x80] sm:$0xff] %v712_v21  ;;  %v2204_v5 = vadd.f32 %v2203_v23, %v1309_v26  ;;  %v2202_v33 = vadd.f32 %v2201_v54, %v2200_v4  ;;  %v928_v26 = vld [vmem:[#allocation5 + $0x2d8] sm:$0xff] }
 0x234   :  { %1133 = vmatmul.bf16.vlgmr.msra.gmra.mxu2 %v4050_v42 }
 0x235   :  { %v2205_v14 = vrot.slane %v2204_v5, 2 }
 0x237   :  { %v749_v50 = vpop.f32.mrf.mxu2  ;;  %v2206_v60 = vadd.f32 %v2205_v14, %v2204_v5  ;;  %v4098_v5 = vpack.c.bf16 %v848_v44, %v847_v3  ;;  %v929_v14 = vld [vmem:[#allocation5 + $0x2e0] sm:$0xff] }
 0x238   :  { %791 = vst [vmem:[#allocation10 + $0x10] sm:$0xff] %v749_v50  ;;  %v1311_v25 = vpop.f32.mrf.mxu3  ;;  %v4094_v50 = vpack.c.bf16 %v928_v26, %v927_v24 }
 0x239   :  { %v666_v13 = vpop.f32.mrf.mxu0  ;;  %v715_v42 = vpop.f32.mrf.mxu1  ;;  %v2209_v18 = vrot.slane %v1311_v25, 4  ;;  %v2207_v41 = vrot.slane %v2206_v60, 1 }
 0x23a   :  { %807 = vst [vmem:[#allocation10 + $0x90] sm:$0xff] %v666_v13 }
 0x23b   :  { %808 = vst [vmem:[#allocation10 + $0x98] sm:$0xff] %v715_v42  ;;  %v2210_v43 = vadd.f32 %v2209_v18, %v1311_v25  ;;  %v2208_v51 = vadd.f32 %v2207_v41, %v2206_v60  ;;  %v849_v18 = vld [vmem:[#allocation5 + $0x60] sm:$0xff] }
 0x23c   :  { %1477 = vmatmul.bf16.gmra.mxu0 %v4076_v6  ;;  %1647 = vmatmul.bf16.gmra.mxu1 %v4023_v19  ;;  %v2745_v19 = vsel %vm2685_vm4, %v2196_v40, %v2744_v46 }
 0x23d   :  { %v2211_v0 = vrot.slane %v2210_v43, 2  ;;  %1353 = vmatmul.bf16.gmra.mxu3 %v4082_v11  ;;  %v2746_v28 = vsel %vm2687_vm5, %v2202_v33, %v2745_v19  ;;  %v4106_v19 = vpack.c.bf16 %v850_v38, %v849_v18 }
 0x23e   :  { %v2747_v9 = vsel %vm2689_vm6, %v2208_v51, %v2746_v28 }
 0x23f   :  { %v751_v17 = vpop.f32.mrf.mxu2  ;;  %v2212_v21 = vadd.f32 %v2211_v0, %v2210_v43 }
 0x240   :  { %794 = vst [vmem:[#allocation10 + $0x28] sm:$0xff] %v751_v17  ;;  %v1314_v29 = vpop.f32.mrf.mxu3 }
 0x241   :  { %v668_v31 = vpop.f32.mrf.mxu0  ;;  %v717_v58 = vpop.f32.mrf.mxu1  ;;  %v2213_v57 = vrot.slane %v2212_v21, 1  ;;  %v2215_v54 = vrot.slane %v1314_v29, 4 }
 0x242   :  { %810 = vst [vmem:[#allocation10 + $0xa8] sm:$0xff] %v668_v31 }
 0x243   :  { %811 = vst [vmem:[#allocation10 + $0xb0] sm:$0xff] %v717_v58  ;;  %v2214_v45 = vadd.f32 %v2213_v57, %v2212_v21  ;;  %v2216_v17 = vadd.f32 %v2215_v54, %v1314_v29 }
 0x244   :  { %1138 = vmatmul.bf16.gmra.mxu2 %v4059_v37 }
 0x245   :  { %v2748_v37 = vsel %vm2691_vm7, %v2214_v45, %v2747_v9  ;;  %v2217_v31 = vrot.slane %v2216_v17, 2 }
 0x246   :  { %2822 = vst [vmem:[#allocation11 + $0x40] sm:$0xff] %v2748_v37 }
 0x247   :  { %v754_v47 = vpop.f32.mrf.mxu2  ;;  %v2218_v20 = vadd.f32 %v2217_v31, %v2216_v17 }
 0x248   :  { %797 = vst [vmem:[#allocation10 + $0x40] sm:$0xff] %v754_v47  ;;  %v1316_v48 = vpop.f32.mrf.mxu3 }
 0x249   :  { %v671_v30 = vpop.f32.mrf.mxu0  ;;  %v1613_v62 = vpop.f32.mrf.mxu1  ;;  %v2221_v60 = vrot.slane %v1316_v48, 4 }
 0x24a   :  { %813 = vst [vmem:[#allocation10 + $0xc0] sm:$0xff] %v671_v30  ;;  %v931_v30 = vld [vmem:[#allocation5 + $0x2f0] sm:$0xff] }
 0x24b   :  { %2890 = vst [vmem:[#allocation13 + $0x1e0] sm:$0xff] %v1613_v62  ;;  %v932_v62 = vld [vmem:[#allocation5 + $0x2f8] sm:$0xff] }
 0x24c   :  { %1482 = vmatmul.bf16.gmra.mxu0 %v4089_v55  ;;  %1652 = vmatmul.bf16.gmra.mxu1 %v4029_v8 }
 0x24d   :  { %1358 = vmatmul.bf16.gmra.mxu3 %v4094_v50 }
 0x24f   :  { %v756_v34 = vpop.f32.mrf.mxu2 }
 0x250   :  { %800 = vst [vmem:[#allocation10 + $0x58] sm:$0xff] %v756_v34  ;;  %v1319_v4 = vpop.f32.mrf.mxu3  ;;  %v2219_v34 = vrot.slane %v2218_v20, 1 }
 0x251   :  { %v673_v61 = vpop.f32.mrf.mxu0  ;;  %v1615_v23 = vpop.f32.mrf.mxu1  ;;  %v2227_v46 = vrot.slane %v1319_v4, 4 }
 0x252   :  { %816 = vst [vmem:[#allocation10 + $0xd8] sm:$0xff] %v673_v61 }
 0x253   :  { %2891 = vst [vmem:[#allocation13 + $0x1e8] sm:$0xff] %v1615_v23  ;;  %v2228_v43 = vadd.f32 %v2227_v46, %v1319_v4  ;;  %v2220_v4 = vadd.f32 %v2219_v34, %v2218_v20  ;;  %v934_v20 = vld [vmem:[#allocation5 + $0x308] sm:$0xff] }
 0x254   :  { %1143 = vmatmul.bf16.gmra.mxu2 %v4067_v22  ;;  %v4102_v22 = vpack.c.bf16 %v930_v16, %v929_v14 }
 0x257   :  { %v759_v8 = vpop.f32.mrf.mxu2 }
 0x258   :  { %803 = vst [vmem:[#allocation10 + $0x70] sm:$0xff] %v759_v8  ;;  %v1321_v32 = vpop.f32.mrf.mxu3 }
 0x259   :  { %v676_v13 = vpop.f32.mrf.mxu0  ;;  %v1618_v42 = vpop.f32.mrf.mxu1  ;;  %v2233_v33 = vrot.slane %v1321_v32, 4 }
 0x25a   :  { %819 = vst [vmem:[#allocation10 + $0xf0] sm:$0xff] %v676_v13 }
 0x25b   :  { %2892 = vst [vmem:[#allocation13 + $0x1f0] sm:$0xff] %v1618_v42  ;;  %v2234_v21 = vadd.f32 %v2233_v33, %v1321_v32  ;;  %v851_v42 = vld [vmem:[#allocation5 + $0x70] sm:$0xff]  ;;  %v852_v32 = vld [vmem:[#allocation5 + $0x78] sm:$0xff] }
 0x25c   :  { %1487 = vmatmul.bf16.gmra.mxu0 %v4098_v5  ;;  %1657 = vmatmul.bf16.gmra.mxu1 %v4034_v49  ;;  %v2222_v49 = vadd.f32 %v2221_v60, %v1316_v48  ;;  %v4110_v48 = vpack.c.bf16 %v932_v62, %v931_v30  ;;  %v4115_v46 = vpack.c.bf16 %v852_v32, %v851_v42 }
 0x25d   :  { %1363 = vmatmul.bf16.gmra.mxu3 %v4102_v22  ;;  %v2235_v9 = vrot.slane %v2234_v21, 2 }
 0x25e   :  { %v2223_v58 = vrot.slane %v2222_v49, 2 }
 0x25f   :  { %v761_v52 = vpop.f32.mrf.mxu2  ;;  %v2236_v44 = vadd.f32 %v2235_v9, %v2234_v21 }
 0x260   :  { %806 = vst [vmem:[#allocation10 + $0x88] sm:$0xff] %v761_v52  ;;  %v1324_v1 = vpop.f32.mrf.mxu3  ;;  %v2224_v56 = vadd.f32 %v2223_v58, %v2222_v49 }
 0x261   :  { %v678_v40 = vpop.f32.mrf.mxu0  ;;  %v1620_v25 = vpop.f32.mrf.mxu1  ;;  %v2239_v28 = vrot.slane %v1324_v1, 4  ;;  %v2237_v54 = vrot.slane %v2236_v44, 1 }
 0x262   :  { %822 = vst [vmem:[#allocation10 + $0x108] sm:$0xff] %v678_v40  ;;  %v2225_v24 = vrot.slane %v2224_v56, 1 }
 0x263   :  { %2893 = vst [vmem:[#allocation13 + $0x1f8] sm:$0xff] %v1620_v25  ;;  %v2240_v29 = vadd.f32 %v2239_v28, %v1324_v1  ;;  %v2238_v1 = vadd.f32 %v2237_v54, %v2236_v44 }
 0x264   :  { %1148 = vmatmul.bf16.gmra.mxu2 %v4076_v6  ;;  %v2229_v6 = vrot.slane %v2228_v43, 2  ;;  %v2226_v8 = vadd.f32 %v2225_v24, %v2224_v56  ;;  %v853_v24 = vld [vmem:[#allocation5 + $0x80] sm:$0xff] }
 0x265   :  { %v2241_v3 = vrot.slane %v2240_v29, 2 }
 0x266   :  { %v2230_v37 = vadd.f32 %v2229_v6, %v2228_v43  ;;  %v2749_v25 = vsel %vm2679_vm1, %v2226_v8, %v2220_v4  ;;  %v933_v6 = vld [vmem:[#allocation5 + $0x300] sm:$0xff] }
 0x267   :  { %v764_v41 = vpop.f32.mrf.mxu2  ;;  %v2242_v52 = vadd.f32 %v2241_v3, %v2240_v29  ;;  %v4121_v29 = vpack.c.bf16 %v934_v20, %v933_v6  ;;  %v858_v6 = vld [vmem:[#allocation5 + $0xa8] sm:$0xff] }
 0x268   :  { %809 = vst [vmem:[#allocation10 + $0xa0] sm:$0xff] %v764_v41  ;;  %v1326_v47 = vpop.f32.mrf.mxu3 }
 0x269   :  { %v681_v0 = vpop.f32.mrf.mxu0  ;;  %v1623_v51 = vpop.f32.mrf.mxu1  ;;  %v2245_v45 = vrot.slane %v1326_v47, 4  ;;  %v2243_v38 = vrot.slane %v2242_v52, 1 }
 0x26a   :  { %825 = vst [vmem:[#allocation10 + $0x120] sm:$0xff] %v681_v0 }
 0x26b   :  { %2894 = vst [vmem:[#allocation13 + $0x200] sm:$0xff] %v1623_v51  ;;  %v2246_v26 = vadd.f32 %v2245_v45, %v1326_v47  ;;  %v2244_v58 = vadd.f32 %v2243_v38, %v2242_v52  ;;  %v935_v52 = vld [vmem:[#allocation5 + $0x310] sm:$0xff] }
 0x26c   :  { %1492 = vmatmul.bf16.gmra.mxu0 %v4106_v19  ;;  %1662 = vmatmul.bf16.gmra.mxu1 %v4043_v39  ;;  %v2231_v39 = vrot.slane %v2230_v37, 1 }
 0x26d   :  { %1368 = vmatmul.bf16.gmra.mxu3 %v4110_v48  ;;  %v2247_v13 = vrot.slane %v2246_v26, 2 }
 0x26e   :  { %v2232_v40 = vadd.f32 %v2231_v39, %v2230_v37 }
 0x26f   :  { %v766_v57 = vpop.f32.mrf.mxu2  ;;  %v2248_v17 = vadd.f32 %v2247_v13, %v2246_v26  ;;  %v854_v26 = vld [vmem:[#allocation5 + $0x88] sm:$0xff] }
 0x270   :  { %812 = vst [vmem:[#allocation10 + $0xb8] sm:$0xff] %v766_v57  ;;  %v1329_v14 = vpop.f32.mrf.mxu3  ;;  %v2750_v33 = vsel %vm2681_vm2, %v2232_v40, %v2749_v25  ;;  %v4128_v39 = vpack.c.bf16 %v854_v26, %v853_v24  ;;  %v855_v40 = vld [vmem:[#allocation5 + $0x90] sm:$0xff]  ;;  %v856_v25 = vld [vmem:[#allocation5 + $0x98] sm:$0xff] }
 0x271   :  { %v683_v61 = vpop.f32.mrf.mxu0  ;;  %v1625_v23 = vpop.f32.mrf.mxu1  ;;  %v2251_v60 = vrot.slane %v1329_v14, 4  ;;  %v2249_v43 = vrot.slane %v2248_v17, 1  ;;  %v2751_v51 = vsel %vm2683_vm3, %v2238_v1, %v2750_v33  ;;  %v938_v33 = vld [vmem:[#allocation5 + $0x328] sm:$0xff] }
 0x272   :  { %828 = vst [vmem:[#allocation10 + $0x138] sm:$0xff] %v683_v61 }
 0x273   :  { %2895 = vst [vmem:[#allocation13 + $0x208] sm:$0xff] %v1625_v23  ;;  %v2252_v49 = vadd.f32 %v2251_v60, %v1329_v14  ;;  %v2250_v47 = vadd.f32 %v2249_v43, %v2248_v17  ;;  %v936_v14 = vld [vmem:[#allocation5 + $0x318] sm:$0xff] }
 0x274   :  { %1153 = vmatmul.bf16.gmra.mxu2 %v4089_v55 }
 0x275   :  { %v2253_v41 = vrot.slane %v2252_v49, 2 }
 0x277   :  { %v769_v16 = vpop.f32.mrf.mxu2  ;;  %v2254_v31 = vadd.f32 %v2253_v41, %v2252_v49  ;;  %v4137_v49 = vpack.c.bf16 %v856_v25, %v855_v40  ;;  %v937_v41 = vld [vmem:[#allocation5 + $0x320] sm:$0xff] }
 0x278   :  { %815 = vst [vmem:[#allocation10 + $0xd0] sm:$0xff] %v769_v16  ;;  %v1331_v0 = vpop.f32.mrf.mxu3  ;;  %v4133_v16 = vpack.c.bf16 %v936_v14, %v935_v52 }
 0x279   :  { %v686_v18 = vpop.f32.mrf.mxu0  ;;  %v1628_v55 = vpop.f32.mrf.mxu1  ;;  %v2257_v21 = vrot.slane %v1331_v0, 4  ;;  %v2255_v56 = vrot.slane %v2254_v31, 1 }
 0x27a   :  { %831 = vst [vmem:[#allocation10 + $0x150] sm:$0xff] %v686_v18 }
 0x27b   :  { %2896 = vst [vmem:[#allocation13 + $0x210] sm:$0xff] %v1628_v55  ;;  %v2258_v57 = vadd.f32 %v2257_v21, %v1331_v0  ;;  %v2256_v62 = vadd.f32 %v2255_v56, %v2254_v31  ;;  %v857_v21 = vld [vmem:[#allocation5 + $0xa0] sm:$0xff] }
 0x27c   :  { %1497 = vmatmul.bf16.gmra.mxu0 %v4115_v46  ;;  %1667 = vmatmul.bf16.gmra.mxu1 %v4055_v35  ;;  %v2752_v35 = vsel %vm2685_vm4, %v2244_v58, %v2751_v51 }
 0x27d   :  { %v2259_v30 = vrot.slane %v2258_v57, 2  ;;  %1373 = vmatmul.bf16.gmra.mxu3 %v4121_v29  ;;  %v2753_v37 = vsel %vm2687_vm5, %v2250_v47, %v2752_v35  ;;  %v4145_v35 = vpack.c.bf16 %v858_v6, %v857_v21 }
 0x27e   :  { %v2754_v44 = vsel %vm2689_vm6, %v2256_v62, %v2753_v37 }
 0x27f   :  { %v771_v28 = vpop.f32.mrf.mxu2  ;;  %v2260_v34 = vadd.f32 %v2259_v30, %v2258_v57 }
 0x280   :  { %818 = vst [vmem:[#allocation10 + $0xe8] sm:$0xff] %v771_v28  ;;  %v1334_v61 = vpop.f32.mrf.mxu3 }
 0x281   :  { %v688_v9 = vpop.f32.mrf.mxu0  ;;  %v1630_v45 = vpop.f32.mrf.mxu1  ;;  %v2261_v3 = vrot.slane %v2260_v34, 1  ;;  %v2263_v43 = vrot.slane %v1334_v61, 4 }
 0x282   :  { %834 = vst [vmem:[#allocation10 + $0x168] sm:$0xff] %v688_v9 }
 0x283   :  { %2897 = vst [vmem:[#allocation13 + $0x218] sm:$0xff] %v1630_v45  ;;  %v2262_v4 = vadd.f32 %v2261_v3, %v2260_v34  ;;  %v2264_v28 = vadd.f32 %v2263_v43, %v1334_v61 }
 0x284   :  { %1158 = vmatmul.bf16.gmra.mxu2 %v4098_v5 }
 0x285   :  { %v2755_v5 = vsel %vm2691_vm7, %v2262_v4, %v2754_v44  ;;  %v2265_v9 = vrot.slane %v2264_v28, 2  ;;  %v939_v4 = vld [vmem:[#allocation5 + $0x330] sm:$0xff] }
 0x286   :  { %2823 = vst [vmem:[#allocation11 + $0x48] sm:$0xff] %v2755_v5 }
 0x287   :  { %v774_v23 = vpop.f32.mrf.mxu2  ;;  %v2266_v24 = vadd.f32 %v2265_v9, %v2264_v28 }
 0x288   :  { %821 = vst [vmem:[#allocation10 + $0x100] sm:$0xff] %v774_v23  ;;  %v1336_v42 = vpop.f32.mrf.mxu3 }
 0x289   :  { %v1463_v8 = vpop.f32.mrf.mxu0  ;;  %v1633_v13 = vpop.f32.mrf.mxu1  ;;  %v2269_v31 = vrot.slane %v1336_v42, 4 }
 0x28a   :  { %2830 = vst [vmem:[#allocation13] sm:$0xff] %v1463_v8  ;;  %v940_v8 = vld [vmem:[#allocation5 + $0x338] sm:$0xff] }
 0x28b   :  { %2898 = vst [vmem:[#allocation13 + $0x220] sm:$0xff] %v1633_v13  ;;  %v4149_v5 = vpack.c.bf16 %v940_v8, %v939_v4 }
 0x28c   :  { %1502 = vmatmul.bf16.gmra.mxu0 %v4128_v39  ;;  %1672 = vmatmul.bf16.gmra.mxu1 %v4063_v59 }
 0x28d   :  { %1378 = vmatmul.bf16.gmra.mxu3 %v4133_v16 }
 0x28f   :  { %v776_v32 = vpop.f32.mrf.mxu2 }
 0x290   :  { %824 = vst [vmem:[#allocation10 + $0x118] sm:$0xff] %v776_v32  ;;  %v1339_v17 = vpop.f32.mrf.mxu3 }
 0x291   :  { %v1465_v54 = vpop.f32.mrf.mxu0  ;;  %v1635_v60 = vpop.f32.mrf.mxu1  ;;  %v2275_v51 = vrot.slane %v1339_v17, 4 }
 0x292   :  { %2831 = vst [vmem:[#allocation13 + $0x8] sm:$0xff] %v1465_v54 }
 0x293   :  { %2899 = vst [vmem:[#allocation13 + $0x228] sm:$0xff] %v1635_v60  ;;  %v2276_v57 = vadd.f32 %v2275_v51, %v1339_v17 }
 0x294   :  { %1163 = vmatmul.bf16.gmra.mxu2 %v4106_v19  ;;  %v4141_v19 = vpack.c.bf16 %v938_v33, %v937_v41 }
 0x297   :  { %v779_v59 = vpop.f32.mrf.mxu2 }
 0x298   :  { %827 = vst [vmem:[#allocation10 + $0x130] sm:$0xff] %v779_v59  ;;  %v1341_v38 = vpop.f32.mrf.mxu3  ;;  %v859_v59 = vld [vmem:[#allocation5 + $0xb0] sm:$0xff] }
 0x299   :  { %v1468_v18 = vpop.f32.mrf.mxu0  ;;  %v1638_v55 = vpop.f32.mrf.mxu1  ;;  %v2281_v47 = vrot.slane %v1341_v38, 4 }
 0x29a   :  { %2832 = vst [vmem:[#allocation13 + $0x10] sm:$0xff] %v1468_v18  ;;  %v860_v18 = vld [vmem:[#allocation5 + $0xb8] sm:$0xff] }
 0x29b   :  { %2900 = vst [vmem:[#allocation13 + $0x230] sm:$0xff] %v1638_v55  ;;  %v2282_v37 = vadd.f32 %v2281_v47, %v1341_v38 }
 0x29c   :  { %1507 = vmatmul.bf16.gmra.mxu0 %v4137_v49  ;;  %1677 = vmatmul.bf16.gmra.mxu1 %v4071_v27  ;;  %v2270_v27 = vadd.f32 %v2269_v31, %v1336_v42  ;;  %v2267_v42 = vrot.slane %v2266_v24, 1 }
 0x29d   :  { %1383 = vmatmul.bf16.gmra.mxu3 %v4141_v19  ;;  %v2283_v44 = vrot.slane %v2282_v37, 2 }
 0x29e   :  { %v2271_v45 = vrot.slane %v2270_v27, 2  ;;  %v2268_v25 = vadd.f32 %v2267_v42, %v2266_v24 }
 0x29f   :  { %v781_v1 = vpop.f32.mrf.mxu2  ;;  %v2284_v60 = vadd.f32 %v2283_v44, %v2282_v37  ;;  %v941_v37 = vld [vmem:[#allocation5 + $0x340] sm:$0xff] }
 0x2a0   :  { %830 = vst [vmem:[#allocation10 + $0x148] sm:$0xff] %v781_v1  ;;  %v1344_v20 = vpop.f32.mrf.mxu3  ;;  %v2272_v26 = vadd.f32 %v2271_v45, %v2270_v27 }
 0x2a1   :  { %v1470_v58 = vpop.f32.mrf.mxu0  ;;  %v1640_v0 = vpop.f32.mrf.mxu1  ;;  %v2287_v34 = vrot.slane %v1344_v20, 4  ;;  %v2285_v33 = vrot.slane %v2284_v60, 1 }
 0x2a2   :  { %2833 = vst [vmem:[#allocation13 + $0x18] sm:$0xff] %v1470_v58  ;;  %v2273_v32 = vrot.slane %v2272_v26, 1 }
 0x2a3   :  { %2901 = vst [vmem:[#allocation13 + $0x238] sm:$0xff] %v1640_v0  ;;  %v2288_v61 = vadd.f32 %v2287_v34, %v1344_v20  ;;  %v4156_v0 = vpack.c.bf16 %v860_v18, %v859_v59  ;;  %v2286_v21 = vadd.f32 %v2285_v33, %v2284_v60  ;;  %v944_v33 = vld [vmem:[#allocation5 + $0x358] sm:$0xff] }
 0x2a4   :  { %1168 = vmatmul.bf16.gmra.mxu2 %v4115_v46  ;;  %v2277_v46 = vrot.slane %v2276_v57, 2  ;;  %v2274_v17 = vadd.f32 %v2273_v32, %v2272_v26  ;;  %v861_v32 = vld [vmem:[#allocation5 + $0xc0] sm:$0xff] }
 0x2a5   :  { %v2289_v54 = vrot.slane %v2288_v61, 2 }
 0x2a6   :  { %v2278_v13 = vadd.f32 %v2277_v46, %v2276_v57  ;;  %v2756_v58 = vsel %vm2679_vm1, %v2274_v17, %v2268_v25  ;;  %v942_v46 = vld [vmem:[#allocation5 + $0x348] sm:$0xff] }
 0x2a7   :  { %v784_v56 = vpop.f32.mrf.mxu2  ;;  %v2290_v55 = vadd.f32 %v2289_v54, %v2288_v61  ;;  %v4164_v61 = vpack.c.bf16 %v942_v46, %v941_v37 }
 0x2a8   :  { %833 = vst [vmem:[#allocation10 + $0x160] sm:$0xff] %v784_v56  ;;  %v1346_v23 = vpop.f32.mrf.mxu3 }
 0x2a9   :  { %v1473_v30 = vpop.f32.mrf.mxu0  ;;  %v1643_v62 = vpop.f32.mrf.mxu1  ;;  %v2293_v40 = vrot.slane %v1346_v23, 4 }
 0x2aa   :  { %2834 = vst [vmem:[#allocation13 + $0x20] sm:$0xff] %v1473_v30 }
 0x2ab   :  { %2902 = vst [vmem:[#allocation13 + $0x240] sm:$0xff] %v1643_v62  ;;  %v2294_v38 = vadd.f32 %v2293_v40, %v1346_v23 }
 0x2ac   :  { %1512 = vmatmul.bf16.gmra.mxu0 %v4145_v35  ;;  %1682 = vmatmul.bf16.gmra.mxu1 %v4082_v11  ;;  %v2279_v11 = vrot.slane %v2278_v13, 1 }
 0x2ad   :  { %1388 = vmatmul.bf16.gmra.mxu3 %v4149_v5  ;;  %v2295_v31 = vrot.slane %v2294_v38, 2 }
 0x2ae   :  { %v2280_v43 = vadd.f32 %v2279_v11, %v2278_v13 }
 0x2af   :  { %v786_v3 = vpop.f32.mrf.mxu2  ;;  %v2296_v27 = vadd.f32 %v2295_v31, %v2294_v38 }
 0x2b0   :  { %836 = vst [vmem:[#allocation10 + $0x178] sm:$0xff] %v786_v3  ;;  %v1349_v1 = vpop.f32.mrf.mxu3  ;;  %v2757_v6 = vsel %vm2681_vm2, %v2280_v43, %v2756_v58 }
 0x2b1   :  { %v1475_v52 = vpop.f32.mrf.mxu0  ;;  %v1645_v14 = vpop.f32.mrf.mxu1  ;;  %v2299_v20 = vrot.slane %v1349_v1, 4  ;;  %v2297_v56 = vrot.slane %v2296_v27, 1  ;;  %v2758_v45 = vsel %vm2683_vm3, %v2286_v21, %v2757_v6  ;;  %2970 = dma.vmem_to_hbm [thread:$0]  %s2963_s9, 6144, %s2965_s29, [#allocation4], %s3476_s10, %s3476_s10, %s3477_s11  }
 0x2b2   :  { %2835 = vst [vmem:[#allocation13 + $0x28] sm:$0xff] %v1475_v52  ;;  %v862_v52 = vld [vmem:[#allocation5 + $0xc8] sm:$0xff] }
 0x2b3   :  { %2903 = vst [vmem:[#allocation13 + $0x248] sm:$0xff] %v1645_v14  ;;  %v2300_v57 = vadd.f32 %v2299_v20, %v1349_v1  ;;  %v2298_v24 = vadd.f32 %v2297_v56, %v2296_v27  ;;  %v4171_v25 = vpack.c.bf16 %v862_v52, %v861_v32  ;;  %v943_v1 = vld [vmem:[#allocation5 + $0x350] sm:$0xff] }
 0x2b4   :  { %1173 = vmatmul.bf16.gmra.mxu2 %v4128_v39  ;;  %v2291_v39 = vrot.slane %v2290_v55, 1  ;;  %v4176_v43 = vpack.c.bf16 %v944_v33, %v943_v1 }
 0x2b5   :  { %v2301_v34 = vrot.slane %v2300_v57, 2 }
 0x2b6   :  { %v2292_v47 = vadd.f32 %v2291_v39, %v2290_v55 }
 0x2b7   :  { %v4153_v41 = vpop.f32.mrf.mxu2  ;;  %v2302_v44 = vadd.f32 %v2301_v34, %v2300_v57 }
 0x2b8   :  { %v1351_v9 = vpop.f32.mrf.mxu3 }
 0x2b9   :  { %v1478_v51 = vpop.f32.mrf.mxu0  ;;  %v1648_v28 = vpop.f32.mrf.mxu1  ;;  %v2305_v62 = vrot.slane %v1351_v9, 4  ;;  %v2303_v8 = vrot.slane %v2302_v44, 1 }
 0x2ba   :  { %2836 = vst [vmem:[#allocation13 + $0x30] sm:$0xff] %v1478_v51  ;;  %v863_v51 = vld [vmem:[#allocation5 + $0xd0] sm:$0xff] }
 0x2bb   :  { %2904 = vst [vmem:[#allocation13 + $0x250] sm:$0xff] %v1648_v28  ;;  %v2306_v26 = vadd.f32 %v2305_v62, %v1351_v9  ;;  %v2304_v14 = vadd.f32 %v2303_v8, %v2302_v44  ;;  %v864_v28 = vld [vmem:[#allocation5 + $0xd8] sm:$0xff]  ;;  %v945_v9 = vld [vmem:[#allocation5 + $0x360] sm:$0xff] }
 0x2bc   :  { %1517 = vmatmul.bf16.gmra.mxu0 %v4156_v0  ;;  %1687 = vmatmul.bf16.gmra.mxu1 %v4094_v50  ;;  %v2759_v50 = vsel %vm2685_vm4, %v2292_v47, %v2758_v45  ;;  %v1783_v47 = vrot.slane %v4153_v41, 4  ;;  %v946_v45 = vld [vmem:[#allocation5 + $0x368] sm:$0xff] }
 0x2bd   :  { %v2307_v4 = vrot.slane %v2306_v26, 2  ;;  %1393 = vmatmul.bf16.gmra.mxu3 %v4164_v61  ;;  %v2760_v13 = vsel %vm2687_vm5, %v2298_v24, %v2759_v50  ;;  %v4187_v46 = vpack.c.bf16 %v946_v45, %v945_v9 }
 0x2be   :  { %v2761_v40 = vsel %vm2689_vm6, %v2304_v14, %v2760_v13  ;;  %v865_v14 = vld [vmem:[#allocation5 + $0xe0] sm:$0xff] }
 0x2bf   :  { %v4162_v30 = vpop.f32.mrf.mxu2  ;;  %v2308_v42 = vadd.f32 %v2307_v4, %v2306_v26 }
 0x2c0   :  { %v1354_v54 = vpop.f32.mrf.mxu3  ;;  %v1789_v20 = vrot.slane %v4162_v30, 4 }
 0x2c1   :  { %v1480_v23 = vpop.f32.mrf.mxu0  ;;  %v1650_v3 = vpop.f32.mrf.mxu1  ;;  %v2309_v11 = vrot.slane %v2308_v42, 1  ;;  %v2311_v24 = vrot.slane %v1354_v54, 4 }
 0x2c2   :  { %2837 = vst [vmem:[#allocation13 + $0x38] sm:$0xff] %v1480_v23  ;;  %v1790_v62 = vadd.f32 %v1789_v20, %v4162_v30 }
 0x2c3   :  { %2905 = vst [vmem:[#allocation13 + $0x258] sm:$0xff] %v1650_v3  ;;  %v2310_v17 = vadd.f32 %v2309_v11, %v2308_v42  ;;  %v2312_v42 = vadd.f32 %v2311_v24, %v1354_v54  ;;  %v866_v11 = vld [vmem:[#allocation5 + $0xe8] sm:$0xff] }
 0x2c4   :  { %1178 = vmatmul.bf16.gmra.mxu2 %v4137_v49  ;;  %v1791_v4 = vrot.slane %v1790_v62, 2 }
 0x2c5   :  { %v2762_v49 = vsel %vm2691_vm7, %v2310_v17, %v2761_v40 }
 0x2c6   :  { %2824 = vst [vmem:[#allocation11 + $0x50] sm:$0xff] %v2762_v49 }
 0x2c7   :  { %v1139_v60 = vpop.f32.mrf.mxu2 }
 0x2c8   :  { %v1356_v55 = vpop.f32.mrf.mxu3 }
 0x2c9   :  { %v1483_v59 = vpop.f32.mrf.mxu0  ;;  %v1653_v18 = vpop.f32.mrf.mxu1  ;;  %v2317_v26 = vrot.slane %v1356_v55, 4 }
 0x2ca   :  { %2838 = vst [vmem:[#allocation13 + $0x40] sm:$0xff] %v1483_v59 }
 0x2cb   :  { %2906 = vst [vmem:[#allocation13 + $0x260] sm:$0xff] %v1653_v18  ;;  %v2318_v32 = vadd.f32 %v2317_v26, %v1356_v55  ;;  %v1792_v18 = vadd.f32 %v1791_v4, %v1790_v62 }
 0x2cc   :  { %1522 = vmatmul.bf16.gmra.mxu0 %v4171_v25  ;;  %1692 = vmatmul.bf16.gmra.mxu1 %v4102_v22  ;;  %v4180_v22 = vpack.c.bf16 %v864_v28, %v863_v51 }
 0x2cd   :  { %1398 = vmatmul.bf16.gmra.mxu3 %v4176_v43  ;;  %v1793_v9 = vrot.slane %v1792_v18, 1 }
 0x2cf   :  { %v1141_v38 = vpop.f32.mrf.mxu2 }
 0x2d0   :  { %v1359_v39 = vpop.f32.mrf.mxu3  ;;  %v1801_v37 = vrot.slane %v1141_v38, 4 }
 0x2d1   :  { %v1485_v31 = vpop.f32.mrf.mxu0  ;;  %v1655_v58 = vpop.f32.mrf.mxu1  ;;  %v2323_v30 = vrot.slane %v1359_v39, 4 }
 0x2d2   :  { %2839 = vst [vmem:[#allocation13 + $0x48] sm:$0xff] %v1485_v31  ;;  %v1802_v8 = vadd.f32 %v1801_v37, %v1141_v38  ;;  %v2313_v31 = vrot.slane %v2312_v42, 2 }
 0x2d3   :  { %2907 = vst [vmem:[#allocation13 + $0x268] sm:$0xff] %v1655_v58  ;;  %v2324_v33 = vadd.f32 %v2323_v30, %v1359_v39  ;;  %v2319_v58 = vrot.slane %v2318_v32, 2 }
 0x2d4   :  { %1183 = vmatmul.bf16.gmra.mxu2 %v4145_v35  ;;  %v1795_v35 = vrot.slane %v1139_v60, 4  ;;  %v1803_v49 = vrot.slane %v1802_v8, 2  ;;  %v2314_v45 = vadd.f32 %v2313_v31, %v2312_v42  ;;  %v1794_v42 = vadd.f32 %v1793_v9, %v1792_v18 }
 0x2d5   :  { %v2320_v62 = vadd.f32 %v2319_v58, %v2318_v32 }
 0x2d6   :  { %v1796_v44 = vadd.f32 %v1795_v35, %v1139_v60  ;;  %v1804_v20 = vadd.f32 %v1803_v49, %v1802_v8  ;;  %v2325_v35 = vrot.slane %v2324_v33, 2 }
 0x2d7   :  { %v1144_v27 = vpop.f32.mrf.mxu2 }
 0x2d8   :  { %v1361_v56 = vpop.f32.mrf.mxu3  ;;  %v1807_v34 = vrot.slane %v1144_v27, 4  ;;  %v1797_v59 = vrot.slane %v1796_v44, 2  ;;  %v1805_v4 = vrot.slane %v1804_v20, 1  ;;  %v2326_v30 = vadd.f32 %v2325_v35, %v2324_v33 }
 0x2d9   :  { %v1488_v21 = vpop.f32.mrf.mxu0  ;;  %v1658_v6 = vpop.f32.mrf.mxu1  ;;  %v2329_v60 = vrot.slane %v1361_v56, 4 }
 0x2da   :  { %2840 = vst [vmem:[#allocation13 + $0x50] sm:$0xff] %v1488_v21  ;;  %v1808_v13 = vadd.f32 %v1807_v34, %v1144_v27  ;;  %v1798_v21 = vadd.f32 %v1797_v59, %v1796_v44  ;;  %v948_v44 = vld [vmem:[#allocation5 + $0x378] sm:$0xff]  ;;  %v2327_v31 = vrot.slane %v2326_v30, 1 }
 0x2db   :  { %2908 = vst [vmem:[#allocation13 + $0x270] sm:$0xff] %v1658_v6  ;;  %v2330_v6 = vadd.f32 %v2329_v60, %v1361_v56 }
 0x2dc   :  { %1527 = vmatmul.bf16.gmra.mxu0 %v4180_v22  ;;  %1697 = vmatmul.bf16.gmra.mxu1 %v4110_v48  ;;  %v1784_v48 = vadd.f32 %v1783_v47, %v4153_v41  ;;  %v1809_v38 = vrot.slane %v1808_v13, 2 }
 0x2dd   :  { %1403 = vmatmul.bf16.gmra.mxu3 %v4187_v46 }
 0x2de   :  { %v1785_v17 = vrot.slane %v1784_v48, 2  ;;  %v1810_v39 = vadd.f32 %v1809_v38, %v1808_v13  ;;  %v1806_v38 = vadd.f32 %v1805_v4, %v1804_v20 }
 0x2df   :  { %v1146_v57 = vpop.f32.mrf.mxu2 }
 0x2e0   :  { %v1813_v23 = vrot.slane %v1146_v57, 4  ;;  %v1364_v40 = vpop.f32.mrf.mxu3  ;;  %v1786_v27 = vadd.f32 %v1785_v17, %v1784_v48  ;;  %v947_v48 = vld [vmem:[#allocation5 + $0x370] sm:$0xff]  ;;  %v1811_v32 = vrot.slane %v1810_v39, 1 }
 0x2e1   :  { %v1490_v3 = vpop.f32.mrf.mxu0  ;;  %v1660_v50 = vpop.f32.mrf.mxu1  ;;  %v4196_v13 = vpack.c.bf16 %v948_v44, %v947_v48 }
 0x2e2   :  { %2841 = vst [vmem:[#allocation13 + $0x58] sm:$0xff] %v1490_v3  ;;  %v1814_v52 = vadd.f32 %v1813_v23, %v1146_v57  ;;  %v2335_v57 = vrot.slane %v1364_v40, 4  ;;  %v1787_v26 = vrot.slane %v1786_v27, 1  ;;  %v1799_v23 = vrot.slane %v1798_v21, 1 }
 0x2e3   :  { %2909 = vst [vmem:[#allocation13 + $0x278] sm:$0xff] %v1660_v50  ;;  %v2331_v50 = vrot.slane %v2330_v6, 2 }
 0x2e4   :  { %1188 = vmatmul.bf16.gmra.mxu2 %v4156_v0  ;;  %v4192_v0 = vpack.c.bf16 %v866_v11, %v865_v14  ;;  %v1815_v51 = vrot.slane %v1814_v52, 2  ;;  %v2336_v34 = vadd.f32 %v2335_v57, %v1364_v40  ;;  %v2315_v14 = vrot.slane %v2314_v45, 1 }
 0x2e5   :  { %v2321_v11 = vrot.slane %v2320_v62, 1  ;;  %v1800_v60 = vadd.f32 %v1799_v23, %v1798_v21  ;;  %v867_v21 = vld [vmem:[#allocation5 + $0xf0] sm:$0xff] }
 0x2e6   :  { %v1816_v37 = vadd.f32 %v1815_v51, %v1814_v52  ;;  %v2337_v59 = vrot.slane %v2336_v34, 2  ;;  %v1812_v51 = vadd.f32 %v1811_v32, %v1810_v39 }
 0x2e7   :  { %v1149_v41 = vpop.f32.mrf.mxu2 }
 0x2e8   :  { %v1819_v1 = vrot.slane %v1149_v41, 4  ;;  %v1366_v24 = vpop.f32.mrf.mxu3  ;;  %v2338_v35 = vadd.f32 %v2337_v59, %v2336_v34 }
 0x2e9   :  { %v1493_v55 = vpop.f32.mrf.mxu0  ;;  %v1663_v28 = vpop.f32.mrf.mxu1  ;;  %v2341_v18 = vrot.slane %v1366_v24, 4 }
 0x2ea   :  { %v1820_v54 = vadd.f32 %v1819_v1, %v1149_v41  ;;  %2842 = vst [vmem:[#allocation13 + $0x60] sm:$0xff] %v1493_v55  ;;  %v1788_v41 = vadd.f32 %v1787_v26, %v1786_v27  ;;  %v2332_v1 = vadd.f32 %v2331_v50, %v2330_v6  ;;  %v2322_v55 = vadd.f32 %v2321_v11, %v2320_v62 }
 0x2eb   :  { %2910 = vst [vmem:[#allocation13 + $0x280] sm:$0xff] %v1663_v28  ;;  %v2342_v6 = vadd.f32 %v2341_v18, %v1366_v24  ;;  %v2328_v50 = vadd.f32 %v2327_v31, %v2326_v30 }
 0x2ec   :  { %v1821_v47 = vrot.slane %v1820_v54, 2  ;;  %1532 = vmatmul.bf16.gmra.mxu0 %v4192_v0  ;;  %1702 = vmatmul.bf16.gmra.mxu1 %v4121_v29  ;;  %v1817_v29 = vrot.slane %v1816_v37, 1  ;;  %v2680_v58 = vsel %vm2679_vm1, %v1794_v42, %v1788_v41  ;;  %v2333_v23 = vrot.slane %v2332_v1, 1 }
 0x2ed   :  { %1408 = vmatmul.bf16.gmra.mxu3 %v4196_v13  ;;  %v2682_v20 = vsel %vm2681_vm2, %v1800_v60, %v2680_v58  ;;  %v2343_v39 = vrot.slane %v2342_v6, 2  ;;  %v949_v60 = vld [vmem:[#allocation5 + $0x380] sm:$0xff] }
 0x2ee   :  { %v1822_v3 = vadd.f32 %v1821_v47, %v1820_v54  ;;  %v2316_v54 = vadd.f32 %v2315_v14, %v2314_v45  ;;  %v1818_v28 = vadd.f32 %v1817_v29, %v1816_v37  ;;  %v868_v47 = vld [vmem:[#allocation5 + $0xf8] sm:$0xff]  ;;  %v2334_v42 = vadd.f32 %v2333_v23, %v2332_v1 }
 0x2ef   :  { %v1151_v56 = vpop.f32.mrf.mxu2  ;;  %v4207_v37 = vpack.c.bf16 %v868_v47, %v867_v21  ;;  %v2344_v4 = vadd.f32 %v2343_v39, %v2342_v6  ;;  %v869_v21 = vld [vmem:[#allocation5 + $0x100] sm:$0xff]  ;;  %v870_v47 = vld [vmem:[#allocation5 + $0x108] sm:$0xff] }
 0x2f0   :  { %v1825_v8 = vrot.slane %v1151_v56, 4  ;;  %v1823_v49 = vrot.slane %v1822_v3, 1  ;;  %v1369_v57 = vpop.f32.mrf.mxu3  ;;  %v2763_v62 = vsel %vm2679_vm1, %v2322_v55, %v2316_v54  ;;  %v4225_v23 = vpack.c.bf16 %v870_v47, %v869_v21 }
 0x2f1   :  { %v1495_v40 = vpop.f32.mrf.mxu0  ;;  %v1665_v17 = vpop.f32.mrf.mxu1  ;;  %v2764_v32 = vsel %vm2681_vm2, %v2328_v50, %v2763_v62  ;;  %v2347_v14 = vrot.slane %v1369_v57, 4  ;;  %v2345_v11 = vrot.slane %v2344_v4, 1  ;;  %v951_v62 = vld [vmem:[#allocation5 + $0x390] sm:$0xff] }
 0x2f2   :  { %v1826_v52 = vadd.f32 %v1825_v8, %v1151_v56  ;;  %2843 = vst [vmem:[#allocation13 + $0x68] sm:$0xff] %v1495_v40  ;;  %v1824_v9 = vadd.f32 %v1823_v49, %v1822_v3  ;;  %v2339_v3 = vrot.slane %v2338_v35, 1  ;;  %v950_v49 = vld [vmem:[#allocation5 + $0x388] sm:$0xff] }
 0x2f3   :  { %2911 = vst [vmem:[#allocation13 + $0x288] sm:$0xff] %v1665_v17  ;;  %v2765_v17 = vsel %vm2683_vm3, %v2334_v42, %v2764_v32  ;;  %v4218_v31 = vpack.c.bf16 %v950_v49, %v949_v60 }
 0x2f4   :  { %v1827_v33 = vrot.slane %v1826_v52, 2  ;;  %1193 = vmatmul.bf16.gmra.mxu2 %v4171_v25  ;;  %v2684_v25 = vsel %vm2683_vm3, %v1806_v38, %v2682_v20  ;;  %v2340_v29 = vadd.f32 %v2339_v3, %v2338_v35  ;;  %v2346_v38 = vadd.f32 %v2345_v11, %v2344_v4  ;;  %v871_v3 = vld [vmem:[#allocation5 + $0x110] sm:$0xff]  ;;  %v872_v4 = vld [vmem:[#allocation5 + $0x118] sm:$0xff] }
 0x2f5   :  { %v2686_v45 = vsel %vm2685_vm4, %v1812_v51, %v2684_v25 }
 0x2f6   :  { %v1828_v27 = vadd.f32 %v1827_v33, %v1826_v52  ;;  %v2688_v34 = vsel %vm2687_vm5, %v1818_v28, %v2686_v45  ;;  %v2348_v52 = vadd.f32 %v2347_v14, %v1369_v57 }
 0x2f7   :  { %v4202_v26 = vpop.f32.mrf.mxu2  ;;  %v2690_v8 = vsel %vm2689_vm6, %v1824_v9, %v2688_v34  ;;  %v952_v34 = vld [vmem:[#allocation5 + $0x398] sm:$0xff] }
 0x2f8   :  { %v1829_v56 = vrot.slane %v1828_v27, 1  ;;  %v1371_v40 = vpop.f32.mrf.mxu3  ;;  %v2349_v1 = vrot.slane %v2348_v52, 2 }
 0x2f9   :  { %v1498_v48 = vpop.f32.mrf.mxu0  ;;  %v1668_v44 = vpop.f32.mrf.mxu1  ;;  %v2353_v41 = vrot.slane %v1371_v40, 4 }
 0x2fa   :  { %v1830_v24 = vadd.f32 %v1829_v56, %v1828_v27  ;;  %2844 = vst [vmem:[#allocation13 + $0x70] sm:$0xff] %v1498_v48  ;;  %v2350_v51 = vadd.f32 %v2349_v1, %v2348_v52 }
 0x2fb   :  { %2912 = vst [vmem:[#allocation13 + $0x290] sm:$0xff] %v1668_v44  ;;  %v2354_v33 = vadd.f32 %v2353_v41, %v1371_v40  ;;  %v953_v40 = vld [vmem:[#allocation5 + $0x3a0] sm:$0xff] }
 0x2fc   :  { %v2692_v30 = vsel %vm2691_vm7, %v1830_v24, %v2690_v8  ;;  %1537 = vmatmul.bf16.gmra.mxu0 %v4207_v37  ;;  %1707 = vmatmul.bf16.gmra.mxu1 %v4133_v16  ;;  %v2766_v16 = vsel %vm2685_vm4, %v2340_v29, %v2765_v17  ;;  %v2351_v55 = vrot.slane %v2350_v51, 1  ;;  %v4230_v24 = vpack.c.bf16 %v952_v34, %v951_v62  ;;  %v954_v17 = vld [vmem:[#allocation5 + $0x3a8] sm:$0xff] }
 0x2fd   :  { %2814 = vst [vmem:[#allocation11] sm:$0xff] %v2692_v30  ;;  %v2355_v54 = vrot.slane %v2354_v33, 2  ;;  %1413 = vmatmul.bf16.gmra.mxu3 %v4218_v31  ;;  %v2767_v28 = vsel %vm2687_vm5, %v2346_v38, %v2766_v16  ;;  %v1831_v29 = vrot.slane %v4202_v26, 4  ;;  %v4241_v49 = vpack.c.bf16 %v954_v17, %v953_v40 }
 0x2fe   :  { %v2352_v35 = vadd.f32 %v2351_v55, %v2350_v51 }
 0x2ff   :  { %v4216_v59 = vpop.f32.mrf.mxu2  ;;  %v2356_v27 = vadd.f32 %v2355_v54, %v2354_v33 }
 0x300   :  { %v1374_v6 = vpop.f32.mrf.mxu3  ;;  %v2768_v9 = vsel %vm2689_vm6, %v2352_v35, %v2767_v28  ;;  %v1837_v14 = vrot.slane %v4216_v59, 4  ;;  %v873_v35 = vld [vmem:[#allocation5 + $0x120] sm:$0xff] }
 0x301   :  { %v1500_v18 = vpop.f32.mrf.mxu0  ;;  %v1670_v58 = vpop.f32.mrf.mxu1  ;;  %v2357_v20 = vrot.slane %v2356_v27, 1  ;;  %v2359_v38 = vrot.slane %v1374_v6, 4 }
 0x302   :  { %2845 = vst [vmem:[#allocation13 + $0x78] sm:$0xff] %v1500_v18  ;;  %v1838_v41 = vadd.f32 %v1837_v14, %v4216_v59 }
 0x303   :  { %2913 = vst [vmem:[#allocation13 + $0x298] sm:$0xff] %v1670_v58  ;;  %v2358_v25 = vadd.f32 %v2357_v20, %v2356_v27  ;;  %v2360_v27 = vadd.f32 %v2359_v38, %v1374_v6  ;;  %v874_v20 = vld [vmem:[#allocation5 + $0x128] sm:$0xff] }
 0x304   :  { %1198 = vmatmul.bf16.gmra.mxu2 %v4180_v22  ;;  %v1839_v54 = vrot.slane %v1838_v41, 2 }
 0x305   :  { %v2769_v22 = vsel %vm2691_vm7, %v2358_v25, %v2768_v9 }
 0x306   :  { %2825 = vst [vmem:[#allocation11 + $0x58] sm:$0xff] %v2769_v22 }
 0x307   :  { %v1159_v57 = vpop.f32.mrf.mxu2 }
 0x308   :  { %v1376_v39 = vpop.f32.mrf.mxu3 }
 0x309   :  { %v1503_v56 = vpop.f32.mrf.mxu0  ;;  %v1673_v50 = vpop.f32.mrf.mxu1  ;;  %v2365_v33 = vrot.slane %v1376_v39, 4 }
 0x30a   :  { %2846 = vst [vmem:[#allocation13 + $0x80] sm:$0xff] %v1503_v56 }
 0x30b   :  { %2914 = vst [vmem:[#allocation13 + $0x2a0] sm:$0xff] %v1673_v50  ;;  %v2366_v21 = vadd.f32 %v2365_v33, %v1376_v39  ;;  %v1840_v50 = vadd.f32 %v1839_v54, %v1838_v41 }
 0x30c   :  { %1542 = vmatmul.bf16.gmra.mxu0 %v4225_v23  ;;  %1712 = vmatmul.bf16.gmra.mxu1 %v4141_v19  ;;  %v4234_v19 = vpack.c.bf16 %v872_v4, %v871_v3 }
 0x30d   :  { %1418 = vmatmul.bf16.gmra.mxu3 %v4230_v24  ;;  %v1841_v40 = vrot.slane %v1840_v50, 1 }
 0x30f   :  { %v1161_v45 = vpop.f32.mrf.mxu2 }
 0x310   :  { %v1379_v8 = vpop.f32.mrf.mxu3  ;;  %v1849_v60 = vrot.slane %v1161_v45, 4 }
 0x311   :  { %v1505_v48 = vpop.f32.mrf.mxu0  ;;  %v1675_v44 = vpop.f32.mrf.mxu1  ;;  %v2371_v59 = vrot.slane %v1379_v8, 4 }
 0x312   :  { %2847 = vst [vmem:[#allocation13 + $0x88] sm:$0xff] %v1505_v48  ;;  %v1850_v55 = vadd.f32 %v1849_v60, %v1161_v45  ;;  %v2361_v48 = vrot.slane %v2360_v27, 2 }
 0x313   :  { %2915 = vst [vmem:[#allocation13 + $0x2a8] sm:$0xff] %v1675_v44  ;;  %v2372_v34 = vadd.f32 %v2371_v59, %v1379_v8  ;;  %v2367_v44 = vrot.slane %v2366_v21, 2 }
 0x314   :  { %1203 = vmatmul.bf16.gmra.mxu2 %v4192_v0  ;;  %v1843_v0 = vrot.slane %v1159_v57, 4  ;;  %v1851_v22 = vrot.slane %v1850_v55, 2  ;;  %v2362_v17 = vadd.f32 %v2361_v48, %v2360_v27  ;;  %v1842_v27 = vadd.f32 %v1841_v40, %v1840_v50 }
 0x315   :  { %v2368_v41 = vadd.f32 %v2367_v44, %v2366_v21 }
 0x316   :  { %v1844_v51 = vadd.f32 %v1843_v0, %v1159_v57  ;;  %v1852_v14 = vadd.f32 %v1851_v22, %v1850_v55  ;;  %v2373_v0 = vrot.slane %v2372_v34, 2 }
 0x317   :  { %v1164_v42 = vpop.f32.mrf.mxu2 }
 0x318   :  { %v1381_v11 = vpop.f32.mrf.mxu3  ;;  %v1855_v1 = vrot.slane %v1164_v42, 4  ;;  %v1845_v56 = vrot.slane %v1844_v51, 2  ;;  %v1853_v54 = vrot.slane %v1852_v14, 1  ;;  %v2374_v59 = vadd.f32 %v2373_v0, %v2372_v34 }
 0x319   :  { %v1508_v30 = vpop.f32.mrf.mxu0  ;;  %v1678_v32 = vpop.f32.mrf.mxu1  ;;  %v2377_v57 = vrot.slane %v1381_v11, 4 }
 0x31a   :  { %2848 = vst [vmem:[#allocation13 + $0x90] sm:$0xff] %v1508_v30  ;;  %v1856_v28 = vadd.f32 %v1855_v1, %v1164_v42  ;;  %v1846_v30 = vadd.f32 %v1845_v56, %v1844_v51  ;;  %v956_v51 = vld [vmem:[#allocation5 + $0x3b8] sm:$0xff]  ;;  %v2375_v48 = vrot.slane %v2374_v59, 1 }
 0x31b   :  { %2916 = vst [vmem:[#allocation13 + $0x2b0] sm:$0xff] %v1678_v32  ;;  %v2378_v32 = vadd.f32 %v2377_v57, %v1381_v11 }
 0x31c   :  { %1547 = vmatmul.bf16.gmra.mxu0 %v4234_v19  ;;  %1717 = vmatmul.bf16.gmra.mxu1 %v4149_v5  ;;  %v1832_v5 = vadd.f32 %v1831_v29, %v4202_v26  ;;  %v1857_v45 = vrot.slane %v1856_v28, 2 }
 0x31d   :  { %1423 = vmatmul.bf16.gmra.mxu3 %v4241_v49 }
 0x31e   :  { %v1833_v25 = vrot.slane %v1832_v5, 2  ;;  %v1858_v8 = vadd.f32 %v1857_v45, %v1856_v28  ;;  %v1854_v45 = vadd.f32 %v1853_v54, %v1852_v14 }
 0x31f   :  { %v1166_v52 = vpop.f32.mrf.mxu2 }
 0x320   :  { %v1861_v18 = vrot.slane %v1166_v52, 4  ;;  %v1384_v9 = vpop.f32.mrf.mxu3  ;;  %v1834_v42 = vadd.f32 %v1833_v25, %v1832_v5  ;;  %v955_v5 = vld [vmem:[#allocation5 + $0x3b0] sm:$0xff]  ;;  %v1859_v21 = vrot.slane %v1858_v8, 1 }
 0x321   :  { %v1510_v58 = vpop.f32.mrf.mxu0  ;;  %v1680_v16 = vpop.f32.mrf.mxu1  ;;  %v4250_v28 = vpack.c.bf16 %v956_v51, %v955_v5 }
 0x322   :  { %2849 = vst [vmem:[#allocation13 + $0x98] sm:$0xff] %v1510_v58  ;;  %v1862_v47 = vadd.f32 %v1861_v18, %v1166_v52  ;;  %v2383_v52 = vrot.slane %v1384_v9, 4  ;;  %v1835_v33 = vrot.slane %v1834_v42, 1  ;;  %v1847_v18 = vrot.slane %v1846_v30, 1 }
 0x323   :  { %2917 = vst [vmem:[#allocation13 + $0x2b8] sm:$0xff] %v1680_v16  ;;  %v2379_v16 = vrot.slane %v2378_v32, 2 }
 0x324   :  { %1208 = vmatmul.bf16.gmra.mxu2 %v4207_v37  ;;  %v4246_v37 = vpack.c.bf16 %v874_v20, %v873_v35  ;;  %v1863_v3 = vrot.slane %v1862_v47, 2  ;;  %v2384_v1 = vadd.f32 %v2383_v52, %v1384_v9  ;;  %v2363_v35 = vrot.slane %v2362_v17, 1 }
 0x325   :  { %v2369_v20 = vrot.slane %v2368_v41, 1  ;;  %v1848_v57 = vadd.f32 %v1847_v18, %v1846_v30  ;;  %v875_v30 = vld [vmem:[#allocation5 + $0x130] sm:$0xff] }
 0x326   :  { %v1864_v60 = vadd.f32 %v1863_v3, %v1862_v47  ;;  %v2385_v56 = vrot.slane %v2384_v1, 2  ;;  %v1860_v3 = vadd.f32 %v1859_v21, %v1858_v8 }
 0x327   :  { %v1169_v26 = vpop.f32.mrf.mxu2 }
 0x328   :  { %v1867_v62 = vrot.slane %v1169_v26, 4  ;;  %v1386_v38 = vpop.f32.mrf.mxu3  ;;  %v2386_v0 = vadd.f32 %v2385_v56, %v2384_v1 }
 0x329   :  { %v1513_v39 = vpop.f32.mrf.mxu0  ;;  %v1683_v4 = vpop.f32.mrf.mxu1  ;;  %v2389_v50 = vrot.slane %v1386_v38, 4 }
 0x32a   :  { %v1868_v6 = vadd.f32 %v1867_v62, %v1169_v26  ;;  %2850 = vst [vmem:[#allocation13 + $0xa0] sm:$0xff] %v1513_v39  ;;  %v1836_v26 = vadd.f32 %v1835_v33, %v1834_v42  ;;  %v2380_v62 = vadd.f32 %v2379_v16, %v2378_v32  ;;  %v2370_v39 = vadd.f32 %v2369_v20, %v2368_v41 }
 0x32b   :  { %2918 = vst [vmem:[#allocation13 + $0x2c0] sm:$0xff] %v1683_v4  ;;  %v2390_v32 = vadd.f32 %v2389_v50, %v1386_v38  ;;  %v2376_v16 = vadd.f32 %v2375_v48, %v2374_v59 }
 0x32c   :  { %v1869_v29 = vrot.slane %v1868_v6, 2  ;;  %1552 = vmatmul.bf16.gmra.mxu0 %v4246_v37  ;;  %1722 = vmatmul.bf16.gmra.mxu1 %v4164_v61  ;;  %v1865_v61 = vrot.slane %v1864_v60, 1  ;;  %v2693_v44 = vsel %vm2679_vm1, %v1842_v27, %v1836_v26  ;;  %v2381_v18 = vrot.slane %v2380_v62, 1 }
 0x32d   :  { %1428 = vmatmul.bf16.gmra.mxu3 %v4250_v28  ;;  %v2694_v14 = vsel %vm2681_vm2, %v1848_v57, %v2693_v44  ;;  %v2391_v8 = vrot.slane %v2390_v32, 2  ;;  %v957_v57 = vld [vmem:[#allocation5 + $0x3c0] sm:$0xff] }
 0x32e   :  { %v1870_v58 = vadd.f32 %v1869_v29, %v1868_v6  ;;  %v2364_v6 = vadd.f32 %v2363_v35, %v2362_v17  ;;  %v1866_v4 = vadd.f32 %v1865_v61, %v1864_v60  ;;  %v876_v29 = vld [vmem:[#allocation5 + $0x138] sm:$0xff]  ;;  %v2382_v27 = vadd.f32 %v2381_v18, %v2380_v62 }
 0x32f   :  { %v1171_v11 = vpop.f32.mrf.mxu2  ;;  %v4261_v60 = vpack.c.bf16 %v876_v29, %v875_v30  ;;  %v2392_v54 = vadd.f32 %v2391_v8, %v2390_v32  ;;  %v877_v30 = vld [vmem:[#allocation5 + $0x140] sm:$0xff]  ;;  %v878_v29 = vld [vmem:[#allocation5 + $0x148] sm:$0xff] }
 0x330   :  { %v1873_v55 = vrot.slane %v1171_v11, 4  ;;  %v1871_v22 = vrot.slane %v1870_v58, 1  ;;  %v1389_v52 = vpop.f32.mrf.mxu3  ;;  %v2770_v41 = vsel %vm2679_vm1, %v2370_v39, %v2364_v6  ;;  %v4279_v18 = vpack.c.bf16 %v878_v29, %v877_v30 }
 0x331   :  { %v1515_v9 = vpop.f32.mrf.mxu0  ;;  %v1685_v25 = vpop.f32.mrf.mxu1  ;;  %v2771_v21 = vsel %vm2681_vm2, %v2376_v16, %v2770_v41  ;;  %v2395_v35 = vrot.slane %v1389_v52, 4  ;;  %v2393_v20 = vrot.slane %v2392_v54, 1  ;;  %v959_v41 = vld [vmem:[#allocation5 + $0x3d0] sm:$0xff] }
 0x332   :  { %v1874_v47 = vadd.f32 %v1873_v55, %v1171_v11  ;;  %2851 = vst [vmem:[#allocation13 + $0xa8] sm:$0xff] %v1515_v9  ;;  %v1872_v40 = vadd.f32 %v1871_v22, %v1870_v58  ;;  %v2387_v58 = vrot.slane %v2386_v0, 1  ;;  %v958_v22 = vld [vmem:[#allocation5 + $0x3c8] sm:$0xff] }
 0x333   :  { %2919 = vst [vmem:[#allocation13 + $0x2c8] sm:$0xff] %v1685_v25  ;;  %v2772_v25 = vsel %vm2683_vm3, %v2382_v27, %v2771_v21  ;;  %v4272_v48 = vpack.c.bf16 %v958_v22, %v957_v57 }
 0x334   :  { %v1875_v34 = vrot.slane %v1874_v47, 2  ;;  %1213 = vmatmul.bf16.gmra.mxu2 %v4225_v23  ;;  %v2695_v23 = vsel %vm2683_vm3, %v1854_v45, %v2694_v14  ;;  %v2388_v61 = vadd.f32 %v2387_v58, %v2386_v0  ;;  %v2394_v45 = vadd.f32 %v2393_v20, %v2392_v54  ;;  %v879_v58 = vld [vmem:[#allocation5 + $0x150] sm:$0xff]  ;;  %v880_v54 = vld [vmem:[#allocation5 + $0x158] sm:$0xff] }
 0x335   :  { %v2696_v17 = vsel %vm2685_vm4, %v1860_v3, %v2695_v23 }
 0x336   :  { %v1876_v42 = vadd.f32 %v1875_v34, %v1874_v47  ;;  %v2697_v1 = vsel %vm2687_vm5, %v1866_v4, %v2696_v17  ;;  %v2396_v47 = vadd.f32 %v2395_v35, %v1389_v52 }
 0x337   :  { %v4256_v33 = vpop.f32.mrf.mxu2  ;;  %v2698_v55 = vsel %vm2689_vm6, %v1872_v40, %v2697_v1  ;;  %v960_v1 = vld [vmem:[#allocation5 + $0x3d8] sm:$0xff] }
 0x338   :  { %v1877_v11 = vrot.slane %v1876_v42, 1  ;;  %v1391_v9 = vpop.f32.mrf.mxu3  ;;  %v2397_v62 = vrot.slane %v2396_v47, 2 }
 0x339   :  { %v1518_v5 = vpop.f32.mrf.mxu0  ;;  %v1688_v51 = vpop.f32.mrf.mxu1  ;;  %v2401_v26 = vrot.slane %v1391_v9, 4 }
 0x33a   :  { %v1878_v38 = vadd.f32 %v1877_v11, %v1876_v42  ;;  %2852 = vst [vmem:[#allocation13 + $0xb0] sm:$0xff] %v1518_v5  ;;  %v2398_v3 = vadd.f32 %v2397_v62, %v2396_v47 }
 0x33b   :  { %2920 = vst [vmem:[#allocation13 + $0x2d0] sm:$0xff] %v1688_v51  ;;  %v2402_v34 = vadd.f32 %v2401_v26, %v1391_v9  ;;  %v961_v9 = vld [vmem:[#allocation5 + $0x3e0] sm:$0xff] }
 0x33c   :  { %v2699_v59 = vsel %vm2691_vm7, %v1878_v38, %v2698_v55  ;;  %1557 = vmatmul.bf16.gmra.mxu0 %v4261_v60  ;;  %1727 = vmatmul.bf16.gmra.mxu1 %v4176_v43  ;;  %v2773_v43 = vsel %vm2685_vm4, %v2388_v61, %v2772_v25  ;;  %v2399_v39 = vrot.slane %v2398_v3, 1  ;;  %v4284_v38 = vpack.c.bf16 %v960_v1, %v959_v41  ;;  %v962_v25 = vld [vmem:[#allocation5 + $0x3e8] sm:$0xff] }
 0x33d   :  { %2815 = vst [vmem:[#allocation11 + $0x8] sm:$0xff] %v2699_v59  ;;  %v2403_v6 = vrot.slane %v2402_v34, 2  ;;  %1433 = vmatmul.bf16.gmra.mxu3 %v4272_v48  ;;  %v2774_v4 = vsel %vm2687_vm5, %v2394_v45, %v2773_v43  ;;  %v1879_v61 = vrot.slane %v4256_v33, 4  ;;  %v4295_v22 = vpack.c.bf16 %v962_v25, %v961_v9 }
 0x33e   :  { %v2400_v0 = vadd.f32 %v2399_v39, %v2398_v3 }
 0x33f   :  { %v4270_v56 = vpop.f32.mrf.mxu2  ;;  %v2404_v42 = vadd.f32 %v2403_v6, %v2402_v34 }
 0x340   :  { %v1394_v32 = vpop.f32.mrf.mxu3  ;;  %v2775_v40 = vsel %vm2689_vm6, %v2400_v0, %v2774_v4  ;;  %v1885_v35 = vrot.slane %v4270_v56, 4  ;;  %v881_v0 = vld [vmem:[#allocation5 + $0x160] sm:$0xff] }
 0x341   :  { %v1520_v50 = vpop.f32.mrf.mxu0  ;;  %v1690_v44 = vpop.f32.mrf.mxu1  ;;  %v2405_v14 = vrot.slane %v2404_v42, 1  ;;  %v2407_v45 = vrot.slane %v1394_v32, 4 }
 0x342   :  { %2853 = vst [vmem:[#allocation13 + $0xb8] sm:$0xff] %v1520_v50  ;;  %v1886_v26 = vadd.f32 %v1885_v35, %v4270_v56 }
 0x343   :  { %2921 = vst [vmem:[#allocation13 + $0x2d8] sm:$0xff] %v1690_v44  ;;  %v2406_v23 = vadd.f32 %v2405_v14, %v2404_v42  ;;  %v2408_v42 = vadd.f32 %v2407_v45, %v1394_v32  ;;  %v882_v14 = vld [vmem:[#allocation5 + $0x168] sm:$0xff] }
 0x344   :  { %1218 = vmatmul.bf16.gmra.mxu2 %v4234_v19  ;;  %v1887_v6 = vrot.slane %v1886_v26, 2 }
 0x345   :  { %v2776_v19 = vsel %vm2691_vm7, %v2406_v23, %v2775_v40 }
 0x346   :  { %2826 = vst [vmem:[#allocation11 + $0x60] sm:$0xff] %v2776_v19 }
 0x347   :  { %v1179_v52 = vpop.f32.mrf.mxu2 }
 0x348   :  { %v1396_v8 = vpop.f32.mrf.mxu3 }
 0x349   :  { %v1523_v11 = vpop.f32.mrf.mxu0  ;;  %v1693_v16 = vpop.f32.mrf.mxu1  ;;  %v2413_v34 = vrot.slane %v1396_v8, 4 }
 0x34a   :  { %2854 = vst [vmem:[#allocation13 + $0xc0] sm:$0xff] %v1523_v11 }
 0x34b   :  { %2922 = vst [vmem:[#allocation13 + $0x2e0] sm:$0xff] %v1693_v16  ;;  %v2414_v30 = vadd.f32 %v2413_v34, %v1396_v8  ;;  %v1888_v16 = vadd.f32 %v1887_v6, %v1886_v26 }
 0x34c   :  { %1562 = vmatmul.bf16.gmra.mxu0 %v4279_v18  ;;  %1732 = vmatmul.bf16.gmra.mxu1 %v4187_v46  ;;  %v4288_v46 = vpack.c.bf16 %v880_v54, %v879_v58 }
 0x34d   :  { %1438 = vmatmul.bf16.gmra.mxu3 %v4284_v38  ;;  %v1889_v9 = vrot.slane %v1888_v16, 1 }
 0x34f   :  { %v1181_v17 = vpop.f32.mrf.mxu2 }
 0x350   :  { %v1399_v55 = vpop.f32.mrf.mxu3  ;;  %v1897_v57 = vrot.slane %v1181_v17, 4 }
 0x351   :  { %v1525_v5 = vpop.f32.mrf.mxu0  ;;  %v1695_v51 = vpop.f32.mrf.mxu1  ;;  %v2419_v56 = vrot.slane %v1399_v55, 4 }
 0x352   :  { %2855 = vst [vmem:[#allocation13 + $0xc8] sm:$0xff] %v1525_v5  ;;  %v1898_v39 = vadd.f32 %v1897_v57, %v1181_v17  ;;  %v2409_v5 = vrot.slane %v2408_v42, 2 }
 0x353   :  { %2923 = vst [vmem:[#allocation13 + $0x2e8] sm:$0xff] %v1695_v51  ;;  %v2420_v1 = vadd.f32 %v2419_v56, %v1399_v55  ;;  %v2415_v51 = vrot.slane %v2414_v30, 2 }
 0x354   :  { %1223 = vmatmul.bf16.gmra.mxu2 %v4246_v37  ;;  %v1891_v37 = vrot.slane %v1179_v52, 4  ;;  %v1899_v19 = vrot.slane %v1898_v39, 2  ;;  %v2410_v25 = vadd.f32 %v2409_v5, %v2408_v42  ;;  %v1890_v42 = vadd.f32 %v1889_v9, %v1888_v16 }
 0x355   :  { %v2416_v26 = vadd.f32 %v2415_v51, %v2414_v30 }
 0x356   :  { %v1892_v3 = vadd.f32 %v1891_v37, %v1179_v52  ;;  %v1900_v35 = vadd.f32 %v1899_v19, %v1898_v39  ;;  %v2421_v37 = vrot.slane %v2420_v1, 2 }
 0x357   :  { %v1184_v27 = vpop.f32.mrf.mxu2 }
 0x358   :  { %v1401_v20 = vpop.f32.mrf.mxu3  ;;  %v1903_v62 = vrot.slane %v1184_v27, 4  ;;  %v1893_v11 = vrot.slane %v1892_v3, 2  ;;  %v1901_v6 = vrot.slane %v1900_v35, 1  ;;  %v2422_v56 = vadd.f32 %v2421_v37, %v2420_v1 }
 0x359   :  { %v1528_v59 = vpop.f32.mrf.mxu0  ;;  %v1698_v21 = vpop.f32.mrf.mxu1  ;;  %v2425_v52 = vrot.slane %v1401_v20, 4 }
 0x35a   :  { %2856 = vst [vmem:[#allocation13 + $0xd0] sm:$0xff] %v1528_v59  ;;  %v1904_v4 = vadd.f32 %v1903_v62, %v1184_v27  ;;  %v1894_v59 = vadd.f32 %v1893_v11, %v1892_v3  ;;  %v964_v3 = vld [vmem:[#allocation5 + $0x3f8] sm:$0xff]  ;;  %v2423_v5 = vrot.slane %v2422_v56, 1 }
 0x35b   :  { %2924 = vst [vmem:[#allocation13 + $0x2f0] sm:$0xff] %v1698_v21  ;;  %v2426_v21 = vadd.f32 %v2425_v52, %v1401_v20 }
 0x35c   :  { %1567 = vmatmul.bf16.gmra.mxu0 %v4288_v46  ;;  %1737 = vmatmul.bf16.gmra.mxu1 %v4196_v13  ;;  %v1880_v13 = vadd.f32 %v1879_v61, %v4256_v33  ;;  %v1905_v17 = vrot.slane %v1904_v4, 2 }
 0x35d   :  { %1443 = vmatmul.bf16.gmra.mxu3 %v4295_v22 }
 0x35e   :  { %v1881_v23 = vrot.slane %v1880_v13, 2  ;;  %v1906_v55 = vadd.f32 %v1905_v17, %v1904_v4  ;;  %v1902_v17 = vadd.f32 %v1901_v6, %v1900_v35 }
 0x35f   :  { %v1186_v47 = vpop.f32.mrf.mxu2 }
 0x360   :  { %v1909_v50 = vrot.slane %v1186_v47, 4  ;;  %v1404_v40 = vpop.f32.mrf.mxu3  ;;  %v1882_v27 = vadd.f32 %v1881_v23, %v1880_v13  ;;  %v963_v13 = vld [vmem:[#allocation5 + $0x3f0] sm:$0xff]  ;;  %v1907_v30 = vrot.slane %v1906_v55, 1 }
 0x361   :  { %v1530_v44 = vpop.f32.mrf.mxu0  ;;  %v1700_v43 = vpop.f32.mrf.mxu1  ;;  %v4304_v4 = vpack.c.bf16 %v964_v3, %v963_v13 }
 0x362   :  { %2857 = vst [vmem:[#allocation13 + $0xd8] sm:$0xff] %v1530_v44  ;;  %v1910_v29 = vadd.f32 %v1909_v50, %v1186_v47  ;;  %v2431_v47 = vrot.slane %v1404_v40, 4  ;;  %v1883_v34 = vrot.slane %v1882_v27, 1  ;;  %v1895_v50 = vrot.slane %v1894_v59, 1 }
 0x363   :  { %2925 = vst [vmem:[#allocation13 + $0x2f8] sm:$0xff] %v1700_v43  ;;  %v2427_v43 = vrot.slane %v2426_v21, 2 }
 0x364   :  { %1228 = vmatmul.bf16.gmra.mxu2 %v4261_v60  ;;  %v4300_v60 = vpack.c.bf16 %v882_v14, %v881_v0  ;;  %v1911_v58 = vrot.slane %v1910_v29, 2  ;;  %v2432_v62 = vadd.f32 %v2431_v47, %v1404_v40  ;;  %v2411_v0 = vrot.slane %v2410_v25, 1 }
 0x365   :  { %v2417_v14 = vrot.slane %v2416_v26, 1  ;;  %v1896_v52 = vadd.f32 %v1895_v50, %v1894_v59  ;;  %v883_v59 = vld [vmem:[#allocation5 + $0x170] sm:$0xff] }
 0x366   :  { %v1912_v57 = vadd.f32 %v1911_v58, %v1910_v29  ;;  %v2433_v11 = vrot.slane %v2432_v62, 2  ;;  %v1908_v58 = vadd.f32 %v1907_v30, %v1906_v55 }
 0x367   :  { %v1189_v33 = vpop.f32.mrf.mxu2 }
 0x368   :  { %v1915_v41 = vrot.slane %v1189_v33, 4  ;;  %v1406_v45 = vpop.f32.mrf.mxu3  ;;  %v2434_v37 = vadd.f32 %v2433_v11, %v2432_v62 }
 0x369   :  { %v1533_v8 = vpop.f32.mrf.mxu0  ;;  %v1703_v54 = vpop.f32.mrf.mxu1  ;;  %v2437_v16 = vrot.slane %v1406_v45, 4 }
 0x36a   :  { %v1916_v32 = vadd.f32 %v1915_v41, %v1189_v33  ;;  %2858 = vst [vmem:[#allocation13 + $0xe0] sm:$0xff] %v1533_v8  ;;  %v1884_v33 = vadd.f32 %v1883_v34, %v1882_v27  ;;  %v2428_v41 = vadd.f32 %v2427_v43, %v2426_v21  ;;  %v2418_v8 = vadd.f32 %v2417_v14, %v2416_v26 }
 0x36b   :  { %2926 = vst [vmem:[#allocation13 + $0x300] sm:$0xff] %v1703_v54  ;;  %v2438_v21 = vadd.f32 %v2437_v16, %v1406_v45  ;;  %v2424_v43 = vadd.f32 %v2423_v5, %v2422_v56 }
 0x36c   :  { %v1917_v61 = vrot.slane %v1916_v32, 2  ;;  %1572 = vmatmul.bf16.gmra.mxu0 %v4300_v60  ;;  %1742 = vmatmul.bf16.gmra.mxu1 %v4218_v31  ;;  %v1913_v31 = vrot.slane %v1912_v57, 1  ;;  %v2700_v51 = vsel %vm2679_vm1, %v1890_v42, %v1884_v33  ;;  %v2429_v50 = vrot.slane %v2428_v41, 1 }
 0x36d   :  { %1448 = vmatmul.bf16.gmra.mxu3 %v4304_v4  ;;  %v2701_v35 = vsel %vm2681_vm2, %v1896_v52, %v2700_v51  ;;  %v2439_v55 = vrot.slane %v2438_v21, 2 }
 0x36e   :  { %v1918_v44 = vadd.f32 %v1917_v61, %v1916_v32  ;;  %v2412_v32 = vadd.f32 %v2411_v0, %v2410_v25  ;;  %v1914_v54 = vadd.f32 %v1913_v31, %v1912_v57  ;;  %v884_v61 = vld [vmem:[#allocation5 + $0x178] sm:$0xff]  ;;  %v2430_v42 = vadd.f32 %v2429_v50, %v2428_v41 }
 0x36f   :  { %v1191_v20 = vpop.f32.mrf.mxu2  ;;  %v4315_v57 = vpack.c.bf16 %v884_v61, %v883_v59  ;;  %v2440_v6 = vadd.f32 %v2439_v55, %v2438_v21 }
 0x370   :  { %v1921_v39 = vrot.slane %v1191_v20, 4  ;;  %v1919_v19 = vrot.slane %v1918_v44, 1  ;;  %v1409_v47 = vpop.f32.mrf.mxu3  ;;  %v2777_v26 = vsel %vm2679_vm1, %v2418_v8, %v2412_v32  ;;  %v885_v8 = vld [vmem:[#allocation5 + $0x180] sm:$0xff] }
 0x371   :  { %v1535_v40 = vpop.f32.mrf.mxu0  ;;  %v1705_v23 = vpop.f32.mrf.mxu1  ;;  %v2778_v30 = vsel %vm2681_vm2, %v2424_v43, %v2777_v26  ;;  %v2443_v0 = vrot.slane %v1409_v47, 4  ;;  %v2441_v14 = vrot.slane %v2440_v6, 1  ;;  %v888_v26 = vld [vmem:[#allocation5 + $0x198] sm:$0xff] }
 0x372   :  { %v1922_v29 = vadd.f32 %v1921_v39, %v1191_v20  ;;  %2859 = vst [vmem:[#allocation13 + $0xe8] sm:$0xff] %v1535_v40  ;;  %v1920_v9 = vadd.f32 %v1919_v19, %v1918_v44  ;;  %v2435_v44 = vrot.slane %v2434_v37, 1 }
 0x373   :  { %2927 = vst [vmem:[#allocation13 + $0x308] sm:$0xff] %v1705_v23  ;;  %v2779_v23 = vsel %vm2683_vm3, %v2430_v42, %v2778_v30  ;;  %v2442_v19 = vadd.f32 %v2441_v14, %v2440_v6 }
 0x374   :  { %v1923_v1 = vrot.slane %v1922_v29, 2  ;;  %1233 = vmatmul.bf16.gmra.mxu2 %v4279_v18  ;;  %v2702_v18 = vsel %vm2683_vm3, %v1902_v17, %v2701_v35  ;;  %v2436_v31 = vadd.f32 %v2435_v44, %v2434_v37 }
 0x375   :  { %v2703_v25 = vsel %vm2685_vm4, %v1908_v58, %v2702_v18 }
 0x376   :  { %v1924_v27 = vadd.f32 %v1923_v1, %v1922_v29  ;;  %v2704_v62 = vsel %vm2687_vm5, %v1914_v54, %v2703_v25  ;;  %v2444_v29 = vadd.f32 %v2443_v0, %v1409_v47  ;;  %v2780_v5 = vsel %vm2685_vm4, %v2436_v31, %v2779_v23  ;;  %v886_v54 = vld [vmem:[#allocation5 + $0x188] sm:$0xff]  ;;  %v887_v25 = vld [vmem:[#allocation5 + $0x190] sm:$0xff] }
 0x377   :  { %v4310_v34 = vpop.f32.mrf.mxu2  ;;  %v2705_v39 = vsel %vm2689_vm6, %v1920_v9, %v2704_v62  ;;  %v2781_v58 = vsel %vm2687_vm5, %v2442_v19, %v2780_v5  ;;  %v4328_v47 = vpack.c.bf16 %v886_v54, %v885_v8 }
 0x378   :  { %v1925_v20 = vrot.slane %v1924_v27, 1  ;;  %v1411_v40 = vpop.f32.mrf.mxu3  ;;  %v2445_v52 = vrot.slane %v2444_v29, 2 }
 0x379   :  { %v1538_v13 = vpop.f32.mrf.mxu0  ;;  %v1708_v3 = vpop.f32.mrf.mxu1  ;;  %v2449_v33 = vrot.slane %v1411_v40, 4 }
 0x37a   :  { %v1926_v45 = vadd.f32 %v1925_v20, %v1924_v27  ;;  %2860 = vst [vmem:[#allocation13 + $0xf0] sm:$0xff] %v1538_v13  ;;  %v2446_v16 = vadd.f32 %v2445_v52, %v2444_v29  ;;  %v4334_v13 = vpack.c.bf16 %v888_v26, %v887_v25 }
 0x37b   :  { %2928 = vst [vmem:[#allocation13 + $0x310] sm:$0xff] %v1708_v3  ;;  %v2450_v41 = vadd.f32 %v2449_v33, %v1411_v40 }
 0x37c   :  { %v2706_v56 = vsel %vm2691_vm7, %v1926_v45, %v2705_v39  ;;  %1577 = vmatmul.bf16.gmra.mxu0 %v4315_v57  ;;  %1747 = vmatmul.bf16.gmra.mxu1 %v4230_v24  ;;  %v2447_v24 = vrot.slane %v2446_v16, 1  ;;  %v1927_v39 = vrot.slane %v4310_v34, 4 }
 0x37d   :  { %2816 = vst [vmem:[#allocation11 + $0x10] sm:$0xff] %v2706_v56  ;;  %v2451_v51 = vrot.slane %v2450_v41, 2 }
 0x37e   :  { %v2448_v27 = vadd.f32 %v2447_v24, %v2446_v16  ;;  %v1928_v33 = vadd.f32 %v1927_v39, %v4310_v34 }
 0x37f   :  { %v1196_v11 = vpop.f32.mrf.mxu2  ;;  %v2452_v32 = vadd.f32 %v2451_v51, %v2450_v41 }
 0x380   :  { %v1414_v59 = vpop.f32.mrf.mxu3  ;;  %v2782_v21 = vsel %vm2689_vm6, %v2448_v27, %v2781_v58  ;;  %v1929_v51 = vrot.slane %v1928_v33, 2 }
 0x381   :  { %v1540_v17 = vpop.f32.mrf.mxu0  ;;  %v1710_v1 = vpop.f32.mrf.mxu1  ;;  %v2453_v37 = vrot.slane %v2452_v32, 1  ;;  %v2455_v14 = vrot.slane %v1414_v59, 4 }
 0x382   :  { %2861 = vst [vmem:[#allocation13 + $0xf8] sm:$0xff] %v1540_v17 }
 0x383   :  { %2929 = vst [vmem:[#allocation13 + $0x318] sm:$0xff] %v1710_v1  ;;  %v2454_v35 = vadd.f32 %v2453_v37, %v2452_v32  ;;  %v2456_v1 = vadd.f32 %v2455_v14, %v1414_v59 }
 0x384   :  { %1238 = vmatmul.bf16.gmra.mxu2 %v4288_v46 }
 0x385   :  { %v2783_v46 = vsel %vm2691_vm7, %v2454_v35, %v2782_v21  ;;  %v2457_v37 = vrot.slane %v2456_v1, 2 }
 0x386   :  { %2827 = vst [vmem:[#allocation11 + $0x68] sm:$0xff] %v2783_v46  ;;  %v1930_v46 = vadd.f32 %v1929_v51, %v1928_v33 }
 0x387   :  { %v1199_v61 = vpop.f32.mrf.mxu2 }
 0x388   :  { %v1416_v18 = vpop.f32.mrf.mxu3  ;;  %v1939_v42 = vrot.slane %v1199_v61, 4 }
 0x389   :  { %v1543_v9 = vpop.f32.mrf.mxu0  ;;  %v1713_v50 = vpop.f32.mrf.mxu1  ;;  %v2461_v31 = vrot.slane %v1416_v18, 4 }
 0x38a   :  { %2862 = vst [vmem:[#allocation13 + $0x100] sm:$0xff] %v1543_v9  ;;  %v1940_v52 = vadd.f32 %v1939_v42, %v1199_v61  ;;  %v1931_v42 = vrot.slane %v1930_v46, 1 }
 0x38b   :  { %2930 = vst [vmem:[#allocation13 + $0x320] sm:$0xff] %v1713_v50  ;;  %v2462_v5 = vadd.f32 %v2461_v31, %v1416_v18 }
 0x38c   :  { %1582 = vmatmul.bf16.gmra.mxu0 %v4328_v47  ;;  %1752 = vmatmul.bf16.gmra.mxu1 %v4241_v49  ;;  %v1933_v49 = vrot.slane %v1196_v11, 4  ;;  %v1941_v24 = vrot.slane %v1940_v52, 2 }
 0x38d   :  { %v2463_v21 = vrot.slane %v2462_v5, 2 }
 0x38e   :  { %v1934_v30 = vadd.f32 %v1933_v49, %v1196_v11  ;;  %v1942_v59 = vadd.f32 %v1941_v24, %v1940_v52 }
 0x38f   :  { %v1201_v20 = vpop.f32.mrf.mxu2 }
 0x390   :  { %v1419_v62 = vpop.f32.mrf.mxu3  ;;  %v1945_v56 = vrot.slane %v1201_v20, 4  ;;  %v1935_v41 = vrot.slane %v1934_v30, 2 }
 0x391   :  { %v1545_v43 = vpop.f32.mrf.mxu0  ;;  %v1715_v55 = vpop.f32.mrf.mxu1 }
 0x392   :  { %2863 = vst [vmem:[#allocation13 + $0x108] sm:$0xff] %v1545_v43  ;;  %v1946_v19 = vadd.f32 %v1945_v56, %v1201_v20  ;;  %v1936_v27 = vadd.f32 %v1935_v41, %v1934_v30  ;;  %v1932_v41 = vadd.f32 %v1931_v42, %v1930_v46 }
 0x393   :  { %2931 = vst [vmem:[#allocation13 + $0x328] sm:$0xff] %v1715_v55 }
 0x394   :  { %1243 = vmatmul.bf16.gmra.mxu2 %v4300_v60  ;;  %v1947_v8 = vrot.slane %v1946_v19, 2  ;;  %v1937_v26 = vrot.slane %v1936_v27, 1 }
 0x396   :  { %v1948_v20 = vadd.f32 %v1947_v8, %v1946_v19 }
 0x397   :  { %v1204_v45 = vpop.f32.mrf.mxu2 }
 0x398   :  { %v1421_v6 = vpop.f32.mrf.mxu3  ;;  %v1951_v0 = vrot.slane %v1204_v45, 4 }
 0x399   :  { %v1548_v3 = vpop.f32.mrf.mxu0  ;;  %v1718_v44 = vpop.f32.mrf.mxu1  ;;  %v2473_v32 = vrot.slane %v1421_v6, 4 }
 0x39a   :  { %2864 = vst [vmem:[#allocation13 + $0x110] sm:$0xff] %v1548_v3  ;;  %v1952_v17 = vadd.f32 %v1951_v0, %v1204_v45  ;;  %v2464_v3 = vadd.f32 %v2463_v21, %v2462_v5  ;;  %v1949_v0 = vrot.slane %v1948_v20, 1 }
 0x39b   :  { %2932 = vst [vmem:[#allocation13 + $0x330] sm:$0xff] %v1718_v44  ;;  %v2474_v18 = vadd.f32 %v2473_v32, %v1421_v6 }
 0x39c   :  { %1587 = vmatmul.bf16.gmra.mxu0 %v4334_v13  ;;  %1757 = vmatmul.bf16.gmra.mxu1 %v4250_v28  ;;  %v2467_v28 = vrot.slane %v1419_v62, 4  ;;  %v1953_v61 = vrot.slane %v1952_v17, 2  ;;  %v2465_v33 = vrot.slane %v2464_v3, 1 }
 0x39d   :  { %v2475_v30 = vrot.slane %v2474_v18, 2 }
 0x39e   :  { %v2468_v34 = vadd.f32 %v2467_v28, %v1419_v62  ;;  %v1954_v45 = vadd.f32 %v1953_v61, %v1952_v17  ;;  %v2458_v62 = vadd.f32 %v2457_v37, %v2456_v1 }
 0x39f   :  { %v1206_v60 = vpop.f32.mrf.mxu2  ;;  %v2476_v5 = vadd.f32 %v2475_v30, %v2474_v18 }
 0x3a0   :  { %v1957_v29 = vrot.slane %v1206_v60, 4  ;;  %v1424_v16 = vpop.f32.mrf.mxu3  ;;  %v2469_v55 = vrot.slane %v2468_v34, 2 }
 0x3a1   :  { %v1550_v40 = vpop.f32.mrf.mxu0  ;;  %v1720_v23 = vpop.f32.mrf.mxu1  ;;  %v2479_v25 = vrot.slane %v1424_v16, 4 }
 0x3a2   :  { %2865 = vst [vmem:[#allocation13 + $0x118] sm:$0xff] %v1550_v40  ;;  %v1958_v11 = vadd.f32 %v1957_v29, %v1206_v60  ;;  %v1943_v60 = vrot.slane %v1942_v59, 1  ;;  %v2470_v31 = vadd.f32 %v2469_v55, %v2468_v34  ;;  %v1938_v29 = vadd.f32 %v1937_v26, %v1936_v27 }
 0x3a3   :  { %2933 = vst [vmem:[#allocation13 + $0x338] sm:$0xff] %v1720_v23  ;;  %v2480_v49 = vadd.f32 %v2479_v25, %v1424_v16  ;;  %v1955_v40 = vrot.slane %v1954_v45, 1  ;;  %v2459_v23 = vrot.slane %v2458_v62, 1 }
 0x3a4   :  { %1248 = vmatmul.bf16.gmra.mxu2 %v4315_v57  ;;  %v1959_v35 = vrot.slane %v1958_v11, 2  ;;  %v1944_v17 = vadd.f32 %v1943_v60, %v1942_v59  ;;  %v2471_v51 = vrot.slane %v2470_v31, 1 }
 0x3a5   :  { %v1956_v32 = vadd.f32 %v1955_v40, %v1954_v45  ;;  %v2460_v8 = vadd.f32 %v2459_v23, %v2458_v62 }
 0x3a6   :  { %v1960_v44 = vadd.f32 %v1959_v35, %v1958_v11  ;;  %v1950_v11 = vadd.f32 %v1949_v0, %v1948_v20  ;;  %v2472_v59 = vadd.f32 %v2471_v51, %v2470_v31 }
 0x3a7   :  { %v1209_v58 = vpop.f32.mrf.mxu2 }
 0x3a8   :  { %v1963_v54 = vrot.slane %v1209_v58, 4  ;;  %v1426_v39 = vpop.f32.mrf.mxu3  ;;  %v1961_v52 = vrot.slane %v1960_v44, 1 }
 0x3a9   :  { %v1553_v9 = vpop.f32.mrf.mxu0  ;;  %v1723_v50 = vpop.f32.mrf.mxu1  ;;  %v2485_v24 = vrot.slane %v1426_v39, 4 }
 0x3aa   :  { %v1964_v57 = vadd.f32 %v1963_v54, %v1209_v58  ;;  %2866 = vst [vmem:[#allocation13 + $0x120] sm:$0xff] %v1553_v9  ;;  %v2707_v58 = vsel %vm2679_vm1, %v1938_v29, %v1932_v41  ;;  %v2466_v54 = vadd.f32 %v2465_v33, %v2464_v3  ;;  %v1962_v34 = vadd.f32 %v1961_v52, %v1960_v44 }
 0x3ab   :  { %2934 = vst [vmem:[#allocation13 + $0x340] sm:$0xff] %v1723_v50  ;;  %v2486_v37 = vadd.f32 %v2485_v24, %v1426_v39  ;;  %v2708_v35 = vsel %vm2681_vm2, %v1944_v17, %v2707_v58  ;;  %v2477_v50 = vrot.slane %v2476_v5, 1 }
 0x3ac   :  { %v1965_v43 = vrot.slane %v1964_v57, 2  ;;  %1592 = vmatmul.bf16.gmra.mxu0 %v3745_v12  ;;  %1762 = vmatmul.bf16.gmra.mxu1 %v4272_v48  ;;  %v2481_v48 = vrot.slane %v2480_v49, 2  ;;  %v2709_v46 = vsel %vm2683_vm3, %v1950_v11, %v2708_v35 }
 0x3ad   :  { %v2487_v18 = vrot.slane %v2486_v37, 2  ;;  %v2710_v20 = vsel %vm2685_vm4, %v1956_v32, %v2709_v46 }
 0x3ae   :  { %v1966_v56 = vadd.f32 %v1965_v43, %v1964_v57  ;;  %v2482_v61 = vadd.f32 %v2481_v48, %v2480_v49  ;;  %v2784_v43 = vsel %vm2679_vm1, %v2466_v54, %v2460_v8  ;;  %v2711_v55 = vsel %vm2687_vm5, %v1962_v34, %v2710_v20 }
 0x3af   :  { %v1211_v6 = vpop.f32.mrf.mxu2  ;;  %v2488_v3 = vadd.f32 %v2487_v18, %v2486_v37  ;;  %v2478_v49 = vadd.f32 %v2477_v50, %v2476_v5  ;;  %v2785_v42 = vsel %vm2681_vm2, %v2472_v59, %v2784_v43 }
 0x3b0   :  { %v1969_v14 = vrot.slane %v1211_v6, 4  ;;  %v1967_v1 = vrot.slane %v1966_v56, 1  ;;  %v1429_v21 = vpop.f32.mrf.mxu3  ;;  %v2483_v62 = vrot.slane %v2482_v61, 1 }
 0x3b1   :  { %v1555_v12 = vpop.f32.mrf.mxu0  ;;  %v1725_v28 = vpop.f32.mrf.mxu1  ;;  %v2491_v60 = vrot.slane %v1429_v21, 4 }
 0x3b2   :  { %v1970_v19 = vadd.f32 %v1969_v14, %v1211_v6  ;;  %2867 = vst [vmem:[#allocation13 + $0x128] sm:$0xff] %v1555_v12  ;;  %v1968_v57 = vadd.f32 %v1967_v1, %v1966_v56  ;;  %v2489_v56 = vrot.slane %v2488_v3, 1  ;;  %v2484_v6 = vadd.f32 %v2483_v62, %v2482_v61 }
 0x3b3   :  { %2935 = vst [vmem:[#allocation13 + $0x348] sm:$0xff] %v1725_v28  ;;  %v2492_v30 = vadd.f32 %v2491_v60, %v1429_v21  ;;  %v2786_v14 = vsel %vm2683_vm3, %v2478_v49, %v2785_v42 }
 0x3b4   :  { %v1971_v16 = vrot.slane %v1970_v19, 2  ;;  %1253 = vmatmul.bf16.gmra.mxu2 %v4328_v47  ;;  %v2712_v44 = vsel %vm2689_vm6, %v1968_v57, %v2711_v55  ;;  %v2490_v23 = vadd.f32 %v2489_v56, %v2488_v3  ;;  %v2787_v12 = vsel %vm2685_vm4, %v2484_v6, %v2786_v14 }
 0x3b5   :  { %v2493_v40 = vrot.slane %v2492_v30, 2 }
 0x3b6   :  { %v1972_v27 = vadd.f32 %v1971_v16, %v1970_v19  ;;  %v2788_v48 = vsel %vm2687_vm5, %v2490_v23, %v2787_v12 }
 0x3b7   :  { %v4346_v9 = vpop.f32.mrf.mxu2  ;;  %v2494_v28 = vadd.f32 %v2493_v40, %v2492_v30 }
 0x3b8   :  { %v1973_v47 = vrot.slane %v1972_v27, 1  ;;  %v1431_v0 = vpop.f32.mrf.mxu3 }
 0x3b9   :  { %v1558_v26 = vpop.f32.mrf.mxu0  ;;  %v1728_v45 = vpop.f32.mrf.mxu1  ;;  %v2497_v29 = vrot.slane %v1431_v0, 4 }
 0x3ba   :  { %v1974_v25 = vadd.f32 %v1973_v47, %v1972_v27  ;;  %2868 = vst [vmem:[#allocation13 + $0x130] sm:$0xff] %v1558_v26 }
 0x3bb   :  { %2936 = vst [vmem:[#allocation13 + $0x350] sm:$0xff] %v1728_v45  ;;  %v2498_v33 = vadd.f32 %v2497_v29, %v1431_v0 }
 0x3bc   :  { %v2713_v39 = vsel %vm2691_vm7, %v1974_v25, %v2712_v44  ;;  %1597 = vmatmul.bf16.gmra.mxu0 %v3822_v36  ;;  %1767 = vmatmul.bf16.gmra.mxu1 %v4284_v38  ;;  %v2495_v38 = vrot.slane %v2494_v28, 1 }
 0x3bd   :  { %2817 = vst [vmem:[#allocation11 + $0x18] sm:$0xff] %v2713_v39  ;;  %v2499_v36 = vrot.slane %v2498_v33, 2 }
 0x3be   :  { %v2496_v17 = vadd.f32 %v2495_v38, %v2494_v28 }
 0x3bf   :  { %v1216_v31 = vpop.f32.mrf.mxu2  ;;  %v2500_v41 = vadd.f32 %v2499_v36, %v2498_v33 }
 0x3c0   :  { %v1434_v1 = vpop.f32.mrf.mxu3  ;;  %v2789_v16 = vsel %vm2689_vm6, %v2496_v17, %v2788_v48  ;;  %v1981_v35 = vrot.slane %v1216_v31, 4 }
 0x3c1   :  { %v1560_v52 = vpop.f32.mrf.mxu0  ;;  %v1730_v19 = vpop.f32.mrf.mxu1  ;;  %v2501_v11 = vrot.slane %v2500_v41, 1  ;;  %v2503_v18 = vrot.slane %v1434_v1, 4 }
 0x3c2   :  { %2869 = vst [vmem:[#allocation13 + $0x138] sm:$0xff] %v1560_v52  ;;  %v1982_v47 = vadd.f32 %v1981_v35, %v1216_v31 }
 0x3c3   :  { %2937 = vst [vmem:[#allocation13 + $0x358] sm:$0xff] %v1730_v19  ;;  %v2502_v51 = vadd.f32 %v2501_v11, %v2500_v41  ;;  %v2504_v44 = vadd.f32 %v2503_v18, %v1434_v1 }
 0x3c4   :  { %1258 = vmatmul.bf16.gmra.mxu2 %v4334_v13  ;;  %v1983_v62 = vrot.slane %v1982_v47, 2 }
 0x3c5   :  { %v2790_v32 = vsel %vm2691_vm7, %v2502_v51, %v2789_v16  ;;  %v2505_v40 = vrot.slane %v2504_v44, 2 }
 0x3c6   :  { %2828 = vst [vmem:[#allocation11 + $0x70] sm:$0xff] %v2790_v32  ;;  %v1984_v31 = vadd.f32 %v1983_v62, %v1982_v47 }
 0x3c7   :  { %v1219_v5 = vpop.f32.mrf.mxu2  ;;  %v2506_v16 = vadd.f32 %v2505_v40, %v2504_v44 }
 0x3c8   :  { %v1436_v13 = vpop.f32.mrf.mxu3  ;;  %v1987_v57 = vrot.slane %v1219_v5, 4 }
 0x3c9   :  { %v1563_v24 = vpop.f32.mrf.mxu0  ;;  %v1733_v58 = vpop.f32.mrf.mxu1  ;;  %v2509_v20 = vrot.slane %v1436_v13, 4 }
 0x3ca   :  { %2870 = vst [vmem:[#allocation13 + $0x140] sm:$0xff] %v1563_v24  ;;  %v1988_v45 = vadd.f32 %v1987_v57, %v1219_v5  ;;  %v1985_v5 = vrot.slane %v1984_v31, 1 }
 0x3cb   :  { %2938 = vst [vmem:[#allocation13 + $0x360] sm:$0xff] %v1733_v58  ;;  %v2510_v49 = vadd.f32 %v2509_v20, %v1436_v13 }
 0x3cc   :  { %1602 = vmatmul.bf16.gmra.mxu0 %v3874_v15  ;;  %1772 = vmatmul.bf16.gmra.mxu1 %v4295_v22  ;;  %v1975_v22 = vrot.slane %v4346_v9, 4  ;;  %v1989_v60 = vrot.slane %v1988_v45, 2  ;;  %v1986_v35 = vadd.f32 %v1985_v5, %v1984_v31 }
 0x3cd   :  { %v2511_v23 = vrot.slane %v2510_v49, 2 }
 0x3ce   :  { %v1976_v26 = vadd.f32 %v1975_v22, %v4346_v9  ;;  %v1990_v36 = vadd.f32 %v1989_v60, %v1988_v45  ;;  %v2507_v22 = vrot.slane %v2506_v16, 1 }
 0x3cf   :  { %v1221_v8 = vpop.f32.mrf.mxu2  ;;  %v2512_v51 = vadd.f32 %v2511_v23, %v2510_v49 }
 0x3d0   :  { %v1439_v27 = vpop.f32.mrf.mxu3  ;;  %v1993_v46 = vrot.slane %v1221_v8, 4  ;;  %v1977_v9 = vrot.slane %v1976_v26, 2  ;;  %v2508_v44 = vadd.f32 %v2507_v22, %v2506_v16 }
 0x3d1   :  { %v1565_v54 = vpop.f32.mrf.mxu0  ;;  %v1735_v34 = vpop.f32.mrf.mxu1  ;;  %v2513_v57 = vrot.slane %v2512_v51, 1 }
 0x3d2   :  { %2871 = vst [vmem:[#allocation13 + $0x148] sm:$0xff] %v1565_v54  ;;  %v1978_v28 = vadd.f32 %v1977_v9, %v1976_v26 }
 0x3d3   :  { %2939 = vst [vmem:[#allocation13 + $0x368] sm:$0xff] %v1735_v34  ;;  %v2514_v49 = vadd.f32 %v2513_v57, %v2512_v51 }
 0x3d4   :  { %v1979_v13 = vrot.slane %v1978_v28, 1 }
 0x3d6   :  { %v1980_v20 = vadd.f32 %v1979_v13, %v1978_v28 }
 0x3d7   :  { %v1224_v61 = vpop.f32.mrf.mxu2 }
 0x3d8   :  { %v1441_v15 = vpop.f32.mrf.mxu3  ;;  %v1999_v59 = vrot.slane %v1224_v61, 4  ;;  %v2714_v62 = vsel %vm2679_vm1, %v1986_v35, %v1980_v20 }
 0x3d9   :  { %v1568_v37 = vpop.f32.mrf.mxu0  ;;  %v1738_v21 = vpop.f32.mrf.mxu1  ;;  %v2521_v6 = vrot.slane %v1441_v15, 4 }
 0x3da   :  { %2872 = vst [vmem:[#allocation13 + $0x150] sm:$0xff] %v1568_v37  ;;  %v2000_v3 = vadd.f32 %v1999_v59, %v1224_v61 }
 0x3db   :  { %2940 = vst [vmem:[#allocation13 + $0x370] sm:$0xff] %v1738_v21  ;;  %v2522_v38 = vadd.f32 %v2521_v6, %v1441_v15 }
 0x3dc   :  { %1607 = vmatmul.bf16.gmra.mxu0 %v3894_v7  ;;  %1777 = vmatmul.bf16.gmra.mxu1 %v4304_v4  ;;  %v1994_v7 = vadd.f32 %v1993_v46, %v1221_v8  ;;  %v2515_v4 = vrot.slane %v1439_v27, 4  ;;  %v2001_v29 = vrot.slane %v2000_v3, 2  ;;  %v1991_v8 = vrot.slane %v1990_v36, 1 }
 0x3de   :  { %v1995_v30 = vrot.slane %v1994_v7, 2  ;;  %v2516_v14 = vadd.f32 %v2515_v4, %v1439_v27  ;;  %v2002_v11 = vadd.f32 %v2001_v29, %v2000_v3  ;;  %v2523_v27 = vrot.slane %v2522_v38, 2 }
 0x3df   :  { %v1226_v50 = vpop.f32.mrf.mxu2 }
 0x3e0   :  { %v2005_v43 = vrot.slane %v1226_v50, 4  ;;  %v1444_v42 = vpop.f32.mrf.mxu3  ;;  %v1996_v48 = vadd.f32 %v1995_v30, %v1994_v7  ;;  %v2517_v17 = vrot.slane %v2516_v14, 2  ;;  %v2003_v15 = vrot.slane %v2002_v11, 1 }
 0x3e1   :  { %v1570_v55 = vpop.f32.mrf.mxu0  ;;  %v1740_v25 = vpop.f32.mrf.mxu1  ;;  %v2527_v1 = vrot.slane %v1444_v42, 4 }
 0x3e2   :  { %2873 = vst [vmem:[#allocation13 + $0x158] sm:$0xff] %v1570_v55  ;;  %v2006_v39 = vadd.f32 %v2005_v43, %v1226_v50  ;;  %v1997_v61 = vrot.slane %v1996_v48, 1  ;;  %v2518_v21 = vadd.f32 %v2517_v17, %v2516_v14  ;;  %v1992_v43 = vadd.f32 %v1991_v8, %v1990_v36 }
 0x3e3   :  { %2941 = vst [vmem:[#allocation13 + $0x378] sm:$0xff] %v1740_v25  ;;  %v2528_v58 = vadd.f32 %v2527_v1, %v1444_v42  ;;  %v2524_v25 = vadd.f32 %v2523_v27, %v2522_v38  ;;  %v2004_v3 = vadd.f32 %v2003_v15, %v2002_v11 }
 0x3e4   :  { %v2007_v33 = vrot.slane %v2006_v39, 2  ;;  %v1998_v26 = vadd.f32 %v1997_v61, %v1996_v48  ;;  %v2519_v7 = vrot.slane %v2518_v21, 1  ;;  %v2715_v6 = vsel %vm2681_vm2, %v1992_v43, %v2714_v62 }
 0x3e5   :  { %v2529_v18 = vrot.slane %v2528_v58, 2  ;;  %v2525_v14 = vrot.slane %v2524_v25, 1 }
 0x3e6   :  { %v2008_v24 = vadd.f32 %v2007_v33, %v2006_v39  ;;  %v2716_v31 = vsel %vm2683_vm3, %v1998_v26, %v2715_v6  ;;  %v2520_v40 = vadd.f32 %v2519_v7, %v2518_v21 }
 0x3e7   :  { %v1229_v56 = vpop.f32.mrf.mxu2  ;;  %v2530_v9 = vadd.f32 %v2529_v18, %v2528_v58  ;;  %v2717_v33 = vsel %vm2685_vm4, %v2004_v3, %v2716_v31  ;;  %v2526_v17 = vadd.f32 %v2525_v14, %v2524_v25 }
 0x3e8   :  { %v2011_v0 = vrot.slane %v1229_v56, 4  ;;  %v1446_v32 = vpop.f32.mrf.mxu3  ;;  %v2009_v50 = vrot.slane %v2008_v24, 1 }
 0x3e9   :  { %v1573_v19 = vpop.f32.mrf.mxu0  ;;  %v1743_v12 = vpop.f32.mrf.mxu1  ;;  %v2533_v4 = vrot.slane %v1446_v32, 4  ;;  %v2531_v38 = vrot.slane %v2530_v9, 1 }
 0x3ea   :  { %v2012_v52 = vadd.f32 %v2011_v0, %v1229_v56  ;;  %2874 = vst [vmem:[#allocation13 + $0x160] sm:$0xff] %v1573_v19  ;;  %v2010_v39 = vadd.f32 %v2009_v50, %v2008_v24 }
 0x3eb   :  { %2942 = vst [vmem:[#allocation13 + $0x380] sm:$0xff] %v1743_v12  ;;  %v2534_v60 = vadd.f32 %v2533_v4, %v1446_v32  ;;  %v2532_v51 = vadd.f32 %v2531_v38, %v2530_v9 }
 0x3ec   :  { %v2013_v41 = vrot.slane %v2012_v52, 2  ;;  %v2718_v19 = vsel %vm2687_vm5, %v2010_v39, %v2717_v33 }
 0x3ed   :  { %v2535_v23 = vrot.slane %v2534_v60, 2 }
 0x3ee   :  { %v2014_v54 = vadd.f32 %v2013_v41, %v2012_v52  ;;  %v2791_v52 = vsel %vm2679_vm1, %v2514_v49, %v2508_v44 }
 0x3ef   :  { %v1231_v34 = vpop.f32.mrf.mxu2  ;;  %v2536_v48 = vadd.f32 %v2535_v23, %v2534_v60  ;;  %v2792_v5 = vsel %vm2681_vm2, %v2520_v40, %v2791_v52 }
 0x3f0   :  { %v2017_v37 = vrot.slane %v1231_v34, 4  ;;  %v2015_v55 = vrot.slane %v2014_v54, 1  ;;  %v1449_v56 = vpop.f32.mrf.mxu3  ;;  %v2793_v32 = vsel %vm2683_vm3, %v2526_v17, %v2792_v5 }
 0x3f1   :  { %v1575_v47 = vpop.f32.mrf.mxu0  ;;  %v1745_v59 = vpop.f32.mrf.mxu1  ;;  %v2539_v11 = vrot.slane %v1449_v56, 4  ;;  %v2537_v16 = vrot.slane %v2536_v48, 1  ;;  %v2794_v21 = vsel %vm2685_vm4, %v2532_v51, %v2793_v32 }
 0x3f2   :  { %v2018_v46 = vadd.f32 %v2017_v37, %v1231_v34  ;;  %2875 = vst [vmem:[#allocation13 + $0x168] sm:$0xff] %v1575_v47  ;;  %v2016_v30 = vadd.f32 %v2015_v55, %v2014_v54 }
 0x3f3   :  { %2943 = vst [vmem:[#allocation13 + $0x388] sm:$0xff] %v1745_v59  ;;  %v2540_v24 = vadd.f32 %v2539_v11, %v1449_v56  ;;  %v2538_v34 = vadd.f32 %v2537_v16, %v2536_v48 }
 0x3f4   :  { %v2019_v45 = vrot.slane %v2018_v46, 2  ;;  %v2719_v41 = vsel %vm2689_vm6, %v2016_v30, %v2718_v19 }
 0x3f5   :  { %v2541_v54 = vrot.slane %v2540_v24, 2  ;;  %v2795_v57 = vsel %vm2687_vm5, %v2538_v34, %v2794_v21 }
 0x3f6   :  { %v2020_v42 = vadd.f32 %v2019_v45, %v2018_v46 }
 0x3f7   :  { %v4374_v0 = vpop.f32.mrf.mxu2  ;;  %v2542_v35 = vadd.f32 %v2541_v54, %v2540_v24 }
 0x3f8   :  { %v2021_v29 = vrot.slane %v2020_v42, 1  ;;  %v1451_v58 = vpop.f32.mrf.mxu3 }
 0x3f9   :  { %v1578_v28 = vpop.f32.mrf.mxu0  ;;  %v1748_v36 = vpop.f32.mrf.mxu1  ;;  %v2545_v8 = vrot.slane %v1451_v58, 4  ;;  %v2543_v22 = vrot.slane %v2542_v35, 1 }
 0x3fa   :  { %v2022_v12 = vadd.f32 %v2021_v29, %v2020_v42  ;;  %2876 = vst [vmem:[#allocation13 + $0x170] sm:$0xff] %v1578_v28  ;;  %v2023_v42 = vrot.slane %v4374_v0, 4 }
 0x3fb   :  { %2944 = vst [vmem:[#allocation13 + $0x390] sm:$0xff] %v1748_v36  ;;  %v2546_v27 = vadd.f32 %v2545_v8, %v1451_v58  ;;  %v2544_v46 = vadd.f32 %v2543_v22, %v2542_v35 }
 0x3fc   :  { %v2720_v1 = vsel %vm2691_vm7, %v2022_v12, %v2719_v41  ;;  %v2024_v29 = vadd.f32 %v2023_v42, %v4374_v0 }
 0x3fd   :  { %2818 = vst [vmem:[#allocation11 + $0x20] sm:$0xff] %v2720_v1  ;;  %v2547_v15 = vrot.slane %v2546_v27, 2  ;;  %v2796_v18 = vsel %vm2689_vm6, %v2544_v46, %v2795_v57 }
 0x3fe   :  { %v2025_v28 = vrot.slane %v2024_v29, 2 }
 0x3ff   :  { %v1236_v13 = vpop.f32.mrf.mxu2  ;;  %v2548_v50 = vadd.f32 %v2547_v15, %v2546_v27 }
 0x400   :  { %v2029_v44 = vrot.slane %v1236_v13, 4  ;;  %v2026_v51 = vadd.f32 %v2025_v28, %v2024_v29  ;;  %v2107_v28 = vrot.slane %v4010_v53, 4 }
 0x401   :  { %v1580_v61 = vpop.f32.mrf.mxu0  ;;  %v1750_v37 = vpop.f32.mrf.mxu1  ;;  %v2549_v59 = vrot.slane %v2548_v50, 1 }
 0x402   :  { %2877 = vst [vmem:[#allocation13 + $0x178] sm:$0xff] %v1580_v61  ;;  %v2030_v56 = vadd.f32 %v2029_v44, %v1236_v13  ;;  %v2027_v27 = vrot.slane %v2026_v51, 1 }
 0x403   :  { %2945 = vst [vmem:[#allocation13 + $0x398] sm:$0xff] %v1750_v37  ;;  %v2550_v20 = vadd.f32 %v2549_v59, %v2548_v50 }
 0x404   :  { %v2031_v33 = vrot.slane %v2030_v56, 2  ;;  %v2028_v59 = vadd.f32 %v2027_v27, %v2026_v51  ;;  %v2108_v51 = vadd.f32 %v2107_v28, %v4010_v53 }
 0x405   :  { %v2797_v25 = vsel %vm2691_vm7, %v2550_v20, %v2796_v18 }
 0x406   :  { %2829 = vst [vmem:[#allocation11 + $0x78] sm:$0xff] %v2797_v25  ;;  %v2032_v41 = vadd.f32 %v2031_v33, %v2030_v56  ;;  %v2109_v27 = vrot.slane %v2108_v51, 2 }
 0x407   :  { %v1239_v47 = vpop.f32.mrf.mxu2 }
 0x408   :  { %v2035_v49 = vrot.slane %v1239_v47, 4  ;;  %v2033_v32 = vrot.slane %v2032_v41, 1 }
 0x409   :  { %v1583_v43 = vpop.f32.mrf.mxu0  ;;  %v1753_v55 = vpop.f32.mrf.mxu1 }
 0x40a   :  { %2878 = vst [vmem:[#allocation13 + $0x180] sm:$0xff] %v1583_v43  ;;  %v2036_v31 = vadd.f32 %v2035_v49, %v1239_v47  ;;  %v2034_v35 = vadd.f32 %v2033_v32, %v2032_v41 }
 0x40b   :  { %2946 = vst [vmem:[#allocation13 + $0x3a0] sm:$0xff] %v1753_v55 }
 0x40c   :  { %v2037_v19 = vrot.slane %v2036_v31, 2  ;;  %v2721_v55 = vsel %vm2679_vm1, %v2034_v35, %v2028_v59 }
 0x40e   :  { %v2038_v16 = vadd.f32 %v2037_v19, %v2036_v31 }
 0x40f   :  { %v1241_v26 = vpop.f32.mrf.mxu2 }
 0x410   :  { %v2041_v9 = vrot.slane %v1241_v26, 4  ;;  %v2039_v8 = vrot.slane %v2038_v16, 1 }
 0x411   :  { %v1585_v45 = vpop.f32.mrf.mxu0  ;;  %v1755_v7 = vpop.f32.mrf.mxu1 }
 0x412   :  { %2879 = vst [vmem:[#allocation13 + $0x188] sm:$0xff] %v1585_v45  ;;  %v2042_v40 = vadd.f32 %v2041_v9, %v1241_v26  ;;  %v2040_v46 = vadd.f32 %v2039_v8, %v2038_v16 }
 0x413   :  { %2947 = vst [vmem:[#allocation13 + $0x3a8] sm:$0xff] %v1755_v7 }
 0x414   :  { %v2043_v36 = vrot.slane %v2042_v40, 2  ;;  %v2722_v45 = vsel %vm2681_vm2, %v2040_v46, %v2721_v55 }
 0x416   :  { %v2044_v0 = vadd.f32 %v2043_v36, %v2042_v40  ;;  %v2113_v36 = vrot.slane %v4015_v63, 4 }
 0x417   :  { %v1244_v4 = vpop.f32.mrf.mxu2 }
 0x418   :  { %v2047_v60 = vrot.slane %v1244_v4, 4  ;;  %v2045_v61 = vrot.slane %v2044_v0, 1 }
 0x419   :  { %v1588_v62 = vpop.f32.mrf.mxu0  ;;  %v1758_v3 = vpop.f32.mrf.mxu1 }
 0x41a   :  { %2880 = vst [vmem:[#allocation13 + $0x190] sm:$0xff] %v1588_v62  ;;  %v2048_v23 = vadd.f32 %v2047_v60, %v1244_v4  ;;  %v2046_v18 = vadd.f32 %v2045_v61, %v2044_v0  ;;  %v2114_v0 = vadd.f32 %v2113_v36, %v4015_v63  ;;  %v2110_v63 = vadd.f32 %v2109_v27, %v2108_v51 }
 0x41b   :  { %2948 = vst [vmem:[#allocation13 + $0x3b0] sm:$0xff] %v1758_v3 }
 0x41c   :  { %v2049_v48 = vrot.slane %v2048_v23, 2  ;;  %v2723_v62 = vsel %vm2683_vm3, %v2046_v18, %v2722_v45  ;;  %v2115_v61 = vrot.slane %v2114_v0, 2 }
 0x41e   :  { %v2050_v58 = vadd.f32 %v2049_v48, %v2048_v23  ;;  %v2095_v23 = vrot.slane %v3989_v2, 4 }
 0x41f   :  { %v1246_v39 = vpop.f32.mrf.mxu2 }
 0x420   :  { %v2053_v6 = vrot.slane %v1246_v39, 4  ;;  %v2051_v21 = vrot.slane %v2050_v58, 1 }
 0x421   :  { %v1590_v30 = vpop.f32.mrf.mxu0  ;;  %v1760_v14 = vpop.f32.mrf.mxu1 }
 0x422   :  { %2881 = vst [vmem:[#allocation13 + $0x198] sm:$0xff] %v1590_v30  ;;  %v2054_v52 = vadd.f32 %v2053_v6, %v1246_v39  ;;  %v2052_v43 = vadd.f32 %v2051_v21, %v2050_v58 }
 0x423   :  { %2949 = vst [vmem:[#allocation13 + $0x3b8] sm:$0xff] %v1760_v14 }
 0x424   :  { %v2055_v17 = vrot.slane %v2054_v52, 2  ;;  %v2724_v44 = vsel %vm2685_vm4, %v2052_v43, %v2723_v62 }
 0x426   :  { %v2056_v13 = vadd.f32 %v2055_v17, %v2054_v52  ;;  %v2101_v52 = vrot.slane %v4000_v10, 4 }
 0x427   :  { %v1249_v12 = vpop.f32.mrf.mxu2 }
 0x428   :  { %v2059_v38 = vrot.slane %v1249_v12, 4  ;;  %v2057_v15 = vrot.slane %v2056_v13, 1 }
 0x429   :  { %v1593_v5 = vpop.f32.mrf.mxu0  ;;  %v1763_v11 = vpop.f32.mrf.mxu1 }
 0x42a   :  { %v2060_v1 = vadd.f32 %v2059_v38, %v1249_v12  ;;  %2882 = vst [vmem:[#allocation13 + $0x1a0] sm:$0xff] %v1593_v5  ;;  %v2058_v25 = vadd.f32 %v2057_v15, %v2056_v13  ;;  %v2102_v5 = vadd.f32 %v2101_v52, %v4000_v10 }
 0x42b   :  { %2950 = vst [vmem:[#allocation13 + $0x3c0] sm:$0xff] %v1763_v11 }
 0x42c   :  { %v2061_v24 = vrot.slane %v2060_v1, 2  ;;  %v2725_v49 = vsel %vm2687_vm5, %v2058_v25, %v2724_v44  ;;  %v2103_v8 = vrot.slane %v2102_v5, 2  ;;  %v2111_v25 = vrot.slane %v2110_v63, 1 }
 0x42e   :  { %v2062_v54 = vadd.f32 %v2061_v24, %v2060_v1  ;;  %v2096_v1 = vadd.f32 %v2095_v23, %v3989_v2 }
 0x42f   :  { %v1251_v34 = vpop.f32.mrf.mxu2 }
 0x430   :  { %v2065_v37 = vrot.slane %v1251_v34, 4  ;;  %v2063_v47 = vrot.slane %v2062_v54, 1  ;;  %v2097_v58 = vrot.slane %v2096_v1, 2 }
 0x431   :  { %v1595_v57 = vpop.f32.mrf.mxu0  ;;  %v1765_v50 = vpop.f32.mrf.mxu1 }
 0x432   :  { %v2066_v22 = vadd.f32 %v2065_v37, %v1251_v34  ;;  %2883 = vst [vmem:[#allocation13 + $0x1a8] sm:$0xff] %v1595_v57  ;;  %v2064_v7 = vadd.f32 %v2063_v47, %v2062_v54  ;;  %v2098_v35 = vadd.f32 %v2097_v58, %v2096_v1 }
 0x433   :  { %2951 = vst [vmem:[#allocation13 + $0x3c8] sm:$0xff] %v1765_v50  ;;  %v2116_v50 = vadd.f32 %v2115_v61, %v2114_v0 }
 0x434   :  { %v2067_v20 = vrot.slane %v2066_v22, 2  ;;  %v2726_v60 = vsel %vm2689_vm6, %v2064_v7, %v2725_v49  ;;  %v2099_v59 = vrot.slane %v2098_v35, 1 }
 0x436   :  { %v2068_v26 = vadd.f32 %v2067_v20, %v2066_v22  ;;  %v2104_v22 = vadd.f32 %v2103_v8, %v2102_v5 }
 0x437   :  { %v1254_v4 = vpop.f32.mrf.mxu2 }
 0x438   :  { %v2069_v3 = vrot.slane %v2068_v26, 1  ;;  %v2071_v29 = vrot.slane %v1254_v4, 4  ;;  %v2105_v20 = vrot.slane %v2104_v22, 1 }
 0x439   :  { %v1598_v42 = vpop.f32.mrf.mxu0  ;;  %v1768_v9 = vpop.f32.mrf.mxu1 }
 0x43a   :  { %v2070_v39 = vadd.f32 %v2069_v3, %v2068_v26  ;;  %2884 = vst [vmem:[#allocation13 + $0x1b0] sm:$0xff] %v1598_v42  ;;  %v2072_v19 = vadd.f32 %v2071_v29, %v1254_v4  ;;  %v2117_v26 = vrot.slane %v2116_v50, 1  ;;  %v2100_v3 = vadd.f32 %v2099_v59, %v2098_v35 }
 0x43b   :  { %2952 = vst [vmem:[#allocation13 + $0x3d0] sm:$0xff] %v1768_v9  ;;  %v2106_v49 = vadd.f32 %v2105_v20, %v2104_v22  ;;  %v2112_v42 = vadd.f32 %v2111_v25, %v2110_v63 }
 0x43c   :  { %v2727_v56 = vsel %vm2691_vm7, %v2070_v39, %v2726_v60  ;;  %v2073_v11 = vrot.slane %v2072_v19, 2  ;;  %v2118_v60 = vadd.f32 %v2117_v26, %v2116_v50 }
 0x43d   :  { %2819 = vst [vmem:[#allocation11 + $0x28] sm:$0xff] %v2727_v56 }
 0x43e   :  { %v2074_v54 = vadd.f32 %v2073_v11, %v2072_v19 }
 0x43f   :  { %v1256_v6 = vpop.f32.mrf.mxu2 }
 0x440   :  { %v2077_v30 = vrot.slane %v1256_v6, 4  ;;  %v2075_v53 = vrot.slane %v2074_v54, 1 }
 0x441   :  { %v1600_v14 = vpop.f32.mrf.mxu0  ;;  %v1770_v31 = vpop.f32.mrf.mxu1 }
 0x442   :  { %2885 = vst [vmem:[#allocation13 + $0x1b8] sm:$0xff] %v1600_v14  ;;  %v2078_v40 = vadd.f32 %v2077_v30, %v1256_v6  ;;  %v2076_v43 = vadd.f32 %v2075_v53, %v2074_v54 }
 0x443   :  { %2953 = vst [vmem:[#allocation13 + $0x3d8] sm:$0xff] %v1770_v31 }
 0x444   :  { %v2079_v38 = vrot.slane %v2078_v40, 2 }
 0x446   :  { %v2080_v24 = vadd.f32 %v2079_v38, %v2078_v40 }
 0x447   :  { %v1259_v33 = vpop.f32.mrf.mxu2 }
 0x448   :  { %v2083_v12 = vrot.slane %v1259_v33, 4  ;;  %v2081_v2 = vrot.slane %v2080_v24, 1 }
 0x449   :  { %v1603_v41 = vpop.f32.mrf.mxu0  ;;  %v1773_v17 = vpop.f32.mrf.mxu1 }
 0x44a   :  { %v2084_v48 = vadd.f32 %v2083_v12, %v1259_v33  ;;  %2886 = vst [vmem:[#allocation13 + $0x1c0] sm:$0xff] %v1603_v41  ;;  %v2082_v46 = vadd.f32 %v2081_v2, %v2080_v24 }
 0x44b   :  { %2954 = vst [vmem:[#allocation13 + $0x3e0] sm:$0xff] %v1773_v17 }
 0x44c   :  { %v2085_v16 = vrot.slane %v2084_v48, 2  ;;  %v2728_v45 = vsel %vm2679_vm1, %v2082_v46, %v2076_v43 }
 0x44e   :  { %v2086_v32 = vadd.f32 %v2085_v16, %v2084_v48 }
 0x44f   :  { %v1261_v13 = vpop.f32.mrf.mxu2 }
 0x450   :  { %v2089_v34 = vrot.slane %v1261_v13, 4  ;;  %v2087_v15 = vrot.slane %v2086_v32, 1 }
 0x451   :  { %v1605_v21 = vpop.f32.mrf.mxu0  ;;  %v1775_v10 = vpop.f32.mrf.mxu1 }
 0x452   :  { %v2090_v37 = vadd.f32 %v2089_v34, %v1261_v13  ;;  %2887 = vst [vmem:[#allocation13 + $0x1c8] sm:$0xff] %v1605_v21  ;;  %v2088_v18 = vadd.f32 %v2087_v15, %v2086_v32 }
 0x453   :  { %2955 = vst [vmem:[#allocation13 + $0x3e8] sm:$0xff] %v1775_v10 }
 0x454   :  { %v2091_v57 = vrot.slane %v2090_v37, 2  ;;  %v2729_v44 = vsel %vm2681_vm2, %v2088_v18, %v2728_v45 }
 0x456   :  { %v2092_v47 = vadd.f32 %v2091_v57, %v2090_v37 }
 0x458   :  { %v2093_v55 = vrot.slane %v2092_v47, 1 }
 0x459   :  { %v1608_v4 = vpop.f32.mrf.mxu0  ;;  %v1778_v62 = vpop.f32.mrf.mxu1 }
 0x45a   :  { %v2094_v7 = vadd.f32 %v2093_v55, %v2092_v47  ;;  %2888 = vst [vmem:[#allocation13 + $0x1d0] sm:$0xff] %v1608_v4 }
 0x45b   :  { %2956 = vst [vmem:[#allocation13 + $0x3f0] sm:$0xff] %v1778_v62 }
 0x45c   :  { %v2730_v39 = vsel %vm2683_vm3, %v2094_v7, %v2729_v44 }
 0x45d   :  { %v2731_v9 = vsel %vm2685_vm4, %v2100_v3, %v2730_v39 }
 0x45e   :  { %v2732_v56 = vsel %vm2687_vm5, %v2106_v49, %v2731_v9 }
 0x45f   :  { %v2733_v6 = vsel %vm2689_vm6, %v2112_v42, %v2732_v56 }
 0x460   :  { %v2734_v30 = vsel %vm2691_vm7, %v2118_v60, %v2733_v6 }
 0x461   :  { %2820 = vst [vmem:[#allocation11 + $0x30] sm:$0xff] %v2734_v30  ;;  %v1610_v14 = vpop.f32.mrf.mxu0  ;;  %v1780_v31 = vpop.f32.mrf.mxu1 }
 0x462   :  { %2983 = dma.vmem_to_hbm [thread:$0]  %s2976_s12, 2048, %s2978_s17, [#allocation12], %s3467_s13, %s3467_s13, %s3468_s14   ;;  %2889 = vst [vmem:[#allocation13 + $0x1d8] sm:$0xff] %v1610_v14 }
 0x463   :  { %2957 = vst [vmem:[#allocation13 + $0x3f8] sm:$0xff] %v1780_v31 }
 0x464   :  { %2996 = dma.vmem_to_hbm [thread:$0]  %s2989_s1, 16384, %s2991_s20, [#allocation12], %s3467_s13, %s3467_s13, %s3468_s14  }
 0x465   :  { %3462 = dma.done.wait [#allocation4], 6144  }
 0x466   :  { %3463 = vsyncadd [#allocation4], 4294961152 }
 0x467   :  { %3464 = dma.done.wait [#allocation12], 18432  }
 0x468   :  { %3465 = vsyncadd [#allocation12], 4294948864 }
 0x469   :  { %3009 = vsyncpa [#allocation3], 1 }
 0x46a   :  { %3010 = vsyncpa [#allocation6], 1 }
 0x46b   :  { %3011 = vsyncpa [#allocation9], 1 }
 0x46c   :  { %3012 = vsyncpa [#allocation4], 1 }
 0x46d   :  { %3013 = vsyncpa [#allocation12], 1 }

</bundles_post_ra>
